<compile_context>
chip_gen: v5e
topology: v5e:2x2
jax: 0.10.0
libtpu: 0.0.40
codegen_flags: <defaults>
</compile_context>

<pallas_src>
import functools
import math

import jax
import jax.numpy as jnp
from jax import lax
from jax.experimental import pallas as pl
from jax.experimental.pallas import tpu as pltpu

_BN_EPS = 1e-5


def _round_up(x, m):
    return (x + m - 1) // m * m


# ---------------------------------------------------------------------------
# Pallas kernel: fused 3x3 reflect-pad conv with the 9 taps packed into the
# MXU contraction dim (single matmul per image, K = 9*Cin_p), plus per-image
# per-channel sum / sum-of-squares for train-mode BatchNorm.
# One grid step = NB images (all channels).
# ---------------------------------------------------------------------------
def _conv_stats_kernel(xp_ref, w_ref, y_ref, s_ref, sq_ref, rhs_ref,
                       *, H, W, Wp, NB, Cin_p):
    L = H * Wp
    # Lane-validity mask (pad columns of each Wp-strided row) — used only for
    # the statistics reductions; the stored activation keeps garbage pad cols.
    cols = lax.broadcasted_iota(jnp.int32, (1, L), 1) % Wp
    valid = cols < W

    offsets = [ki * Wp + kj for ki in range(3) for kj in range(3)]
    for b in range(NB):                       # static sub-batch loop
        # Pack the 9 shifted tap slices into one (9*Cin_p, L) RHS in VMEM.
        for t, off in enumerate(offsets):
            rhs_ref[t * Cin_p:(t + 1) * Cin_p, :] = xp_ref[b, :, off:off + L]
        # Single MXU matmul: (Cout_p, 9*Cin_p) x (9*Cin_p, L) -> f32 acc.
        acc = jnp.dot(w_ref[...], rhs_ref[...],
                      preferred_element_type=jnp.float32)
        y_ref[b] = acc.astype(y_ref.dtype)    # bf16 intermediate to HBM
        s_ref[b] = jnp.sum(jnp.where(valid, acc, 0.0), axis=1, keepdims=True)
        sq_ref[b] = jnp.sum(jnp.where(valid, acc * acc, 0.0),
                            axis=1, keepdims=True)


def _conv_stats_pallas(xp, wk, *, H, W, Wp, NB, Cin_p, Cout_p):
    N, _, Lin = xp.shape
    L = H * Wp
    K = 9 * Cin_p
    kernel = functools.partial(_conv_stats_kernel,
                               H=H, W=W, Wp=Wp, NB=NB, Cin_p=Cin_p)

    # VMEM budget derived from the actual blocks (double-buffered in/out +
    # single-buffered scratch), clamped to stay v7x-friendly (64 MiB phys).
    in_bytes = NB * Cin_p * Lin * 2 + Cout_p * K * 2
    out_bytes = NB * Cout_p * L * 2 + 2 * NB * Cout_p * 4
    scratch_bytes = K * L * 2
    need = 2 * (in_bytes + out_bytes) + scratch_bytes
    vmem_limit = int(min(max(2 * need + (2 << 20), 8 << 20), 28 << 20))

    flops = 2 * N * Cout_p * K * L
    bytes_accessed = (xp.size * 2 + wk.size * 2
                      + N * Cout_p * L * 2 + 2 * N * Cout_p * 4)

    return pl.pallas_call(
        kernel,
        out_shape=(
            jax.ShapeDtypeStruct((N, Cout_p, L), jnp.bfloat16),  # conv out (Wp-strided rows)
            jax.ShapeDtypeStruct((N, Cout_p, 1), jnp.float32),   # per-image channel sum
            jax.ShapeDtypeStruct((N, Cout_p, 1), jnp.float32),   # per-image channel sumsq
        ),
        grid=(N // NB,),
        in_specs=[
            pl.BlockSpec((NB, Cin_p, Lin), lambda n: (n, 0, 0)),
            pl.BlockSpec((Cout_p, K), lambda n: (0, 0)),
        ],
        out_specs=(
            pl.BlockSpec((NB, Cout_p, L), lambda n: (n, 0, 0)),
            pl.BlockSpec((NB, Cout_p, 1), lambda n: (n, 0, 0)),
            pl.BlockSpec((NB, Cout_p, 1), lambda n: (n, 0, 0)),
        ),
        scratch_shapes=[pltpu.VMEM((K, L), jnp.bfloat16)],
        compiler_params=pltpu.CompilerParams(
            dimension_semantics=("parallel",),
            vmem_limit_bytes=vmem_limit),
        cost_estimate=pl.CostEstimate(
            flops=flops, transcendentals=0, bytes_accessed=bytes_accessed),
    )(xp, wk)


# ---------------------------------------------------------------------------
# One Conv2d(3x3, reflect) -> BatchNorm2d(train) -> (ReLU) layer.
# The conv is the Pallas kernel; BN fold + ReLU + pad-strip + the next
# layer's pad/cast prologue are plain XLA so they fuse into one pass.
# ---------------------------------------------------------------------------
def _conv_bn_relu_layer(x, w, gamma, beta, apply_relu, out_dtype):
    N, Cx, H, W = x.shape
    Cout, Cin = w.shape[0], w.shape[1]
    Cin_p = _round_up(Cin, 16)       # bf16 packs 16 rows per vreg sublane group
    Cout_p = _round_up(Cout, 16)
    Hp, Wp = H + 2, W + 2
    L = H * Wp                       # flattened output rows keep the Wp stride
    Lin = Hp * Wp + 2                # +2 so tap (2,2) on the last pad column is in-bounds

    # --- XLA prologue (fuses): reflect pad, flatten, channel/tail pad, bf16.
    xp = jnp.pad(x, ((0, 0), (0, 0), (1, 1), (1, 1)), mode="reflect")
    xp = xp.reshape(N, Cx, Hp * Wp)
    xp = jnp.pad(xp, ((0, 0), (0, Cin_p - Cx), (0, Lin - Hp * Wp)))
    xp = xp.astype(jnp.bfloat16)

    # Weights (Cout, Cin, 3, 3) -> (Cout_p, 9*Cin_p); K order = (tap, cin).
    w_p = jnp.pad(w, ((0, Cout_p - Cout), (0, Cin_p - Cin), (0, 0), (0, 0)))
    wk = jnp.transpose(w_p, (0, 2, 3, 1)).reshape(Cout_p, 9 * Cin_p)
    wk = wk.astype(jnp.bfloat16)

    NB = math.gcd(N, 8)              # images per grid step (divides N)
    y, s, sq = _conv_stats_pallas(xp, wk, H=H, W=W, Wp=Wp,
                                  NB=NB, Cin_p=Cin_p, Cout_p=Cout_p)

    # --- Train-mode BatchNorm statistics folded into per-channel scale/shift.
    count = float(N * H * W)
    mean = jnp.sum(s, axis=0)[:, 0] / count
    ex2 = jnp.sum(sq, axis=0)[:, 0] / count
    var = jnp.maximum(ex2 - mean * mean, 0.0)     # biased var (BN train forward)
    gamma_p = jnp.pad(gamma, (0, Cout_p - Cout), constant_values=1.0)
    beta_p = jnp.pad(beta, (0, Cout_p - Cout))
    scale = (gamma_p * lax.rsqrt(var + _BN_EPS)).astype(jnp.float32)
    shift = (beta_p - mean * scale).astype(jnp.float32)

    # --- XLA epilogue (fuses with the next layer's prologue):
    # strip the 2 pad columns, single FMA per element, ReLU, cast.
    z = y.astype(jnp.float32).reshape(N, Cout_p, H, Wp)[:, :, :, :W]
    z = z * scale[None, :, None, None] + shift[None, :, None, None]
    if apply_relu:
        z = jnp.maximum(z, 0.0)
    # Padded output channels are exactly zero (zero weights -> acc 0, shift 0),
    # so they can be carried into the next layer's (already padded) input.
    return z.astype(out_dtype)


def conv_block_forward(x, params, last_relu=True):
    """ConvBlock.forward: [Conv2d(3x3, reflect) -> BatchNorm2d -> ReLU] x layers."""
    squeeze_5d = x.ndim == 5
    if squeeze_5d:                   # TemporallySharedBlock.smart_forward (pad_value=None)
        b, t = x.shape[0], x.shape[1]
        x = x.reshape((b * t,) + x.shape[2:])

    n_layers = len(params)
    for i, (w, cb, gamma, beta) in enumerate(params):
        # Conv bias `cb` is intentionally unused: it is cancelled exactly by
        # the mean subtraction of training-mode BatchNorm.
        del cb
        apply_relu = last_relu or (i < n_layers - 1)
        is_last = i == n_layers - 1
        x = _conv_bn_relu_layer(
            x, w, gamma, beta, apply_relu,
            out_dtype=jnp.float32 if is_last else jnp.bfloat16)

    Cout = params[-1][0].shape[0]
    x = x[:, :Cout]                  # strip channel padding of the last layer
    if squeeze_5d:
        x = x.reshape((b, t) + x.shape[1:])
    return x


def init_params(key, nkernels):
    """Deterministic parameter init, shapes as in ConvLayer.__init__."""
    params = []
    for i in range(len(nkernels) - 1):
        cin, cout = nkernels[i], nkernels[i + 1]
        key, k1, k2, k3, k4 = jax.random.split(key, 5)
        w = jax.random.normal(k1, (cout, cin, 3, 3), jnp.float32) * 0.1
        cb = jax.random.normal(k2, (cout,), jnp.float32) * 0.1
        gamma = 1.0 + 0.1 * jax.random.normal(k3, (cout,), jnp.float32)
        beta = 0.1 * jax.random.normal(k4, (cout,), jnp.float32)
        params.append((w, cb, gamma, beta))
    return params


def _reference_forward(x, params, last_relu=True):
    """Pure-JAX/XLA reference of the PyTorch module (f32, includes the bias)."""
    n_layers = len(params)
    for i, (w, cb, gamma, beta) in enumerate(params):
        xp = jnp.pad(x, ((0, 0), (0, 0), (1, 1), (1, 1)), mode="reflect")
        y = lax.conv_general_dilated(xp, w, (1, 1), "VALID",
                                     dimension_numbers=("NCHW", "OIHW", "NCHW"))
        y = y + cb[None, :, None, None]
        mean = y.mean(axis=(0, 2, 3), keepdims=True)
        var = y.var(axis=(0, 2, 3), keepdims=True)
        y = (y - mean) * lax.rsqrt(var + _BN_EPS)
        y = y * gamma[None, :, None, None] + beta[None, :, None, None]
        if last_relu or (i < n_layers - 1):
            y = jnp.maximum(y, 0.0)
        x = y
    return x


if __name__ == "__main__":
    key = jax.random.PRNGKey(0)
    kx, kp = jax.random.split(key)

    nkernels = [4, 16, 32]                                    # ConvBlock(nkernels=[4,16,32])
    x = jax.random.normal(kx, (2, 4, 16, 16), jnp.float32)    # NCHW
    params = init_params(kp, nkernels)

    fwd = jax.jit(functools.partial(conv_block_forward, last_relu=True))
    out = jax.block_until_ready(fwd(x, params))
    assert out.shape == (2, nkernels[-1], 16, 16), out.shape

    ref = _reference_forward(x, params, last_relu=True)
    max_err = float(jnp.max(jnp.abs(out - ref)))
    assert max_err < 0.1, f"mismatch vs reference: max_err={max_err}"

    print("KERNEL_OK")
</pallas_src>

<mosaic_0001>
module attributes {stable_mosaic.version = 11 : i64} {
  func.func @_conv_stats_kernel(%arg0: i32, %arg1: memref<2x16x326xbf16, #tpu.memory_space<vmem>>, %arg2: memref<16x144xbf16, #tpu.memory_space<vmem>>, %arg3: memref<2x16x288xbf16, #tpu.memory_space<vmem>>, %arg4: memref<2x16x1xf32, #tpu.memory_space<vmem>>, %arg5: memref<2x16x1xf32, #tpu.memory_space<vmem>>, %arg6: memref<144x288xbf16, #tpu.memory_space<vmem>>) attributes {dimension_semantics = [#tpu.dimension_semantics<parallel>], iteration_bounds = array<i64: 1>, scalar_prefetch = 0 : i64, scratch_operands = 1 : i64, tpu.core_type = #tpu.core_type<tc>, window_params = [{transform_indices = @transform_0, window_bounds = array<i64: 2, 16, 326>}, {pipeline_mode = #tpu.pipeline_mode<synchronous>, transform_indices = @transform_1, window_bounds = array<i64: 16, 144>}, {transform_indices = @transform_2, window_bounds = array<i64: 2, 16, 288>}, {transform_indices = @transform_3, window_bounds = array<i64: 2, 16, 1>}, {transform_indices = @transform_4, window_bounds = array<i64: 2, 16, 1>}]} {
    %0 = tpu.iota {dimensions = array<i32: 1>} : vector<1x288xi32>
    %c18_i32 = arith.constant 18 : i32
    %c0_i32 = arith.constant 0 : i32
    %1 = arith.cmpi eq, %c18_i32, %c0_i32 : i32
    %c1_i32 = arith.constant 1 : i32
    %2 = arith.select %1, %c1_i32, %c18_i32 : i32
    %3 = vector.broadcast %2 : i32 to vector<1x288xi32>
    %4 = arith.remsi %0, %3 : vector<1x288xi32>
    %c0_i32_0 = arith.constant 0 : i32
    %5 = vector.broadcast %c0_i32_0 : i32 to vector<1x288xi32>
    %6 = arith.cmpi ne, %4, %5 : vector<1x288xi32>
    %c0_i32_1 = arith.constant 0 : i32
    %7 = vector.broadcast %c0_i32_1 : i32 to vector<1x288xi32>
    %8 = arith.cmpi slt, %4, %7 : vector<1x288xi32>
    %c0_i32_2 = arith.constant 0 : i32
    %9 = arith.cmpi slt, %2, %c0_i32_2 : i32
    %10 = vector.broadcast %9 : i1 to vector<1x288xi1>
    %11 = vector.broadcast %10 : vector<1x288xi1> to vector<1x288xi1>
    %12 = arith.xori %8, %11 : vector<1x288xi1>
    %13 = arith.andi %12, %6 : vector<1x288xi1>
    %14 = vector.broadcast %2 : i32 to vector<1x288xi32>
    %15 = arith.addi %4, %14 : vector<1x288xi32>
    %16 = arith.select %13, %15, %4 : vector<1x288xi1>, vector<1x288xi32>
    %c16_i32 = arith.constant 16 : i32
    %17 = vector.broadcast %c16_i32 : i32 to vector<1x288xi32>
    %18 = arith.cmpi slt, %16, %17 : vector<1x288xi32>
    %c0 = arith.constant 0 : index
    %c0_3 = arith.constant 0 : index
    %c0_4 = arith.constant 0 : index
    %19 = vector.load %arg1[%c0, %c0_3, %c0_4] : memref<2x16x326xbf16, #tpu.memory_space<vmem>>, vector<1x16x288xbf16>
    %20 = vector.shape_cast %19 : vector<1x16x288xbf16> to vector<16x288xbf16>
    %c0_5 = arith.constant 0 : index
    %c0_6 = arith.constant 0 : index
    %21 = vector.load %arg6[%c0_5, %c0_6] : memref<144x288xbf16, #tpu.memory_space<vmem>>, vector<16x288xbf16>
    tpu.vector_store %arg6[%c0_5, %c0_6], %20 {strides = array<i32>} : memref<144x288xbf16, #tpu.memory_space<vmem>>, vector<16x288xbf16>,
    %c0_7 = arith.constant 0 : index
    %c0_8 = arith.constant 0 : index
    %c1 = arith.constant 1 : index
    %22 = vector.load %arg1[%c0_7, %c0_8, %c1] : memref<2x16x326xbf16, #tpu.memory_space<vmem>>, vector<1x16x288xbf16>
    %23 = vector.shape_cast %22 : vector<1x16x288xbf16> to vector<16x288xbf16>
    %c16 = arith.constant 16 : index
    %c0_9 = arith.constant 0 : index
    %24 = vector.load %arg6[%c16, %c0_9] : memref<144x288xbf16, #tpu.memory_space<vmem>>, vector<16x288xbf16>
    tpu.vector_store %arg6[%c16, %c0_9], %23 {strides = array<i32>} : memref<144x288xbf16, #tpu.memory_space<vmem>>, vector<16x288xbf16>,
    %c0_10 = arith.constant 0 : index
    %c0_11 = arith.constant 0 : index
    %c2 = arith.constant 2 : index
    %25 = vector.load %arg1[%c0_10, %c0_11, %c2] : memref<2x16x326xbf16, #tpu.memory_space<vmem>>, vector<1x16x288xbf16>
    %26 = vector.shape_cast %25 : vector<1x16x288xbf16> to vector<16x288xbf16>
    %c32 = arith.constant 32 : index
    %c0_12 = arith.constant 0 : index
    %27 = vector.load %arg6[%c32, %c0_12] : memref<144x288xbf16, #tpu.memory_space<vmem>>, vector<16x288xbf16>
    tpu.vector_store %arg6[%c32, %c0_12], %26 {strides = array<i32>} : memref<144x288xbf16, #tpu.memory_space<vmem>>, vector<16x288xbf16>,
    %c0_13 = arith.constant 0 : index
    %c0_14 = arith.constant 0 : index
    %c18 = arith.constant 18 : index
    %28 = vector.load %arg1[%c0_13, %c0_14, %c18] : memref<2x16x326xbf16, #tpu.memory_space<vmem>>, vector<1x16x288xbf16>
    %29 = vector.shape_cast %28 : vector<1x16x288xbf16> to vector<16x288xbf16>
    %c48 = arith.constant 48 : index
    %c0_15 = arith.constant 0 : index
    %30 = vector.load %arg6[%c48, %c0_15] : memref<144x288xbf16, #tpu.memory_space<vmem>>, vector<16x288xbf16>
    tpu.vector_store %arg6[%c48, %c0_15], %29 {strides = array<i32>} : memref<144x288xbf16, #tpu.memory_space<vmem>>, vector<16x288xbf16>,
    %c0_16 = arith.constant 0 : index
    %c0_17 = arith.constant 0 : index
    %c19 = arith.constant 19 : index
    %31 = vector.load %arg1[%c0_16, %c0_17, %c19] : memref<2x16x326xbf16, #tpu.memory_space<vmem>>, vector<1x16x288xbf16>
    %32 = vector.shape_cast %31 : vector<1x16x288xbf16> to vector<16x288xbf16>
    %c64 = arith.constant 64 : index
    %c0_18 = arith.constant 0 : index
    %33 = vector.load %arg6[%c64, %c0_18] : memref<144x288xbf16, #tpu.memory_space<vmem>>, vector<16x288xbf16>
    tpu.vector_store %arg6[%c64, %c0_18], %32 {strides = array<i32>} : memref<144x288xbf16, #tpu.memory_space<vmem>>, vector<16x288xbf16>,
    %c0_19 = arith.constant 0 : index
    %c0_20 = arith.constant 0 : index
    %c20 = arith.constant 20 : index
    %34 = vector.load %arg1[%c0_19, %c0_20, %c20] : memref<2x16x326xbf16, #tpu.memory_space<vmem>>, vector<1x16x288xbf16>
    %35 = vector.shape_cast %34 : vector<1x16x288xbf16> to vector<16x288xbf16>
    %c80 = arith.constant 80 : index
    %c0_21 = arith.constant 0 : index
    %36 = vector.load %arg6[%c80, %c0_21] : memref<144x288xbf16, #tpu.memory_space<vmem>>, vector<16x288xbf16>
    tpu.vector_store %arg6[%c80, %c0_21], %35 {strides = array<i32>} : memref<144x288xbf16, #tpu.memory_space<vmem>>, vector<16x288xbf16>,
    %c0_22 = arith.constant 0 : index
    %c0_23 = arith.constant 0 : index
    %c36 = arith.constant 36 : index
    %37 = vector.load %arg1[%c0_22, %c0_23, %c36] : memref<2x16x326xbf16, #tpu.memory_space<vmem>>, vector<1x16x288xbf16>
    %38 = vector.shape_cast %37 : vector<1x16x288xbf16> to vector<16x288xbf16>
    %c96 = arith.constant 96 : index
    %c0_24 = arith.constant 0 : index
    %39 = vector.load %arg6[%c96, %c0_24] : memref<144x288xbf16, #tpu.memory_space<vmem>>, vector<16x288xbf16>
    tpu.vector_store %arg6[%c96, %c0_24], %38 {strides = array<i32>} : memref<144x288xbf16, #tpu.memory_space<vmem>>, vector<16x288xbf16>,
    %c0_25 = arith.constant 0 : index
    %c0_26 = arith.constant 0 : index
    %c37 = arith.constant 37 : index
    %40 = vector.load %arg1[%c0_25, %c0_26, %c37] : memref<2x16x326xbf16, #tpu.memory_space<vmem>>, vector<1x16x288xbf16>
    %41 = vector.shape_cast %40 : vector<1x16x288xbf16> to vector<16x288xbf16>
    %c112 = arith.constant 112 : index
    %c0_27 = arith.constant 0 : index
    %42 = vector.load %arg6[%c112, %c0_27] : memref<144x288xbf16, #tpu.memory_space<vmem>>, vector<16x288xbf16>
    tpu.vector_store %arg6[%c112, %c0_27], %41 {strides = array<i32>} : memref<144x288xbf16, #tpu.memory_space<vmem>>, vector<16x288xbf16>,
    %c0_28 = arith.constant 0 : index
    %c0_29 = arith.constant 0 : index
    %c38 = arith.constant 38 : index
    %43 = vector.load %arg1[%c0_28, %c0_29, %c38] : memref<2x16x326xbf16, #tpu.memory_space<vmem>>, vector<1x16x288xbf16>
    %44 = vector.shape_cast %43 : vector<1x16x288xbf16> to vector<16x288xbf16>
    %c128 = arith.constant 128 : index
    %c0_30 = arith.constant 0 : index
    %45 = vector.load %arg6[%c128, %c0_30] : memref<144x288xbf16, #tpu.memory_space<vmem>>, vector<16x288xbf16>
    tpu.vector_store %arg6[%c128, %c0_30], %44 {strides = array<i32>} : memref<144x288xbf16, #tpu.memory_space<vmem>>, vector<16x288xbf16>,
    %c0_31 = arith.constant 0 : index
    %c0_32 = arith.constant 0 : index
    %46 = vector.load %arg2[%c0_31, %c0_32] : memref<16x144xbf16, #tpu.memory_space<vmem>>, vector<16x144xbf16>
    %c0_33 = arith.constant 0 : index
    %c0_34 = arith.constant 0 : index
    %47 = vector.load %arg6[%c0_33, %c0_34] : memref<144x288xbf16, #tpu.memory_space<vmem>>, vector<144x288xbf16>
    %cst = arith.constant dense<0.000000e+00> : vector<16x288xf32>
    %48 = tpu.matmul %46, %47, %cst {dimension_numbers = #tpu.dot_dimension_numbers<[1], [0], [0], [1], [0, 0, 1, 1], [], []>} : vector<16x144xbf16>, vector<144x288xbf16>, vector<16x288xf32> -> vector<16x288xf32>
    %49 = arith.truncf %48 : vector<16x288xf32> to vector<16x288xbf16>
    %c0_35 = arith.constant 0 : index
    %c0_36 = arith.constant 0 : index
    %c0_37 = arith.constant 0 : index
    %50 = vector.load %arg3[%c0_35, %c0_36, %c0_37] : memref<2x16x288xbf16, #tpu.memory_space<vmem>>, vector<1x16x288xbf16>
    %51 = vector.shape_cast %50 : vector<1x16x288xbf16> to vector<16x288xbf16>
    %52 = vector.shape_cast %49 : vector<16x288xbf16> to vector<1x16x288xbf16>
    tpu.vector_store %arg3[%c0_35, %c0_36, %c0_37], %52 {strides = array<i32>} : memref<2x16x288xbf16, #tpu.memory_space<vmem>>, vector<1x16x288xbf16>,
    %cst_38 = arith.constant 0.000000e+00 : f32
    %53 = vector.shape_cast %18 : vector<1x288xi1> to vector<1x288xi1>
    %54 = vector.broadcast %53 : vector<1x288xi1> to vector<16x288xi1>
    %55 = vector.broadcast %cst_38 : f32 to vector<16x288xf32>
    %56 = arith.select %54, %48, %55 : vector<16x288xi1>, vector<16x288xf32>
    %cst_39 = arith.constant dense<0.000000e+00> : vector<16xf32>
    %57 = vector.multi_reduction <add>, %56, %cst_39 [1] : vector<16x288xf32> to vector<16xf32>
    %58 = vector.shape_cast %57 : vector<16xf32> to vector<16x1xf32>
    %c0_40 = arith.constant 0 : index
    %c0_41 = arith.constant 0 : index
    %c0_42 = arith.constant 0 : index
    %59 = vector.load %arg4[%c0_40, %c0_41, %c0_42] : memref<2x16x1xf32, #tpu.memory_space<vmem>>, vector<1x16x1xf32>
    %60 = vector.shape_cast %59 : vector<1x16x1xf32> to vector<16x1xf32>
    %61 = vector.shape_cast %58 : vector<16x1xf32> to vector<1x16x1xf32>
    tpu.vector_store %arg4[%c0_40, %c0_41, %c0_42], %61 {strides = array<i32>} : memref<2x16x1xf32, #tpu.memory_space<vmem>>, vector<1x16x1xf32>,
    %62 = arith.mulf %48, %48 : vector<16x288xf32>
    %cst_43 = arith.constant 0.000000e+00 : f32
    %63 = vector.shape_cast %18 : vector<1x288xi1> to vector<1x288xi1>
    %64 = vector.broadcast %63 : vector<1x288xi1> to vector<16x288xi1>
    %65 = vector.broadcast %cst_43 : f32 to vector<16x288xf32>
    %66 = arith.select %64, %62, %65 : vector<16x288xi1>, vector<16x288xf32>
    %cst_44 = arith.constant dense<0.000000e+00> : vector<16xf32>
    %67 = vector.multi_reduction <add>, %66, %cst_44 [1] : vector<16x288xf32> to vector<16xf32>
    %68 = vector.shape_cast %67 : vector<16xf32> to vector<16x1xf32>
    %c0_45 = arith.constant 0 : index
    %c0_46 = arith.constant 0 : index
    %c0_47 = arith.constant 0 : index
    %69 = vector.load %arg5[%c0_45, %c0_46, %c0_47] : memref<2x16x1xf32, #tpu.memory_space<vmem>>, vector<1x16x1xf32>
    %70 = vector.shape_cast %69 : vector<1x16x1xf32> to vector<16x1xf32>
    %71 = vector.shape_cast %68 : vector<16x1xf32> to vector<1x16x1xf32>
    tpu.vector_store %arg5[%c0_45, %c0_46, %c0_47], %71 {strides = array<i32>} : memref<2x16x1xf32, #tpu.memory_space<vmem>>, vector<1x16x1xf32>,
    %c1_48 = arith.constant 1 : index
    %c0_49 = arith.constant 0 : index
    %c0_50 = arith.constant 0 : index
    %72 = vector.load %arg1[%c1_48, %c0_49, %c0_50] : memref<2x16x326xbf16, #tpu.memory_space<vmem>>, vector<1x16x288xbf16>
    %73 = vector.shape_cast %72 : vector<1x16x288xbf16> to vector<16x288xbf16>
    %c0_51 = arith.constant 0 : index
    %c0_52 = arith.constant 0 : index
    %74 = vector.load %arg6[%c0_51, %c0_52] : memref<144x288xbf16, #tpu.memory_space<vmem>>, vector<16x288xbf16>
    tpu.vector_store %arg6[%c0_51, %c0_52], %73 {strides = array<i32>} : memref<144x288xbf16, #tpu.memory_space<vmem>>, vector<16x288xbf16>,
    %c1_53 = arith.constant 1 : index
    %c0_54 = arith.constant 0 : index
    %c1_55 = arith.constant 1 : index
    %75 = vector.load %arg1[%c1_53, %c0_54, %c1_55] : memref<2x16x326xbf16, #tpu.memory_space<vmem>>, vector<1x16x288xbf16>
    %76 = vector.shape_cast %75 : vector<1x16x288xbf16> to vector<16x288xbf16>
    %c16_56 = arith.constant 16 : index
    %c0_57 = arith.constant 0 : index
    %77 = vector.load %arg6[%c16_56, %c0_57] : memref<144x288xbf16, #tpu.memory_space<vmem>>, vector<16x288xbf16>
    tpu.vector_store %arg6[%c16_56, %c0_57], %76 {strides = array<i32>} : memref<144x288xbf16, #tpu.memory_space<vmem>>, vector<16x288xbf16>,
    %c1_58 = arith.constant 1 : index
    %c0_59 = arith.constant 0 : index
    %c2_60 = arith.constant 2 : index
    %78 = vector.load %arg1[%c1_58, %c0_59, %c2_60] : memref<2x16x326xbf16, #tpu.memory_space<vmem>>, vector<1x16x288xbf16>
    %79 = vector.shape_cast %78 : vector<1x16x288xbf16> to vector<16x288xbf16>
    %c32_61 = arith.constant 32 : index
    %c0_62 = arith.constant 0 : index
    %80 = vector.load %arg6[%c32_61, %c0_62] : memref<144x288xbf16, #tpu.memory_space<vmem>>, vector<16x288xbf16>
    tpu.vector_store %arg6[%c32_61, %c0_62], %79 {strides = array<i32>} : memref<144x288xbf16, #tpu.memory_space<vmem>>, vector<16x288xbf16>,
    %c1_63 = arith.constant 1 : index
    %c0_64 = arith.constant 0 : index
    %c18_65 = arith.constant 18 : index
    %81 = vector.load %arg1[%c1_63, %c0_64, %c18_65] : memref<2x16x326xbf16, #tpu.memory_space<vmem>>, vector<1x16x288xbf16>
    %82 = vector.shape_cast %81 : vector<1x16x288xbf16> to vector<16x288xbf16>
    %c48_66 = arith.constant 48 : index
    %c0_67 = arith.constant 0 : index
    %83 = vector.load %arg6[%c48_66, %c0_67] : memref<144x288xbf16, #tpu.memory_space<vmem>>, vector<16x288xbf16>
    tpu.vector_store %arg6[%c48_66, %c0_67], %82 {strides = array<i32>} : memref<144x288xbf16, #tpu.memory_space<vmem>>, vector<16x288xbf16>,
    %c1_68 = arith.constant 1 : index
    %c0_69 = arith.constant 0 : index
    %c19_70 = arith.constant 19 : index
    %84 = vector.load %arg1[%c1_68, %c0_69, %c19_70] : memref<2x16x326xbf16, #tpu.memory_space<vmem>>, vector<1x16x288xbf16>
    %85 = vector.shape_cast %84 : vector<1x16x288xbf16> to vector<16x288xbf16>
    %c64_71 = arith.constant 64 : index
    %c0_72 = arith.constant 0 : index
    %86 = vector.load %arg6[%c64_71, %c0_72] : memref<144x288xbf16, #tpu.memory_space<vmem>>, vector<16x288xbf16>
    tpu.vector_store %arg6[%c64_71, %c0_72], %85 {strides = array<i32>} : memref<144x288xbf16, #tpu.memory_space<vmem>>, vector<16x288xbf16>,
    %c1_73 = arith.constant 1 : index
    %c0_74 = arith.constant 0 : index
    %c20_75 = arith.constant 20 : index
    %87 = vector.load %arg1[%c1_73, %c0_74, %c20_75] : memref<2x16x326xbf16, #tpu.memory_space<vmem>>, vector<1x16x288xbf16>
    %88 = vector.shape_cast %87 : vector<1x16x288xbf16> to vector<16x288xbf16>
    %c80_76 = arith.constant 80 : index
    %c0_77 = arith.constant 0 : index
    %89 = vector.load %arg6[%c80_76, %c0_77] : memref<144x288xbf16, #tpu.memory_space<vmem>>, vector<16x288xbf16>
    tpu.vector_store %arg6[%c80_76, %c0_77], %88 {strides = array<i32>} : memref<144x288xbf16, #tpu.memory_space<vmem>>, vector<16x288xbf16>,
    %c1_78 = arith.constant 1 : index
    %c0_79 = arith.constant 0 : index
    %c36_80 = arith.constant 36 : index
    %90 = vector.load %arg1[%c1_78, %c0_79, %c36_80] : memref<2x16x326xbf16, #tpu.memory_space<vmem>>, vector<1x16x288xbf16>
    %91 = vector.shape_cast %90 : vector<1x16x288xbf16> to vector<16x288xbf16>
    %c96_81 = arith.constant 96 : index
    %c0_82 = arith.constant 0 : index
    %92 = vector.load %arg6[%c96_81, %c0_82] : memref<144x288xbf16, #tpu.memory_space<vmem>>, vector<16x288xbf16>
    tpu.vector_store %arg6[%c96_81, %c0_82], %91 {strides = array<i32>} : memref<144x288xbf16, #tpu.memory_space<vmem>>, vector<16x288xbf16>,
    %c1_83 = arith.constant 1 : index
    %c0_84 = arith.constant 0 : index
    %c37_85 = arith.constant 37 : index
    %93 = vector.load %arg1[%c1_83, %c0_84, %c37_85] : memref<2x16x326xbf16, #tpu.memory_space<vmem>>, vector<1x16x288xbf16>
    %94 = vector.shape_cast %93 : vector<1x16x288xbf16> to vector<16x288xbf16>
    %c112_86 = arith.constant 112 : index
    %c0_87 = arith.constant 0 : index
    %95 = vector.load %arg6[%c112_86, %c0_87] : memref<144x288xbf16, #tpu.memory_space<vmem>>, vector<16x288xbf16>
    tpu.vector_store %arg6[%c112_86, %c0_87], %94 {strides = array<i32>} : memref<144x288xbf16, #tpu.memory_space<vmem>>, vector<16x288xbf16>,
    %c1_88 = arith.constant 1 : index
    %c0_89 = arith.constant 0 : index
    %c38_90 = arith.constant 38 : index
    %96 = vector.load %arg1[%c1_88, %c0_89, %c38_90] : memref<2x16x326xbf16, #tpu.memory_space<vmem>>, vector<1x16x288xbf16>
    %97 = vector.shape_cast %96 : vector<1x16x288xbf16> to vector<16x288xbf16>
    %c128_91 = arith.constant 128 : index
    %c0_92 = arith.constant 0 : index
    %98 = vector.load %arg6[%c128_91, %c0_92] : memref<144x288xbf16, #tpu.memory_space<vmem>>, vector<16x288xbf16>
    tpu.vector_store %arg6[%c128_91, %c0_92], %97 {strides = array<i32>} : memref<144x288xbf16, #tpu.memory_space<vmem>>, vector<16x288xbf16>,
    %c0_93 = arith.constant 0 : index
    %c0_94 = arith.constant 0 : index
    %99 = vector.load %arg2[%c0_93, %c0_94] : memref<16x144xbf16, #tpu.memory_space<vmem>>, vector<16x144xbf16>
    %c0_95 = arith.constant 0 : index
    %c0_96 = arith.constant 0 : index
    %100 = vector.load %arg6[%c0_95, %c0_96] : memref<144x288xbf16, #tpu.memory_space<vmem>>, vector<144x288xbf16>
    %cst_97 = arith.constant dense<0.000000e+00> : vector<16x288xf32>
    %101 = tpu.matmul %99, %100, %cst_97 {dimension_numbers = #tpu.dot_dimension_numbers<[1], [0], [0], [1], [0, 0, 1, 1], [], []>} : vector<16x144xbf16>, vector<144x288xbf16>, vector<16x288xf32> -> vector<16x288xf32>
    %102 = arith.truncf %101 : vector<16x288xf32> to vector<16x288xbf16>
    %c1_98 = arith.constant 1 : index
    %c0_99 = arith.constant 0 : index
    %c0_100 = arith.constant 0 : index
    %103 = vector.load %arg3[%c1_98, %c0_99, %c0_100] : memref<2x16x288xbf16, #tpu.memory_space<vmem>>, vector<1x16x288xbf16>
    %104 = vector.shape_cast %103 : vector<1x16x288xbf16> to vector<16x288xbf16>
    %105 = vector.shape_cast %102 : vector<16x288xbf16> to vector<1x16x288xbf16>
    tpu.vector_store %arg3[%c1_98, %c0_99, %c0_100], %105 {strides = array<i32>} : memref<2x16x288xbf16, #tpu.memory_space<vmem>>, vector<1x16x288xbf16>,
    %cst_101 = arith.constant 0.000000e+00 : f32
    %106 = vector.shape_cast %18 : vector<1x288xi1> to vector<1x288xi1>
    %107 = vector.broadcast %106 : vector<1x288xi1> to vector<16x288xi1>
    %108 = vector.broadcast %cst_101 : f32 to vector<16x288xf32>
    %109 = arith.select %107, %101, %108 : vector<16x288xi1>, vector<16x288xf32>
    %cst_102 = arith.constant dense<0.000000e+00> : vector<16xf32>
    %110 = vector.multi_reduction <add>, %109, %cst_102 [1] : vector<16x288xf32> to vector<16xf32>
    %111 = vector.shape_cast %110 : vector<16xf32> to vector<16x1xf32>
    %c1_103 = arith.constant 1 : index
    %c0_104 = arith.constant 0 : index
    %c0_105 = arith.constant 0 : index
    %112 = vector.load %arg4[%c1_103, %c0_104, %c0_105] : memref<2x16x1xf32, #tpu.memory_space<vmem>>, vector<1x16x1xf32>
    %113 = vector.shape_cast %112 : vector<1x16x1xf32> to vector<16x1xf32>
    %114 = vector.shape_cast %111 : vector<16x1xf32> to vector<1x16x1xf32>
    tpu.vector_store %arg4[%c1_103, %c0_104, %c0_105], %114 {strides = array<i32>} : memref<2x16x1xf32, #tpu.memory_space<vmem>>, vector<1x16x1xf32>,
    %115 = arith.mulf %101, %101 : vector<16x288xf32>
    %cst_106 = arith.constant 0.000000e+00 : f32
    %116 = vector.shape_cast %18 : vector<1x288xi1> to vector<1x288xi1>
    %117 = vector.broadcast %116 : vector<1x288xi1> to vector<16x288xi1>
    %118 = vector.broadcast %cst_106 : f32 to vector<16x288xf32>
    %119 = arith.select %117, %115, %118 : vector<16x288xi1>, vector<16x288xf32>
    %cst_107 = arith.constant dense<0.000000e+00> : vector<16xf32>
    %120 = vector.multi_reduction <add>, %119, %cst_107 [1] : vector<16x288xf32> to vector<16xf32>
    %121 = vector.shape_cast %120 : vector<16xf32> to vector<16x1xf32>
    %c1_108 = arith.constant 1 : index
    %c0_109 = arith.constant 0 : index
    %c0_110 = arith.constant 0 : index
    %122 = vector.load %arg5[%c1_108, %c0_109, %c0_110] : memref<2x16x1xf32, #tpu.memory_space<vmem>>, vector<1x16x1xf32>
    %123 = vector.shape_cast %122 : vector<1x16x1xf32> to vector<16x1xf32>
    %124 = vector.shape_cast %121 : vector<16x1xf32> to vector<1x16x1xf32>
    tpu.vector_store %arg5[%c1_108, %c0_109, %c0_110], %124 {strides = array<i32>} : memref<2x16x1xf32, #tpu.memory_space<vmem>>, vector<1x16x1xf32>,
    return
  }
  func.func @transform_0(%arg0: i32) -> (i32, i32, i32) {
    %c0_i32 = arith.constant 0 : i32
    %c0_i32_0 = arith.constant 0 : i32
    %c0_i32_1 = arith.constant 0 : i32
    return %arg0, %c0_i32, %c0_i32_0 : i32, i32, i32
  }
  func.func @transform_1(%arg0: i32) -> (i32, i32) {
    %c0_i32 = arith.constant 0 : i32
    %c0_i32_0 = arith.constant 0 : i32
    %c0_i32_1 = arith.constant 0 : i32
    return %c0_i32, %c0_i32_0 : i32, i32
  }
  func.func @transform_2(%arg0: i32) -> (i32, i32, i32) {
    %c0_i32 = arith.constant 0 : i32
    %c0_i32_0 = arith.constant 0 : i32
    %c0_i32_1 = arith.constant 0 : i32
    return %arg0, %c0_i32, %c0_i32_0 : i32, i32, i32
  }
  func.func @transform_3(%arg0: i32) -> (i32, i32, i32) {
    %c0_i32 = arith.constant 0 : i32
    %c0_i32_0 = arith.constant 0 : i32
    %c0_i32_1 = arith.constant 0 : i32
    return %arg0, %c0_i32, %c0_i32_0 : i32, i32, i32
  }
  func.func @transform_4(%arg0: i32) -> (i32, i32, i32) {
    %c0_i32 = arith.constant 0 : i32
    %c0_i32_0 = arith.constant 0 : i32
    %c0_i32_1 = arith.constant 0 : i32
    return %arg0, %c0_i32, %c0_i32_0 : i32, i32, i32
  }
}

module attributes {stable_mosaic.version = 11 : i64} {
  func.func @_conv_stats_kernel(%arg0: i32, %arg1: memref<2x16x326xbf16, #tpu.memory_space<vmem>>, %arg2: memref<32x144xbf16, #tpu.memory_space<vmem>>, %arg3: memref<2x32x288xbf16, #tpu.memory_space<vmem>>, %arg4: memref<2x32x1xf32, #tpu.memory_space<vmem>>, %arg5: memref<2x32x1xf32, #tpu.memory_space<vmem>>, %arg6: memref<144x288xbf16, #tpu.memory_space<vmem>>) attributes {dimension_semantics = [#tpu.dimension_semantics<parallel>], iteration_bounds = array<i64: 1>, scalar_prefetch = 0 : i64, scratch_operands = 1 : i64, tpu.core_type = #tpu.core_type<tc>, window_params = [{transform_indices = @transform_0, window_bounds = array<i64: 2, 16, 326>}, {pipeline_mode = #tpu.pipeline_mode<synchronous>, transform_indices = @transform_1, window_bounds = array<i64: 32, 144>}, {transform_indices = @transform_2, window_bounds = array<i64: 2, 32, 288>}, {transform_indices = @transform_3, window_bounds = array<i64: 2, 32, 1>}, {transform_indices = @transform_4, window_bounds = array<i64: 2, 32, 1>}]} {
    %0 = tpu.iota {dimensions = array<i32: 1>} : vector<1x288xi32>
    %c18_i32 = arith.constant 18 : i32
    %c0_i32 = arith.constant 0 : i32
    %1 = arith.cmpi eq, %c18_i32, %c0_i32 : i32
    %c1_i32 = arith.constant 1 : i32
    %2 = arith.select %1, %c1_i32, %c18_i32 : i32
    %3 = vector.broadcast %2 : i32 to vector<1x288xi32>
    %4 = arith.remsi %0, %3 : vector<1x288xi32>
    %c0_i32_0 = arith.constant 0 : i32
    %5 = vector.broadcast %c0_i32_0 : i32 to vector<1x288xi32>
    %6 = arith.cmpi ne, %4, %5 : vector<1x288xi32>
    %c0_i32_1 = arith.constant 0 : i32
    %7 = vector.broadcast %c0_i32_1 : i32 to vector<1x288xi32>
    %8 = arith.cmpi slt, %4, %7 : vector<1x288xi32>
    %c0_i32_2 = arith.constant 0 : i32
    %9 = arith.cmpi slt, %2, %c0_i32_2 : i32
    %10 = vector.broadcast %9 : i1 to vector<1x288xi1>
    %11 = vector.broadcast %10 : vector<1x288xi1> to vector<1x288xi1>
    %12 = arith.xori %8, %11 : vector<1x288xi1>
    %13 = arith.andi %12, %6 : vector<1x288xi1>
    %14 = vector.broadcast %2 : i32 to vector<1x288xi32>
    %15 = arith.addi %4, %14 : vector<1x288xi32>
    %16 = arith.select %13, %15, %4 : vector<1x288xi1>, vector<1x288xi32>
    %c16_i32 = arith.constant 16 : i32
    %17 = vector.broadcast %c16_i32 : i32 to vector<1x288xi32>
    %18 = arith.cmpi slt, %16, %17 : vector<1x288xi32>
    %c0 = arith.constant 0 : index
    %c0_3 = arith.constant 0 : index
    %c0_4 = arith.constant 0 : index
    %19 = vector.load %arg1[%c0, %c0_3, %c0_4] : memref<2x16x326xbf16, #tpu.memory_space<vmem>>, vector<1x16x288xbf16>
    %20 = vector.shape_cast %19 : vector<1x16x288xbf16> to vector<16x288xbf16>
    %c0_5 = arith.constant 0 : index
    %c0_6 = arith.constant 0 : index
    %21 = vector.load %arg6[%c0_5, %c0_6] : memref<144x288xbf16, #tpu.memory_space<vmem>>, vector<16x288xbf16>
    tpu.vector_store %arg6[%c0_5, %c0_6], %20 {strides = array<i32>} : memref<144x288xbf16, #tpu.memory_space<vmem>>, vector<16x288xbf16>,
    %c0_7 = arith.constant 0 : index
    %c0_8 = arith.constant 0 : index
    %c1 = arith.constant 1 : index
    %22 = vector.load %arg1[%c0_7, %c0_8, %c1] : memref<2x16x326xbf16, #tpu.memory_space<vmem>>, vector<1x16x288xbf16>
    %23 = vector.shape_cast %22 : vector<1x16x288xbf16> to vector<16x288xbf16>
    %c16 = arith.constant 16 : index
    %c0_9 = arith.constant 0 : index
    %24 = vector.load %arg6[%c16, %c0_9] : memref<144x288xbf16, #tpu.memory_space<vmem>>, vector<16x288xbf16>
    tpu.vector_store %arg6[%c16, %c0_9], %23 {strides = array<i32>} : memref<144x288xbf16, #tpu.memory_space<vmem>>, vector<16x288xbf16>,
    %c0_10 = arith.constant 0 : index
    %c0_11 = arith.constant 0 : index
    %c2 = arith.constant 2 : index
    %25 = vector.load %arg1[%c0_10, %c0_11, %c2] : memref<2x16x326xbf16, #tpu.memory_space<vmem>>, vector<1x16x288xbf16>
    %26 = vector.shape_cast %25 : vector<1x16x288xbf16> to vector<16x288xbf16>
    %c32 = arith.constant 32 : index
    %c0_12 = arith.constant 0 : index
    %27 = vector.load %arg6[%c32, %c0_12] : memref<144x288xbf16, #tpu.memory_space<vmem>>, vector<16x288xbf16>
    tpu.vector_store %arg6[%c32, %c0_12], %26 {strides = array<i32>} : memref<144x288xbf16, #tpu.memory_space<vmem>>, vector<16x288xbf16>,
    %c0_13 = arith.constant 0 : index
    %c0_14 = arith.constant 0 : index
    %c18 = arith.constant 18 : index
    %28 = vector.load %arg1[%c0_13, %c0_14, %c18] : memref<2x16x326xbf16, #tpu.memory_space<vmem>>, vector<1x16x288xbf16>
    %29 = vector.shape_cast %28 : vector<1x16x288xbf16> to vector<16x288xbf16>
    %c48 = arith.constant 48 : index
    %c0_15 = arith.constant 0 : index
    %30 = vector.load %arg6[%c48, %c0_15] : memref<144x288xbf16, #tpu.memory_space<vmem>>, vector<16x288xbf16>
    tpu.vector_store %arg6[%c48, %c0_15], %29 {strides = array<i32>} : memref<144x288xbf16, #tpu.memory_space<vmem>>, vector<16x288xbf16>,
    %c0_16 = arith.constant 0 : index
    %c0_17 = arith.constant 0 : index
    %c19 = arith.constant 19 : index
    %31 = vector.load %arg1[%c0_16, %c0_17, %c19] : memref<2x16x326xbf16, #tpu.memory_space<vmem>>, vector<1x16x288xbf16>
    %32 = vector.shape_cast %31 : vector<1x16x288xbf16> to vector<16x288xbf16>
    %c64 = arith.constant 64 : index
    %c0_18 = arith.constant 0 : index
    %33 = vector.load %arg6[%c64, %c0_18] : memref<144x288xbf16, #tpu.memory_space<vmem>>, vector<16x288xbf16>
    tpu.vector_store %arg6[%c64, %c0_18], %32 {strides = array<i32>} : memref<144x288xbf16, #tpu.memory_space<vmem>>, vector<16x288xbf16>,
    %c0_19 = arith.constant 0 : index
    %c0_20 = arith.constant 0 : index
    %c20 = arith.constant 20 : index
    %34 = vector.load %arg1[%c0_19, %c0_20, %c20] : memref<2x16x326xbf16, #tpu.memory_space<vmem>>, vector<1x16x288xbf16>
    %35 = vector.shape_cast %34 : vector<1x16x288xbf16> to vector<16x288xbf16>
    %c80 = arith.constant 80 : index
    %c0_21 = arith.constant 0 : index
    %36 = vector.load %arg6[%c80, %c0_21] : memref<144x288xbf16, #tpu.memory_space<vmem>>, vector<16x288xbf16>
    tpu.vector_store %arg6[%c80, %c0_21], %35 {strides = array<i32>} : memref<144x288xbf16, #tpu.memory_space<vmem>>, vector<16x288xbf16>,
    %c0_22 = arith.constant 0 : index
    %c0_23 = arith.constant 0 : index
    %c36 = arith.constant 36 : index
    %37 = vector.load %arg1[%c0_22, %c0_23, %c36] : memref<2x16x326xbf16, #tpu.memory_space<vmem>>, vector<1x16x288xbf16>
    %38 = vector.shape_cast %37 : vector<1x16x288xbf16> to vector<16x288xbf16>
    %c96 = arith.constant 96 : index
    %c0_24 = arith.constant 0 : index
    %39 = vector.load %arg6[%c96, %c0_24] : memref<144x288xbf16, #tpu.memory_space<vmem>>, vector<16x288xbf16>
    tpu.vector_store %arg6[%c96, %c0_24], %38 {strides = array<i32>} : memref<144x288xbf16, #tpu.memory_space<vmem>>, vector<16x288xbf16>,
    %c0_25 = arith.constant 0 : index
    %c0_26 = arith.constant 0 : index
    %c37 = arith.constant 37 : index
    %40 = vector.load %arg1[%c0_25, %c0_26, %c37] : memref<2x16x326xbf16, #tpu.memory_space<vmem>>, vector<1x16x288xbf16>
    %41 = vector.shape_cast %40 : vector<1x16x288xbf16> to vector<16x288xbf16>
    %c112 = arith.constant 112 : index
    %c0_27 = arith.constant 0 : index
    %42 = vector.load %arg6[%c112, %c0_27] : memref<144x288xbf16, #tpu.memory_space<vmem>>, vector<16x288xbf16>
    tpu.vector_store %arg6[%c112, %c0_27], %41 {strides = array<i32>} : memref<144x288xbf16, #tpu.memory_space<vmem>>, vector<16x288xbf16>,
    %c0_28 = arith.constant 0 : index
    %c0_29 = arith.constant 0 : index
    %c38 = arith.constant 38 : index
    %43 = vector.load %arg1[%c0_28, %c0_29, %c38] : memref<2x16x326xbf16, #tpu.memory_space<vmem>>, vector<1x16x288xbf16>
    %44 = vector.shape_cast %43 : vector<1x16x288xbf16> to vector<16x288xbf16>
    %c128 = arith.constant 128 : index
    %c0_30 = arith.constant 0 : index
    %45 = vector.load %arg6[%c128, %c0_30] : memref<144x288xbf16, #tpu.memory_space<vmem>>, vector<16x288xbf16>
    tpu.vector_store %arg6[%c128, %c0_30], %44 {strides = array<i32>} : memref<144x288xbf16, #tpu.memory_space<vmem>>, vector<16x288xbf16>,
    %c0_31 = arith.constant 0 : index
    %c0_32 = arith.constant 0 : index
    %46 = vector.load %arg2[%c0_31, %c0_32] : memref<32x144xbf16, #tpu.memory_space<vmem>>, vector<32x144xbf16>
    %c0_33 = arith.constant 0 : index
    %c0_34 = arith.constant 0 : index
    %47 = vector.load %arg6[%c0_33, %c0_34] : memref<144x288xbf16, #tpu.memory_space<vmem>>, vector<144x288xbf16>
    %cst = arith.constant dense<0.000000e+00> : vector<32x288xf32>
    %48 = tpu.matmul %46, %47, %cst {dimension_numbers = #tpu.dot_dimension_numbers<[1], [0], [0], [1], [0, 0, 1, 1], [], []>} : vector<32x144xbf16>, vector<144x288xbf16>, vector<32x288xf32> -> vector<32x288xf32>
    %49 = arith.truncf %48 : vector<32x288xf32> to vector<32x288xbf16>
    %c0_35 = arith.constant 0 : index
    %c0_36 = arith.constant 0 : index
    %c0_37 = arith.constant 0 : index
    %50 = vector.load %arg3[%c0_35, %c0_36, %c0_37] : memref<2x32x288xbf16, #tpu.memory_space<vmem>>, vector<1x32x288xbf16>
    %51 = vector.shape_cast %50 : vector<1x32x288xbf16> to vector<32x288xbf16>
    %52 = vector.shape_cast %49 : vector<32x288xbf16> to vector<1x32x288xbf16>
    tpu.vector_store %arg3[%c0_35, %c0_36, %c0_37], %52 {strides = array<i32>} : memref<2x32x288xbf16, #tpu.memory_space<vmem>>, vector<1x32x288xbf16>,
    %cst_38 = arith.constant 0.000000e+00 : f32
    %53 = vector.shape_cast %18 : vector<1x288xi1> to vector<1x288xi1>
    %54 = vector.broadcast %53 : vector<1x288xi1> to vector<32x288xi1>
    %55 = vector.broadcast %cst_38 : f32 to vector<32x288xf32>
    %56 = arith.select %54, %48, %55 : vector<32x288xi1>, vector<32x288xf32>
    %cst_39 = arith.constant dense<0.000000e+00> : vector<32xf32>
    %57 = vector.multi_reduction <add>, %56, %cst_39 [1] : vector<32x288xf32> to vector<32xf32>
    %58 = vector.shape_cast %57 : vector<32xf32> to vector<32x1xf32>
    %c0_40 = arith.constant 0 : index
    %c0_41 = arith.constant 0 : index
    %c0_42 = arith.constant 0 : index
    %59 = vector.load %arg4[%c0_40, %c0_41, %c0_42] : memref<2x32x1xf32, #tpu.memory_space<vmem>>, vector<1x32x1xf32>
    %60 = vector.shape_cast %59 : vector<1x32x1xf32> to vector<32x1xf32>
    %61 = vector.shape_cast %58 : vector<32x1xf32> to vector<1x32x1xf32>
    tpu.vector_store %arg4[%c0_40, %c0_41, %c0_42], %61 {strides = array<i32>} : memref<2x32x1xf32, #tpu.memory_space<vmem>>, vector<1x32x1xf32>,
    %62 = arith.mulf %48, %48 : vector<32x288xf32>
    %cst_43 = arith.constant 0.000000e+00 : f32
    %63 = vector.shape_cast %18 : vector<1x288xi1> to vector<1x288xi1>
    %64 = vector.broadcast %63 : vector<1x288xi1> to vector<32x288xi1>
    %65 = vector.broadcast %cst_43 : f32 to vector<32x288xf32>
    %66 = arith.select %64, %62, %65 : vector<32x288xi1>, vector<32x288xf32>
    %cst_44 = arith.constant dense<0.000000e+00> : vector<32xf32>
    %67 = vector.multi_reduction <add>, %66, %cst_44 [1] : vector<32x288xf32> to vector<32xf32>
    %68 = vector.shape_cast %67 : vector<32xf32> to vector<32x1xf32>
    %c0_45 = arith.constant 0 : index
    %c0_46 = arith.constant 0 : index
    %c0_47 = arith.constant 0 : index
    %69 = vector.load %arg5[%c0_45, %c0_46, %c0_47] : memref<2x32x1xf32, #tpu.memory_space<vmem>>, vector<1x32x1xf32>
    %70 = vector.shape_cast %69 : vector<1x32x1xf32> to vector<32x1xf32>
    %71 = vector.shape_cast %68 : vector<32x1xf32> to vector<1x32x1xf32>
    tpu.vector_store %arg5[%c0_45, %c0_46, %c0_47], %71 {strides = array<i32>} : memref<2x32x1xf32, #tpu.memory_space<vmem>>, vector<1x32x1xf32>,
    %c1_48 = arith.constant 1 : index
    %c0_49 = arith.constant 0 : index
    %c0_50 = arith.constant 0 : index
    %72 = vector.load %arg1[%c1_48, %c0_49, %c0_50] : memref<2x16x326xbf16, #tpu.memory_space<vmem>>, vector<1x16x288xbf16>
    %73 = vector.shape_cast %72 : vector<1x16x288xbf16> to vector<16x288xbf16>
    %c0_51 = arith.constant 0 : index
    %c0_52 = arith.constant 0 : index
    %74 = vector.load %arg6[%c0_51, %c0_52] : memref<144x288xbf16, #tpu.memory_space<vmem>>, vector<16x288xbf16>
    tpu.vector_store %arg6[%c0_51, %c0_52], %73 {strides = array<i32>} : memref<144x288xbf16, #tpu.memory_space<vmem>>, vector<16x288xbf16>,
    %c1_53 = arith.constant 1 : index
    %c0_54 = arith.constant 0 : index
    %c1_55 = arith.constant 1 : index
    %75 = vector.load %arg1[%c1_53, %c0_54, %c1_55] : memref<2x16x326xbf16, #tpu.memory_space<vmem>>, vector<1x16x288xbf16>
    %76 = vector.shape_cast %75 : vector<1x16x288xbf16> to vector<16x288xbf16>
    %c16_56 = arith.constant 16 : index
    %c0_57 = arith.constant 0 : index
    %77 = vector.load %arg6[%c16_56, %c0_57] : memref<144x288xbf16, #tpu.memory_space<vmem>>, vector<16x288xbf16>
    tpu.vector_store %arg6[%c16_56, %c0_57], %76 {strides = array<i32>} : memref<144x288xbf16, #tpu.memory_space<vmem>>, vector<16x288xbf16>,
    %c1_58 = arith.constant 1 : index
    %c0_59 = arith.constant 0 : index
    %c2_60 = arith.constant 2 : index
    %78 = vector.load %arg1[%c1_58, %c0_59, %c2_60] : memref<2x16x326xbf16, #tpu.memory_space<vmem>>, vector<1x16x288xbf16>
    %79 = vector.shape_cast %78 : vector<1x16x288xbf16> to vector<16x288xbf16>
    %c32_61 = arith.constant 32 : index
    %c0_62 = arith.constant 0 : index
    %80 = vector.load %arg6[%c32_61, %c0_62] : memref<144x288xbf16, #tpu.memory_space<vmem>>, vector<16x288xbf16>
    tpu.vector_store %arg6[%c32_61, %c0_62], %79 {strides = array<i32>} : memref<144x288xbf16, #tpu.memory_space<vmem>>, vector<16x288xbf16>,
    %c1_63 = arith.constant 1 : index
    %c0_64 = arith.constant 0 : index
    %c18_65 = arith.constant 18 : index
    %81 = vector.load %arg1[%c1_63, %c0_64, %c18_65] : memref<2x16x326xbf16, #tpu.memory_space<vmem>>, vector<1x16x288xbf16>
    %82 = vector.shape_cast %81 : vector<1x16x288xbf16> to vector<16x288xbf16>
    %c48_66 = arith.constant 48 : index
    %c0_67 = arith.constant 0 : index
    %83 = vector.load %arg6[%c48_66, %c0_67] : memref<144x288xbf16, #tpu.memory_space<vmem>>, vector<16x288xbf16>
    tpu.vector_store %arg6[%c48_66, %c0_67], %82 {strides = array<i32>} : memref<144x288xbf16, #tpu.memory_space<vmem>>, vector<16x288xbf16>,
    %c1_68 = arith.constant 1 : index
    %c0_69 = arith.constant 0 : index
    %c19_70 = arith.constant 19 : index
    %84 = vector.load %arg1[%c1_68, %c0_69, %c19_70] : memref<2x16x326xbf16, #tpu.memory_space<vmem>>, vector<1x16x288xbf16>
    %85 = vector.shape_cast %84 : vector<1x16x288xbf16> to vector<16x288xbf16>
    %c64_71 = arith.constant 64 : index
    %c0_72 = arith.constant 0 : index
    %86 = vector.load %arg6[%c64_71, %c0_72] : memref<144x288xbf16, #tpu.memory_space<vmem>>, vector<16x288xbf16>
    tpu.vector_store %arg6[%c64_71, %c0_72], %85 {strides = array<i32>} : memref<144x288xbf16, #tpu.memory_space<vmem>>, vector<16x288xbf16>,
    %c1_73 = arith.constant 1 : index
    %c0_74 = arith.constant 0 : index
    %c20_75 = arith.constant 20 : index
    %87 = vector.load %arg1[%c1_73, %c0_74, %c20_75] : memref<2x16x326xbf16, #tpu.memory_space<vmem>>, vector<1x16x288xbf16>
    %88 = vector.shape_cast %87 : vector<1x16x288xbf16> to vector<16x288xbf16>
    %c80_76 = arith.constant 80 : index
    %c0_77 = arith.constant 0 : index
    %89 = vector.load %arg6[%c80_76, %c0_77] : memref<144x288xbf16, #tpu.memory_space<vmem>>, vector<16x288xbf16>
    tpu.vector_store %arg6[%c80_76, %c0_77], %88 {strides = array<i32>} : memref<144x288xbf16, #tpu.memory_space<vmem>>, vector<16x288xbf16>,
    %c1_78 = arith.constant 1 : index
    %c0_79 = arith.constant 0 : index
    %c36_80 = arith.constant 36 : index
    %90 = vector.load %arg1[%c1_78, %c0_79, %c36_80] : memref<2x16x326xbf16, #tpu.memory_space<vmem>>, vector<1x16x288xbf16>
    %91 = vector.shape_cast %90 : vector<1x16x288xbf16> to vector<16x288xbf16>
    %c96_81 = arith.constant 96 : index
    %c0_82 = arith.constant 0 : index
    %92 = vector.load %arg6[%c96_81, %c0_82] : memref<144x288xbf16, #tpu.memory_space<vmem>>, vector<16x288xbf16>
    tpu.vector_store %arg6[%c96_81, %c0_82], %91 {strides = array<i32>} : memref<144x288xbf16, #tpu.memory_space<vmem>>, vector<16x288xbf16>,
    %c1_83 = arith.constant 1 : index
    %c0_84 = arith.constant 0 : index
    %c37_85 = arith.constant 37 : index
    %93 = vector.load %arg1[%c1_83, %c0_84, %c37_85] : memref<2x16x326xbf16, #tpu.memory_space<vmem>>, vector<1x16x288xbf16>
    %94 = vector.shape_cast %93 : vector<1x16x288xbf16> to vector<16x288xbf16>
    %c112_86 = arith.constant 112 : index
    %c0_87 = arith.constant 0 : index
    %95 = vector.load %arg6[%c112_86, %c0_87] : memref<144x288xbf16, #tpu.memory_space<vmem>>, vector<16x288xbf16>
    tpu.vector_store %arg6[%c112_86, %c0_87], %94 {strides = array<i32>} : memref<144x288xbf16, #tpu.memory_space<vmem>>, vector<16x288xbf16>,
    %c1_88 = arith.constant 1 : index
    %c0_89 = arith.constant 0 : index
    %c38_90 = arith.constant 38 : index
    %96 = vector.load %arg1[%c1_88, %c0_89, %c38_90] : memref<2x16x326xbf16, #tpu.memory_space<vmem>>, vector<1x16x288xbf16>
    %97 = vector.shape_cast %96 : vector<1x16x288xbf16> to vector<16x288xbf16>
    %c128_91 = arith.constant 128 : index
    %c0_92 = arith.constant 0 : index
    %98 = vector.load %arg6[%c128_91, %c0_92] : memref<144x288xbf16, #tpu.memory_space<vmem>>, vector<16x288xbf16>
    tpu.vector_store %arg6[%c128_91, %c0_92], %97 {strides = array<i32>} : memref<144x288xbf16, #tpu.memory_space<vmem>>, vector<16x288xbf16>,
    %c0_93 = arith.constant 0 : index
    %c0_94 = arith.constant 0 : index
    %99 = vector.load %arg2[%c0_93, %c0_94] : memref<32x144xbf16, #tpu.memory_space<vmem>>, vector<32x144xbf16>
    %c0_95 = arith.constant 0 : index
    %c0_96 = arith.constant 0 : index
    %100 = vector.load %arg6[%c0_95, %c0_96] : memref<144x288xbf16, #tpu.memory_space<vmem>>, vector<144x288xbf16>
    %cst_97 = arith.constant dense<0.000000e+00> : vector<32x288xf32>
    %101 = tpu.matmul %99, %100, %cst_97 {dimension_numbers = #tpu.dot_dimension_numbers<[1], [0], [0], [1], [0, 0, 1, 1], [], []>} : vector<32x144xbf16>, vector<144x288xbf16>, vector<32x288xf32> -> vector<32x288xf32>
    %102 = arith.truncf %101 : vector<32x288xf32> to vector<32x288xbf16>
    %c1_98 = arith.constant 1 : index
    %c0_99 = arith.constant 0 : index
    %c0_100 = arith.constant 0 : index
    %103 = vector.load %arg3[%c1_98, %c0_99, %c0_100] : memref<2x32x288xbf16, #tpu.memory_space<vmem>>, vector<1x32x288xbf16>
    %104 = vector.shape_cast %103 : vector<1x32x288xbf16> to vector<32x288xbf16>
    %105 = vector.shape_cast %102 : vector<32x288xbf16> to vector<1x32x288xbf16>
    tpu.vector_store %arg3[%c1_98, %c0_99, %c0_100], %105 {strides = array<i32>} : memref<2x32x288xbf16, #tpu.memory_space<vmem>>, vector<1x32x288xbf16>,
    %cst_101 = arith.constant 0.000000e+00 : f32
    %106 = vector.shape_cast %18 : vector<1x288xi1> to vector<1x288xi1>
    %107 = vector.broadcast %106 : vector<1x288xi1> to vector<32x288xi1>
    %108 = vector.broadcast %cst_101 : f32 to vector<32x288xf32>
    %109 = arith.select %107, %101, %108 : vector<32x288xi1>, vector<32x288xf32>
    %cst_102 = arith.constant dense<0.000000e+00> : vector<32xf32>
    %110 = vector.multi_reduction <add>, %109, %cst_102 [1] : vector<32x288xf32> to vector<32xf32>
    %111 = vector.shape_cast %110 : vector<32xf32> to vector<32x1xf32>
    %c1_103 = arith.constant 1 : index
    %c0_104 = arith.constant 0 : index
    %c0_105 = arith.constant 0 : index
    %112 = vector.load %arg4[%c1_103, %c0_104, %c0_105] : memref<2x32x1xf32, #tpu.memory_space<vmem>>, vector<1x32x1xf32>
    %113 = vector.shape_cast %112 : vector<1x32x1xf32> to vector<32x1xf32>
    %114 = vector.shape_cast %111 : vector<32x1xf32> to vector<1x32x1xf32>
    tpu.vector_store %arg4[%c1_103, %c0_104, %c0_105], %114 {strides = array<i32>} : memref<2x32x1xf32, #tpu.memory_space<vmem>>, vector<1x32x1xf32>,
    %115 = arith.mulf %101, %101 : vector<32x288xf32>
    %cst_106 = arith.constant 0.000000e+00 : f32
    %116 = vector.shape_cast %18 : vector<1x288xi1> to vector<1x288xi1>
    %117 = vector.broadcast %116 : vector<1x288xi1> to vector<32x288xi1>
    %118 = vector.broadcast %cst_106 : f32 to vector<32x288xf32>
    %119 = arith.select %117, %115, %118 : vector<32x288xi1>, vector<32x288xf32>
    %cst_107 = arith.constant dense<0.000000e+00> : vector<32xf32>
    %120 = vector.multi_reduction <add>, %119, %cst_107 [1] : vector<32x288xf32> to vector<32xf32>
    %121 = vector.shape_cast %120 : vector<32xf32> to vector<32x1xf32>
    %c1_108 = arith.constant 1 : index
    %c0_109 = arith.constant 0 : index
    %c0_110 = arith.constant 0 : index
    %122 = vector.load %arg5[%c1_108, %c0_109, %c0_110] : memref<2x32x1xf32, #tpu.memory_space<vmem>>, vector<1x32x1xf32>
    %123 = vector.shape_cast %122 : vector<1x32x1xf32> to vector<32x1xf32>
    %124 = vector.shape_cast %121 : vector<32x1xf32> to vector<1x32x1xf32>
    tpu.vector_store %arg5[%c1_108, %c0_109, %c0_110], %124 {strides = array<i32>} : memref<2x32x1xf32, #tpu.memory_space<vmem>>, vector<1x32x1xf32>,
    return
  }
  func.func @transform_0(%arg0: i32) -> (i32, i32, i32) {
    %c0_i32 = arith.constant 0 : i32
    %c0_i32_0 = arith.constant 0 : i32
    %c0_i32_1 = arith.constant 0 : i32
    return %arg0, %c0_i32, %c0_i32_0 : i32, i32, i32
  }
  func.func @transform_1(%arg0: i32) -> (i32, i32) {
    %c0_i32 = arith.constant 0 : i32
    %c0_i32_0 = arith.constant 0 : i32
    %c0_i32_1 = arith.constant 0 : i32
    return %c0_i32, %c0_i32_0 : i32, i32
  }
  func.func @transform_2(%arg0: i32) -> (i32, i32, i32) {
    %c0_i32 = arith.constant 0 : i32
    %c0_i32_0 = arith.constant 0 : i32
    %c0_i32_1 = arith.constant 0 : i32
    return %arg0, %c0_i32, %c0_i32_0 : i32, i32, i32
  }
  func.func @transform_3(%arg0: i32) -> (i32, i32, i32) {
    %c0_i32 = arith.constant 0 : i32
    %c0_i32_0 = arith.constant 0 : i32
    %c0_i32_1 = arith.constant 0 : i32
    return %arg0, %c0_i32, %c0_i32_0 : i32, i32, i32
  }
  func.func @transform_4(%arg0: i32) -> (i32, i32, i32) {
    %c0_i32 = arith.constant 0 : i32
    %c0_i32_0 = arith.constant 0 : i32
    %c0_i32_1 = arith.constant 0 : i32
    return %arg0, %c0_i32, %c0_i32_0 : i32, i32, i32
  }
}

</mosaic_0001>

<bundles_post_ra>
// kernel: conv_block_forward.2
= control target key start
LH: loop header
LB: loop body
LE: loop exit
PB: predicated region body
PF: predicated region fallthrough
CT: control target
= control target key end

     0   :  { %s1692_s19 = smov 91   ;;  %s1693_s20 = smov 92   ;;  %vm129_vm0 = vcmask 257024   ;;  %vm153_vm1 = vcmask 1043456   ;;  %vm320_vm2 = vcmask 752640   ;;  %vm353_vm3 = vcmask 744448   ;;  %s2319_s0 = inlined_call_operand.vmem [shape: bf16[2,16,326], index: 0, kind: input, shape index: {}]   ;;  %s2320_s1 = inlined_call_operand.vmem [shape: bf16[16,144], index: 1, kind: input, shape index: {}]   ;;  %s2321_s2 = inlined_call_operand.vmem [shape: bf16[2,16,288], index: 2, kind: output, shape index: {0}]   ;;  %s2322_s3 = inlined_call_operand.vmem [shape: f32[2,16,1], index: 3, kind: output, shape index: {1}]   ;;  %s2323_s4 = inlined_call_operand.vmem [shape: f32[2,16,1], index: 4, kind: output, shape index: {2}]  }
   0x1   :  { %v1729_v0 = vld [vmem:[%s2319_s0 + $0xc] sm:$0xff]  ;;  %v1734_v1 = vld [vmem:[%s2319_s0] sm:$0xff]  ;;  %v335_v2 = vld [vmem:[%s2319_s0 + $0x14] sm:$0xf]  ;;  %s1694_s29 = smov 90   ;;  %s1695_s10 = smov 108  }
   0x2   :  { %344 = vrot.lane.b32.xlu1 %v1729_v0, %s1692_s19  ;;  %340 = vrot.lane.b32.xlu0 %v1734_v1, %s1692_s19  ;;  %128 = vst [vmem:[#allocation2] sm:$0xff] %v1734_v1  ;;  %v333_v3 = vld [vmem:[%s2319_s0 + $0x8] sm:$0xf]  ;;  %v302_v5 = vld [vmem:[%s2319_s0 + $0x14] sm:$0xf]  ;;  %s1696_s23 = smov 109  }
   0x3   :  { %307 = vrot.lane.b32.xlu2 %v1734_v1, %s1693_s20  ;;  %131 = vst [vmem:[#allocation2 + $0xc] sm:$0xff] %v1729_v0  ;;  %v300_v4 = vld [vmem:[%s2319_s0 + $0x8] sm:$0xf]  ;;  %v368_v7 = vld [vmem:[%s2319_s0 + $0x14] sm:$0xf]  ;;  %v1785_v9 = vld [vmem:[%s2319_s0 + $0x18] sm:$0xff] }
   0x4   :  { %v366_v6 = vld [vmem:[%s2319_s0 + $0x8] sm:$0xf]  ;;  %v269_v10 = vld [vmem:[%s2319_s0 + $0x14] sm:$0xf]  ;;  %v1491_v11 = vld [vmem:[%s2319_s0 + $0x20] sm:$0xf] }
   0x5   :  { %v267_v8 = vld [vmem:[%s2319_s0 + $0x8] sm:$0xf]  ;;  %v1493_v12 = vld [vmem:[%s2319_s0 + $0x2c] sm:$0xf]  ;;  %v236_v15 = vld [vmem:[%s2319_s0 + $0x14] sm:$0xf] }
   0x6   :  { %v1803_v13 = vld [vmem:[%s2319_s0 + $0x24] sm:$0xff]  ;;  %v1487_v16 = vld [vmem:[%s2319_s0 + $0x20] sm:$0xf]  ;;  %v1489_v17 = vld [vmem:[%s2319_s0 + $0x2c] sm:$0xf]  ;;  %s1697_s8 = smov 110  }
   0x7   :  { %v234_v14 = vld [vmem:[%s2319_s0 + $0x8] sm:$0xf]  ;;  %v203_v19 = vld [vmem:[%s2319_s0 + $0x14] sm:$0xf]  ;;  %v1483_v20 = vld [vmem:[%s2319_s0 + $0x20] sm:$0xf] }
   0x8   :  { %v201_v18 = vld [vmem:[%s2319_s0 + $0x8] sm:$0xf]  ;;  %v1485_v21 = vld [vmem:[%s2319_s0 + $0x2c] sm:$0xf]  ;;  %s1698_s17 = smov 126   ;;  %s1699_s26 = smov 127  }
   0x9   :  { %v168_v23 = vld [vmem:[%s2319_s0 + $0x8] sm:$0xf]  ;;  %v170_v27 = vld [vmem:[%s2319_s0 + $0x14] sm:$0xf]  ;;  %v1479_v29 = vld [vmem:[%s2319_s0 + $0x20] sm:$0xf] }
   0xa   :  { %346 = vrot.lane.b32.xlu1 %v335_v2, %s1692_s19  ;;  %342 = vrot.lane.b32.xlu0 %v333_v3, %s1692_s19  ;;  %v1481_v32 = vld [vmem:[%s2319_s0 + $0x2c] sm:$0xf]  ;;  %v134_v36 = vld [vmem:[%s2319_s0 + $0x8] sm:$0xf]  ;;  %vm386_vm4 = vcmask 736256   ;;  %vm287_vm5 = vcmask 883712  }
   0xb   :  { %309 = vrot.lane.b32.xlu2 %v300_v4, %s1693_s20  ;;  %v136_v37 = vld [vmem:[%s2319_s0 + $0x14] sm:$0xf]  ;;  %v1475_v47 = vld [vmem:[%s2319_s0 + $0x20] sm:$0xf]  ;;  %v1477_v57 = vld [vmem:[%s2319_s0 + $0x2c] sm:$0xf] }
   0xc   :  { %v1471_v61 = vld [vmem:[%s2319_s0 + $0x20] sm:$0xf]  ;;  %vm589_vm6 = vcmask 130048   ;;  %vm254_vm7 = vcmask 891904   ;;  %vm221_vm8 = vcmask 900096   ;;  %vm188_vm9 = vcmask 1031168  }
   0xd   :  { %vm155_vm10 = vcmask 1039360  }
  0x12   :  { %313 = vrot.lane.b32.xlu1 %v302_v5, %s1693_s20  ;;  %311 = vrot.lane.b32.xlu0 %v1729_v0, %s1693_s20 }
  0x13   :  { %373 = vrot.lane.b32.xlu2 %v1734_v1, %s1694_s29 }
  0x1a   :  { %377 = vrot.lane.b32.xlu1 %v1729_v0, %s1694_s29  ;;  %375 = vrot.lane.b32.xlu0 %v366_v6, %s1694_s29 }
  0x1b   :  { %379 = vrot.lane.b32.xlu2 %v368_v7, %s1694_s29 }
  0x22   :  { %276 = vrot.lane.b32.xlu1 %v267_v8, %s1695_s10  ;;  %274 = vrot.lane.b32.xlu0 %v1734_v1, %s1695_s10 }
  0x23   :  { %278 = vrot.lane.b32.xlu2 %v1729_v0, %s1695_s10 }
  0x2a   :  { %944 = vrot.lane.b32.xlu1 %v1785_v9, %s1692_s19  ;;  %280 = vrot.lane.b32.xlu0 %v269_v10, %s1695_s10 }
  0x2b   :  { %946 = vrot.lane.b32.xlu2 %v1491_v11, %s1692_s19 }
  0x32   :  { %950 = vrot.lane.b32.xlu1 %v1493_v12, %s1692_s19  ;;  %948 = vrot.lane.b32.xlu0 %v1803_v13, %s1692_s19  ;;  %v1473_v12 = vld [vmem:[%s2319_s0 + $0x2c] sm:$0xf] }
  0x33   :  { %241 = vrot.lane.b32.xlu2 %v1734_v1, %s1696_s23 }
  0x3a   :  { %245 = vrot.lane.b32.xlu1 %v1729_v0, %s1696_s23  ;;  %243 = vrot.lane.b32.xlu0 %v234_v14, %s1696_s23 }
  0x3b   :  { %247 = vrot.lane.b32.xlu2 %v236_v15, %s1696_s23 }
  0x42   :  { %914 = vrot.lane.b32.xlu1 %v1487_v16, %s1693_s20  ;;  %912 = vrot.lane.b32.xlu0 %v1785_v9, %s1693_s20 }
  0x43   :  { %916 = vrot.lane.b32.xlu2 %v1803_v13, %s1693_s20 }
  0x4a   :  { %918 = vrot.lane.b32.xlu0 %v1489_v17, %s1693_s20  ;;  %208 = vrot.lane.b32.xlu1 %v1734_v1, %s1697_s8 }
  0x4b   :  { %210 = vrot.lane.b32.xlu2 %v201_v18, %s1697_s8 }
  0x52   :  { %212 = vrot.lane.b32.xlu0 %v1729_v0, %s1697_s8  ;;  %214 = vrot.lane.b32.xlu1 %v203_v19, %s1697_s8 }
  0x53   :  { %880 = vrot.lane.b32.xlu2 %v1785_v9, %s1695_s10 }
  0x5a   :  { %882 = vrot.lane.b32.xlu0 %v1483_v20, %s1695_s10  ;;  %884 = vrot.lane.b32.xlu1 %v1803_v13, %s1695_s10 }
  0x5b   :  { %886 = vrot.lane.b32.xlu2 %v1485_v21, %s1695_s10 }
  0x5d   :  { %v308_v22 = vpop.permute.xlu2 %307 }
  0x5e   :  { %v315_v24 = vrot.slane %v308_v22, 4 }
  0x62   :  { %177 = vrot.lane.b32.xlu1 %v168_v23, %s1698_s17  ;;  %175 = vrot.lane.b32.xlu0 %v1734_v1, %s1698_s17 }
  0x63   :  { %179 = vrot.lane.b32.xlu2 %v1729_v0, %s1698_s17 }
  0x65   :  { %v310_v25 = vpop.permute.xlu2 %309 }
  0x66   :  { %v316_v26 = vrot.slane %v310_v25, 4  ;;  %329 = vst.msk [vmem:[#allocation2 + $0x98] sm:$0xf] %vm129_vm0, %v310_v25 }
  0x68   :  { %v319_v28 = vsel %vm153_vm1, %v315_v24, %v316_v26 }
  0x69   :  { %v321_v30 = vsel %vm320_vm2, %v308_v22, %v319_v28 }
  0x6a   :  { %848 = vrot.lane.b32.xlu1 %v1785_v9, %s1696_s23  ;;  %181 = vrot.lane.b32.xlu0 %v170_v27, %s1698_s17  ;;  %328 = vst [vmem:[#allocation2 + $0x90] sm:$0xff] %v321_v30  ;;  %v1467_v27 = vld [vmem:[%s2319_s0 + $0x20] sm:$0xf] }
  0x6b   :  { %850 = vrot.lane.b32.xlu2 %v1479_v29, %s1696_s23 }
  0x6d   :  { %v1877_v31 = vpop.permute.xlu2 %373 }
  0x6e   :  { %v381_v5 = vrot.slane %v1877_v31, 4 }
  0x71   :  { %v1425_v14 = vld [vmem:[#allocation2 + $0x90] sm:$0xf]  ;;  %v1645_v18 = vld [vmem:[#allocation2 + $0x94] sm:$0xf] }
  0x72   :  { %854 = vrot.lane.b32.xlu1 %v1481_v32, %s1696_s23  ;;  %852 = vrot.lane.b32.xlu0 %v1803_v13, %s1696_s23  ;;  %v1347_v32 = vld [vmem:[%s2320_s1 + $0x8] sm:$0xf0] }
  0x73   :  { %141 = vrot.lane.b32.xlu2 %v1734_v1, %s1699_s26 }
  0x74   :  { %v345_v33 = vpop.permute.xlu1 %344  ;;  %v341_v34 = vpop.permute.xlu0 %340 }
  0x75   :  { %v1887_v35 = vpop.permute.xlu2 %379  ;;  %v350_v40 = vrot.slane %v345_v33, 4  ;;  %v348_v41 = vrot.slane %v341_v34, 4 }
  0x76   :  { %397 = vst.msk [vmem:[#allocation2 + $0xd4] sm:$0xf] %vm129_vm0, %v1887_v35  ;;  %v384_v2 = vrot.slane %v1887_v35, 4 }
  0x7a   :  { %145 = vrot.lane.b32.xlu1 %v1729_v0, %s1699_s26  ;;  %143 = vrot.lane.b32.xlu0 %v134_v36, %s1699_s26 }
  0x7b   :  { %147 = vrot.lane.b32.xlu2 %v136_v37, %s1699_s26 }
  0x7c   :  { %v347_v38 = vpop.permute.xlu1 %346  ;;  %v343_v39 = vpop.permute.xlu0 %342 }
  0x7d   :  { %v351_v42 = vrot.slane %v347_v38, 4  ;;  %364 = vst.msk [vmem:[#allocation2 + $0xbc] sm:$0xf] %vm129_vm0, %v347_v38  ;;  %v349_v43 = vrot.slane %v343_v39, 4  ;;  %v1902_v44 = vpop.permute.xlu2 %278  ;;  %v1653_v28 = vld [vmem:[#allocation2 + $0xd0] sm:$0xf0] }
  0x7e   :  { %362 = vst.msk [vmem:[#allocation2 + $0xb0] sm:$0xf] %vm129_vm0, %v343_v39 }
  0x7f   :  { %v355_v45 = vsel %vm153_vm1, %v350_v40, %v351_v42  ;;  %v352_v46 = vsel %vm153_vm1, %v348_v41, %v349_v43 }
  0x80   :  { %v356_v48 = vsel %vm353_vm3, %v345_v33, %v355_v45  ;;  %v354_v49 = vsel %vm353_vm3, %v341_v34, %v352_v46  ;;  %v1469_v45 = vld [vmem:[%s2319_s0 + $0x2c] sm:$0xf] }
  0x81   :  { %363 = vst [vmem:[#allocation2 + $0xb4] sm:$0xff] %v356_v48 }
  0x82   :  { %361 = vst [vmem:[#allocation2 + $0xa8] sm:$0xff] %v354_v49  ;;  %818 = vrot.lane.b32.xlu1 %v1475_v47, %s1697_s8  ;;  %816 = vrot.lane.b32.xlu0 %v1785_v9, %s1697_s8 }
  0x83   :  { %820 = vrot.lane.b32.xlu2 %v1803_v13, %s1697_s8 }
  0x84   :  { %v314_v50 = vpop.permute.xlu1 %313  ;;  %v312_v51 = vpop.permute.xlu0 %311  ;;  %v1650_v30 = vld [vmem:[#allocation2 + $0xb8] sm:$0xf0] }
  0x85   :  { %v318_v52 = vrot.slane %v314_v50, 4  ;;  %331 = vst.msk [vmem:[#allocation2 + $0xa4] sm:$0xf] %vm129_vm0, %v314_v50  ;;  %v317_v53 = vrot.slane %v312_v51, 4  ;;  %v1918_v54 = vld [vmem:[#allocation2 + $0xb0] sm:$0xf]  ;;  %v1920_v55 = vpop.permute.xlu2 %946 }
  0x86   :  { %965 = vst.msk [vmem:[#allocation2 + $0xb0] sm:$0xf] %vm129_vm0, %v1920_v55  ;;  %v1446_v41 = vor.u32 %v1650_v30, %v1918_v54  ;;  %v953_v43 = vrot.slane %v1920_v55, 4  ;;  %v284_v50 = vrot.slane %v1902_v44, 4  ;;  %v1433_v54 = vld [vmem:[#allocation2 + $0x98] sm:$0xf] }
  0x87   :  { %v322_v56 = vsel %vm153_vm1, %v317_v53, %v318_v52 }
  0x88   :  { %v323_v58 = vsel %vm320_vm2, %v312_v51, %v322_v56  ;;  %v1649_v59 = vld [vmem:[#allocation2 + $0xb0] sm:$0xf0]  ;;  %v1439_v60 = vld [vmem:[#allocation2 + $0xb4] sm:$0xf0] }
  0x89   :  { %330 = vst [vmem:[#allocation2 + $0x9c] sm:$0xff] %v323_v58  ;;  %v1437_v62 = vld [vmem:[#allocation2 + $0xa8] sm:$0xf]  ;;  %v1648_v63 = vld [vmem:[#allocation2 + $0xac] sm:$0xf] }
  0x8a   :  { %784 = vrot.lane.b32.xlu1 %v1785_v9, %s1698_s17  ;;  %822 = vrot.lane.b32.xlu0 %v1477_v57, %s1697_s8  ;;  %v1438_v0 = vor.u32 %v1649_v59, %v1437_v62  ;;  %v1442_v1 = vor.u32 %v1648_v63, %v1439_v60  ;;  %v1495_v58 = vld [vmem:[%s2319_s0 + $0x20] sm:$0xf] }
  0x8b   :  { %786 = vrot.lane.b32.xlu2 %v1471_v61, %s1698_s17 }
  0x8c   :  { %593 = vmatpush.bf16.msra.mxu0 %v1438_v0  ;;  %621 = vmatpush.bf16.msra.mxu2 %v1442_v1  ;;  %v378_v3 = vpop.permute.xlu1 %377  ;;  %v376_v4 = vpop.permute.xlu0 %375  ;;  %v1647_v49 = vld [vmem:[#allocation2 + $0xa0] sm:$0xf0] }
  0x8d   :  { %v383_v6 = vrot.slane %v378_v3, 4  ;;  %v382_v7 = vrot.slane %v376_v4, 4  ;;  %395 = vst.msk [vmem:[#allocation2 + $0xc8] sm:$0xf] %vm129_vm0, %v376_v4  ;;  %v1939_v8 = vpop.permute.xlu2 %241  ;;  %v1434_v57 = vor.u32 %v1647_v49, %v1433_v54 }
  0x8f   :  { %v385_v10 = vsel %vm153_vm1, %v381_v5, %v382_v7  ;;  %v388_v11 = vsel %vm153_vm1, %v383_v6, %v384_v2  ;;  %v1497_v5 = vld [vmem:[%s2319_s0 + $0x2c] sm:$0xf] }
  0x90   :  { %v387_v15 = vsel %vm386_vm4, %v1877_v31, %v385_v10  ;;  %v389_v16 = vsel %vm386_vm4, %v378_v3, %v388_v11  ;;  %v1646_v17 = vld [vmem:[#allocation2 + $0x98] sm:$0xf0]  ;;  %v1427_v19 = vld [vmem:[#allocation2 + $0x9c] sm:$0xf0]  ;;  %v1625_v31 = vld [vmem:[%s2320_s1 + $0x4] sm:$0xf] }
  0x91   :  { %394 = vst [vmem:[#allocation2 + $0xc0] sm:$0xff] %v387_v15  ;;  %v1426_v20 = vor.u32 %v1646_v17, %v1425_v14  ;;  %v1430_v21 = vor.u32 %v1645_v18, %v1427_v19  ;;  %v1978_v46 = vor.u32 %v1625_v31, %v1347_v32  ;;  %v249_v19 = vrot.slane %v1939_v8, 4 }
  0x92   :  { %396 = vst [vmem:[#allocation2 + $0xcc] sm:$0xff] %v389_v16  ;;  %790 = vrot.lane.b32.xlu1 %v1473_v12, %s1698_s17  ;;  %788 = vrot.lane.b32.xlu0 %v1803_v13, %s1698_s17 }
  0x93   :  { %594 = vmatpush.bf16.msra.mxu0 %v1426_v20  ;;  %622 = vmatpush.bf16.msra.mxu2 %v1430_v21 }
  0x94   :  { %v277_v22 = vpop.permute.xlu1 %276  ;;  %v275_v23 = vpop.permute.xlu0 %274  ;;  %752 = vrot.lane.b32.xlu2 %v1785_v9, %s1699_s26  ;;  %v1457_v36 = vld [vmem:[#allocation2 + $0xc8] sm:$0xf] }
  0x95   :  { %v283_v24 = vrot.slane %v277_v22, 4  ;;  %296 = vst.msk [vmem:[#allocation2 + $0x80] sm:$0xf] %vm129_vm0, %v277_v22  ;;  %v282_v25 = vrot.slane %v275_v23, 4  ;;  %v1955_v26 = vpop.permute.xlu2 %247  ;;  %v1458_v42 = vor.u32 %v1653_v28, %v1457_v36 }
  0x96   :  { %265 = vst.msk [vmem:[#allocation2 + $0x74] sm:$0xf] %vm129_vm0, %v1955_v26  ;;  %v252_v16 = vrot.slane %v1955_v26, 4 }
  0x97   :  { %v286_v29 = vsel %vm153_vm1, %v282_v25, %v283_v24 }
  0x98   :  { %v288_v33 = vsel %vm287_vm5, %v275_v23, %v286_v29  ;;  %v1449_v34 = vld [vmem:[#allocation2 + $0xc0] sm:$0xf]  ;;  %v1651_v35 = vld [vmem:[#allocation2 + $0xc4] sm:$0xf] }
  0x99   :  { %295 = vst [vmem:[#allocation2 + $0x78] sm:$0xff] %v288_v33  ;;  %v1652_v37 = vld [vmem:[#allocation2 + $0xc8] sm:$0xf0]  ;;  %v1451_v38 = vld [vmem:[#allocation2 + $0xcc] sm:$0xf0] }
  0x9a   :  { %756 = vrot.lane.b32.xlu1 %v1803_v13, %s1699_s26  ;;  %754 = vrot.lane.b32.xlu0 %v1467_v27, %s1699_s26  ;;  %v1450_v39 = vor.u32 %v1652_v37, %v1449_v34  ;;  %v1454_v40 = vor.u32 %v1651_v35, %v1451_v38 }
  0x9c   :  { %614 = vmatpush.bf16.msra.mxu1 %v1450_v39  ;;  %642 = vmatpush.bf16.msra.mxu3 %v1454_v40  ;;  %v945_v47 = vpop.permute.xlu1 %944  ;;  %v281_v48 = vpop.permute.xlu0 %280  ;;  %v1421_v63 = vld [vmem:[#allocation2 + $0x80] sm:$0xf] }
  0x9d   :  { %v952_v51 = vrot.slane %v945_v47, 4  ;;  %v285_v52 = vrot.slane %v281_v48, 4  ;;  %298 = vst.msk [vmem:[#allocation2 + $0x8c] sm:$0xf] %vm129_vm0, %v281_v48  ;;  %v1982_v53 = vpop.permute.xlu2 %916  ;;  %758 = vrot.lane.b32.xlu2 %v1469_v45, %s1699_s26  ;;  %v1641_v30 = vld [vmem:[#allocation2 + $0x70] sm:$0xf0] }
  0x9e   :  { %v922_v49 = vrot.slane %v1982_v53, 4 }
  0x9f   :  { %v956_v55 = vsel %vm153_vm1, %v952_v51, %v953_v43  ;;  %v289_v56 = vsel %vm153_vm1, %v284_v50, %v285_v52  ;;  %1460 = vmatmul.msk.bf16.vlgmr.msra.gmra.mxu3 %vm589_vm6, %v1978_v46  ;;  %1459 = vmatmul.msk.bf16.vlgmr.msra.gmra.mxu1 %vm589_vm6, %v1978_v46 }
  0xa0   :  { %649 = vmatpush.bf16.msrb.mxu1 %v1446_v41  ;;  %670 = vmatpush.bf16.msrb.mxu3 %v1458_v42  ;;  %v957_v59 = vsel %vm353_vm3, %v945_v47, %v956_v55  ;;  %v290_v60 = vsel %vm287_vm5, %v1902_v44, %v289_v56  ;;  %v1413_v7 = vld [vmem:[#allocation2 + $0x78] sm:$0xf]  ;;  %v1642_v10 = vld [vmem:[#allocation2 + $0x7c] sm:$0xf] }
  0xa1   :  { %964 = vst [vmem:[#allocation2 + $0xa8] sm:$0xff] %v957_v59 }
  0xa2   :  { %297 = vst [vmem:[#allocation2 + $0x84] sm:$0xff] %v290_v60  ;;  %978 = vrot.lane.b32.xlu1 %v1495_v58, %s1694_s29  ;;  %976 = vrot.lane.b32.xlu0 %v1785_v9, %s1694_s29 }
  0xa4   :  { %650 = vmatpush.bf16.msrb.mxu1 %v1434_v57  ;;  %v951_v61 = vpop.permute.xlu1 %950  ;;  %v949_v62 = vpop.permute.xlu0 %948  ;;  %v1644_v0 = vld [vmem:[#allocation2 + $0x88] sm:$0xf0] }
  0xa5   :  { %v955_v1 = vrot.slane %v951_v61, 4  ;;  %967 = vst.msk [vmem:[#allocation2 + $0xbc] sm:$0xf] %vm129_vm0, %v951_v61  ;;  %v954_v2 = vrot.slane %v949_v62, 4  ;;  %v1422_v3 = vor.u32 %v1644_v0, %v1421_v63  ;;  %v2001_v4 = vpop.permute.xlu2 %210  ;;  %980 = vrot.lane.b32.xlu2 %v1803_v13, %s1694_s29 }
  0xa6   :  { %230 = vst.msk [vmem:[#allocation2 + $0x50] sm:$0xf] %vm129_vm0, %v2001_v4 }
  0xa7   :  { %v958_v44 = vsel %vm153_vm1, %v954_v2, %v955_v1 }
  0xa8   :  { %651 = vmatpush.bf16.msrb.mxu1 %v1422_v3  ;;  %v959_v6 = vsel %vm353_vm3, %v949_v62, %v958_v44  ;;  %v1592_v27 = vld [vmem:[#allocation2 + $0xa8] sm:$0xf] }
  0xa9   :  { %966 = vst [vmem:[#allocation2 + $0xb4] sm:$0xff] %v959_v6  ;;  %v1643_v11 = vld [vmem:[#allocation2 + $0x80] sm:$0xf0]  ;;  %v1415_v12 = vld [vmem:[#allocation2 + $0x84] sm:$0xf0] }
  0xaa   :  { %982 = vrot.lane.b32.xlu0 %v1497_v5, %s1694_s29  ;;  %v1414_v14 = vor.u32 %v1643_v11, %v1413_v7  ;;  %v1418_v15 = vor.u32 %v1642_v10, %v1415_v12 }
  0xac   :  { %595 = vmatpush.bf16.msra.mxu0 %v1414_v14  ;;  %623 = vmatpush.bf16.msra.mxu2 %v1418_v15  ;;  %v246_v17 = vpop.permute.xlu1 %245  ;;  %v244_v18 = vpop.permute.xlu0 %243 }
  0xad   :  { %v251_v20 = vrot.slane %v246_v17, 4  ;;  %v250_v21 = vrot.slane %v244_v18, 4  ;;  %263 = vst.msk [vmem:[#allocation2 + $0x68] sm:$0xf] %vm129_vm0, %v244_v18  ;;  %v2016_v22 = vpop.permute.xlu2 %880  ;;  %v1397_v5 = vld [vmem:[#allocation2 + $0x50] sm:$0xf] }
  0xae   :  { %v888_v7 = vrot.slane %v2016_v22, 4 }
  0xaf   :  { %v253_v23 = vsel %vm153_vm1, %v249_v19, %v250_v21  ;;  %v256_v24 = vsel %vm153_vm1, %v251_v20, %v252_v16  ;;  %1461 = vmatmul.msk.bf16.vlgmr.msrb.gmra.mxu3 %vm589_vm6, %v1978_v46  ;;  %v217_v46 = vrot.slane %v2001_v4, 4 }
  0xb0   :  { %v255_v25 = vsel %vm254_vm7, %v1939_v8, %v253_v23  ;;  %v257_v26 = vsel %vm254_vm7, %v246_v17, %v256_v24  ;;  %v1678_v28 = vld [vmem:[#allocation2 + $0xb0] sm:$0xf0] }
  0xb1   :  { %262 = vst [vmem:[#allocation2 + $0x60] sm:$0xff] %v255_v25  ;;  %v1593_v29 = vor.u32 %v1678_v28, %v1592_v27 }
  0xb2   :  { %264 = vst [vmem:[#allocation2 + $0x6c] sm:$0xff] %v257_v26 }
  0xb3   :  { %1194 = vmatpush.bf16.msra.mxu3 %v1593_v29 }
  0xb4   :  { %v915_v31 = vpop.permute.xlu1 %914  ;;  %v913_v32 = vpop.permute.xlu0 %912  ;;  %v1409_v33 = vld [vmem:[#allocation2 + $0x68] sm:$0xf] }
  0xb5   :  { %v921_v34 = vrot.slane %v915_v31, 4  ;;  %933 = vst.msk [vmem:[#allocation2 + $0x98] sm:$0xf] %vm129_vm0, %v915_v31  ;;  %v920_v35 = vrot.slane %v913_v32, 4  ;;  %v1410_v36 = vor.u32 %v1641_v30, %v1409_v33  ;;  %v887_v37 = vpop.permute.xlu2 %886 }
  0xb6   :  { %903 = vst.msk [vmem:[#allocation2 + $0x8c] sm:$0xf] %vm129_vm0, %v887_v37  ;;  %v891_v3 = vrot.slane %v887_v37, 4 }
  0xb7   :  { %v924_v8 = vsel %vm153_vm1, %v920_v35, %v921_v34  ;;  %652 = vmatpush.bf16.msrb.mxu1 %v1410_v36 }
  0xb8   :  { %v925_v38 = vsel %vm320_vm2, %v913_v32, %v924_v8  ;;  %v1401_v39 = vld [vmem:[#allocation2 + $0x60] sm:$0xf]  ;;  %v1639_v40 = vld [vmem:[#allocation2 + $0x64] sm:$0xf]  ;;  %v125_v8 = vld [vmem:[%s2319_s0 + $0x8] sm:$0xf] }
  0xb9   :  { %932 = vst [vmem:[#allocation2 + $0x90] sm:$0xff] %v925_v38  ;;  %v1640_v41 = vld [vmem:[#allocation2 + $0x68] sm:$0xf0]  ;;  %v1403_v42 = vld [vmem:[#allocation2 + $0x6c] sm:$0xf0] }
  0xba   :  { %v1402_v43 = vor.u32 %v1640_v41, %v1401_v39  ;;  %v1406_v45 = vor.u32 %v1639_v40, %v1403_v42  ;;  %130 = vst.msk [vmem:[#allocation2 + $0x8] sm:$0xf] %vm129_vm0, %v125_v8 }
  0xbc   :  { %596 = vmatpush.bf16.msra.mxu0 %v1402_v43  ;;  %624 = vmatpush.bf16.msra.mxu2 %v1406_v45  ;;  %v919_v47 = vpop.permute.xlu0 %918  ;;  %v209_v48 = vpop.permute.xlu1 %208  ;;  %v2068_v45 = vld [vmem:[#allocation2] sm:$0xf] }
  0xbd   :  { %v923_v50 = vrot.slane %v919_v47, 4  ;;  %935 = vst.msk [vmem:[#allocation2 + $0xa4] sm:$0xf] %vm129_vm0, %v919_v47  ;;  %v216_v51 = vrot.slane %v209_v48, 4  ;;  %v2032_v52 = vpop.permute.xlu2 %179 }
  0xbe   :  { %v185_v38 = vrot.slane %v2032_v52, 4 }
  0xbf   :  { %v926_v54 = vsel %vm153_vm1, %v922_v49, %v923_v50  ;;  %v220_v55 = vsel %vm153_vm1, %v216_v51, %v217_v46  ;;  %v2070_v46 = vld [vmem:[#allocation2 + $0x4] sm:$0xf]  ;;  %v127_v49 = vld [vmem:[%s2319_s0 + $0x14] sm:$0xf]  ;;  %v2080_v50 = vld [vmem:[#allocation2 + $0x8] sm:$0xf0] }
  0xc0   :  { %v927_v56 = vsel %vm320_vm2, %v1982_v53, %v926_v54  ;;  %v222_v57 = vsel %vm221_vm8, %v209_v48, %v220_v55  ;;  %v1580_v1 = vld [vmem:[#allocation2 + $0x90] sm:$0xf]  ;;  %740 = vst [vmem:[#allocation2] sm:$0xff] %v1785_v9 }
  0xc1   :  { %934 = vst [vmem:[#allocation2 + $0x9c] sm:$0xff] %v927_v56  ;;  %v2082_v51 = vld [vmem:[#allocation2 + $0xc] sm:$0xf0] }
  0xc2   :  { %229 = vst [vmem:[#allocation2 + $0x48] sm:$0xff] %v222_v57 }
  0xc3   :  { %742 = vst [vmem:[#allocation2 + $0xc] sm:$0xff] %v1803_v13 }
  0xc4   :  { %v213_v58 = vpop.permute.xlu0 %212  ;;  %v215_v59 = vpop.permute.xlu1 %214  ;;  %132 = vst.msk [vmem:[#allocation2 + $0x14] sm:$0xf] %vm129_vm0, %v127_v49  ;;  %v1594_v49 = vld [vmem:[#allocation2 + $0xb4] sm:$0xf0] }
  0xc5   :  { %v218_v60 = vrot.slane %v213_v58, 4  ;;  %v219_v61 = vrot.slane %v215_v59, 4  ;;  %232 = vst.msk [vmem:[#allocation2 + $0x5c] sm:$0xf] %vm129_vm0, %v215_v59  ;;  %v851_v62 = vpop.permute.xlu2 %850 }
  0xc6   :  { %869 = vst.msk [vmem:[#allocation2 + $0x68] sm:$0xf] %vm129_vm0, %v851_v62  ;;  %v857_v35 = vrot.slane %v851_v62, 4 }
  0xc7   :  { %v223_v63 = vsel %vm153_vm1, %v218_v60, %v219_v61 }
  0xc8   :  { %v224_v0 = vsel %vm221_vm8, %v213_v58, %v223_v63  ;;  %v1675_v2 = vld [vmem:[#allocation2 + $0x98] sm:$0xf0] }
  0xc9   :  { %231 = vst [vmem:[#allocation2 + $0x54] sm:$0xff] %v224_v0  ;;  %v1581_v53 = vor.u32 %v1675_v2, %v1580_v1  ;;  %v1389_v17 = vld [vmem:[#allocation2 + $0x48] sm:$0xf]  ;;  %v1636_v21 = vld [vmem:[#allocation2 + $0x4c] sm:$0xf] }
  0xcb   :  { %1195 = vmatpush.bf16.msra.mxu3 %v1581_v53  ;;  %v1361_v53 = vld [vmem:[#allocation2 + $0x8] sm:$0xf] }
  0xcc   :  { %v883_v4 = vpop.permute.xlu0 %882  ;;  %v885_v44 = vpop.permute.xlu1 %884  ;;  %v1638_v6 = vld [vmem:[#allocation2 + $0x58] sm:$0xf0] }
  0xcd   :  { %v889_v10 = vrot.slane %v883_v4, 4  ;;  %901 = vst.msk [vmem:[#allocation2 + $0x80] sm:$0xf] %vm129_vm0, %v883_v4  ;;  %v890_v11 = vrot.slane %v885_v44, 4  ;;  %v1398_v12 = vor.u32 %v1638_v6, %v1397_v5  ;;  %v2045_v14 = vpop.permute.xlu2 %141  ;;  %v1465_v4 = vld [vmem:[%s2319_s0 + $0x2c] sm:$0xf] }
  0xce   :  { %v1629_v5 = vld [vmem:[#allocation2 + $0x10] sm:$0xf0] }
  0xcf   :  { %v892_v15 = vsel %vm153_vm1, %v888_v7, %v889_v10  ;;  %v894_v16 = vsel %vm153_vm1, %v890_v11, %v891_v3  ;;  %653 = vmatpush.bf16.msrb.mxu1 %v1398_v12  ;;  %v1463_v3 = vld [vmem:[%s2319_s0 + $0x20] sm:$0xf]  ;;  %743 = vst.msk [vmem:[#allocation2 + $0x14] sm:$0xf] %vm129_vm0, %v1465_v4  ;;  %v149_v10 = vrot.slane %v2045_v14, 4 }
  0xd0   :  { %v893_v18 = vsel %vm287_vm5, %v2016_v22, %v892_v15  ;;  %v895_v19 = vsel %vm287_vm5, %v885_v44, %v894_v16  ;;  %v1637_v20 = vld [vmem:[#allocation2 + $0x50] sm:$0xf0]  ;;  %v1391_v23 = vld [vmem:[#allocation2 + $0x54] sm:$0xf0]  ;;  %741 = vst.msk [vmem:[#allocation2 + $0x8] sm:$0xf] %vm129_vm0, %v1463_v3 }
  0xd1   :  { %900 = vst [vmem:[#allocation2 + $0x78] sm:$0xff] %v893_v18  ;;  %v1390_v24 = vor.u32 %v1637_v20, %v1389_v17  ;;  %v1394_v25 = vor.u32 %v1636_v21, %v1391_v23 }
  0xd2   :  { %902 = vst [vmem:[#allocation2 + $0x84] sm:$0xff] %v895_v19 }
  0xd3   :  { %597 = vmatpush.bf16.msra.mxu0 %v1390_v24  ;;  %625 = vmatpush.bf16.msra.mxu2 %v1394_v25 }
  0xd4   :  { %v178_v26 = vpop.permute.xlu1 %177  ;;  %v176_v27 = vpop.permute.xlu0 %175 }
  0xd5   :  { %v184_v28 = vrot.slane %v178_v26, 4  ;;  %197 = vst.msk [vmem:[#allocation2 + $0x38] sm:$0xf] %vm129_vm0, %v178_v26  ;;  %v183_v29 = vrot.slane %v176_v27, 4  ;;  %v2053_v30 = vpop.permute.xlu2 %147 }
  0xd6   :  { %166 = vst.msk [vmem:[#allocation2 + $0x2c] sm:$0xf] %vm129_vm0, %v2053_v30  ;;  %v152_v44 = vrot.slane %v2053_v30, 4 }
  0xd7   :  { %v187_v22 = vsel %vm153_vm1, %v183_v29, %v184_v28 }
  0xd8   :  { %v189_v31 = vsel %vm188_vm9, %v176_v27, %v187_v22  ;;  %v1568_v32 = vld [vmem:[#allocation2 + $0x78] sm:$0xf] }
  0xd9   :  { %196 = vst [vmem:[#allocation2 + $0x30] sm:$0xff] %v189_v31  ;;  %v1672_v33 = vld [vmem:[#allocation2 + $0x80] sm:$0xf0]  ;;  %v1362_v31 = vor.u32 %v1629_v5, %v1361_v53  ;;  %v1570_v4 = vld [vmem:[#allocation2 + $0x84] sm:$0xf0] }
  0xda   :  { %v1569_v34 = vor.u32 %v1672_v33, %v1568_v32 }
  0xdc   :  { %1196 = vmatpush.bf16.msra.mxu3 %v1569_v34  ;;  %v849_v36 = vpop.permute.xlu1 %848  ;;  %v182_v37 = vpop.permute.xlu0 %181  ;;  %v1385_v56 = vld [vmem:[#allocation2 + $0x38] sm:$0xf] }
  0xdd   :  { %v856_v39 = vrot.slane %v849_v36, 4  ;;  %v186_v40 = vrot.slane %v182_v37, 4  ;;  %199 = vst.msk [vmem:[#allocation2 + $0x44] sm:$0xf] %vm129_vm0, %v182_v37  ;;  %v2064_v41 = vpop.permute.xlu2 %820  ;;  %v1632_v24 = vld [vmem:[#allocation2 + $0x28] sm:$0xf0] }
  0xdf   :  { %v860_v42 = vsel %vm153_vm1, %v856_v39, %v857_v35  ;;  %v190_v43 = vsel %vm153_vm1, %v185_v38, %v186_v40  ;;  %v1626_v35 = vld [vmem:[%s2320_s1 + $0x4] sm:$0xf0] }
  0xe0   :  { %v861_v47 = vsel %vm254_vm7, %v849_v36, %v860_v42  ;;  %v191_v48 = vsel %vm188_vm9, %v2032_v52, %v190_v43  ;;  %v1377_v61 = vld [vmem:[#allocation2 + $0x30] sm:$0xf]  ;;  %v1633_v62 = vld [vmem:[#allocation2 + $0x34] sm:$0xf] }
  0xe1   :  { %868 = vst [vmem:[#allocation2 + $0x60] sm:$0xff] %v861_v47  ;;  %v1354_v47 = vor.u32 %v2080_v50, %v2068_v45 }
  0xe2   :  { %198 = vst [vmem:[#allocation2 + $0x3c] sm:$0xff] %v191_v48  ;;  %v1358_v48 = vor.u32 %v2070_v46, %v2082_v51 }
  0xe4   :  { %v855_v54 = vpop.permute.xlu1 %854  ;;  %v853_v55 = vpop.permute.xlu0 %852  ;;  %v1635_v57 = vld [vmem:[#allocation2 + $0x40] sm:$0xf0] }
  0xe5   :  { %v859_v52 = vrot.slane %v855_v54, 4  ;;  %871 = vst.msk [vmem:[#allocation2 + $0x74] sm:$0xf] %vm129_vm0, %v855_v54  ;;  %v858_v9 = vrot.slane %v853_v55, 4  ;;  %v1386_v58 = vor.u32 %v1635_v57, %v1385_v56  ;;  %v2087_v59 = vpop.permute.xlu2 %786  ;;  %v1679_v54 = vld [vmem:[#allocation2 + $0xb8] sm:$0xf0] }
  0xe6   :  { %805 = vst.msk [vmem:[#allocation2 + $0x38] sm:$0xf] %vm129_vm0, %v2087_v59  ;;  %v793_v40 = vrot.slane %v2087_v59, 4  ;;  %v826_v56 = vrot.slane %v2064_v41, 4 }
  0xe7   :  { %v862_v60 = vsel %vm153_vm1, %v858_v9, %v859_v52  ;;  %654 = vmatpush.bf16.msrb.mxu1 %v1386_v58  ;;  %v1677_v9 = vld [vmem:[#allocation2 + $0xac] sm:$0xf]  ;;  %v1600_v58 = vld [vmem:[#allocation2 + $0xb0] sm:$0xf] }
  0xe8   :  { %v863_v13 = vsel %vm254_vm7, %v853_v55, %v862_v60  ;;  %v1556_v20 = vld [vmem:[#allocation2 + $0x60] sm:$0xf]  ;;  %v1597_v45 = vor.u32 %v1677_v9, %v1594_v49  ;;  %v1601_v50 = vor.u32 %v1679_v54, %v1600_v58 }
  0xe9   :  { %870 = vst [vmem:[#allocation2 + $0x6c] sm:$0xff] %v863_v13  ;;  %v1634_v63 = vld [vmem:[#allocation2 + $0x38] sm:$0xf0]  ;;  %v1379_v0 = vld [vmem:[#allocation2 + $0x3c] sm:$0xf0] }
  0xea   :  { %v1378_v1 = vor.u32 %v1634_v63, %v1377_v61  ;;  %v1382_v2 = vor.u32 %v1633_v62, %v1379_v0  ;;  %v1582_v13 = vld [vmem:[#allocation2 + $0x9c] sm:$0xf0]  ;;  %v1676_v61 = vld [vmem:[#allocation2 + $0xa0] sm:$0xf0]  ;;  %v1674_v62 = vld [vmem:[#allocation2 + $0x94] sm:$0xf] }
  0xeb   :  { %v1588_v63 = vld [vmem:[#allocation2 + $0x98] sm:$0xf]  ;;  %v1585_v0 = vor.u32 %v1674_v62, %v1582_v13  ;;  %v1656_v13 = vld [vmem:[#allocation2 + $0x4] sm:$0xf] }
  0xec   :  { %598 = vmatpush.bf16.msra.mxu0 %v1378_v1  ;;  %626 = vmatpush.bf16.msra.mxu2 %v1382_v2  ;;  %v146_v6 = vpop.permute.xlu1 %145  ;;  %v144_v7 = vpop.permute.xlu0 %143  ;;  %v1589_v1 = vor.u32 %v1676_v61, %v1588_v63  ;;  %v1673_v2 = vld [vmem:[#allocation2 + $0x88] sm:$0xf0] }
  0xed   :  { %v151_v11 = vrot.slane %v146_v6, 4  ;;  %v150_v12 = vrot.slane %v144_v7, 4  ;;  %164 = vst.msk [vmem:[#allocation2 + $0x20] sm:$0xf] %vm129_vm0, %v144_v7  ;;  %v1540_v54 = vld [vmem:[#allocation2 + $0x38] sm:$0xf] }
  0xee   :  { %v2104_v15 = vpop.permute.xlu2 %752 }
  0xef   :  { %v154_v16 = vsel %vm153_vm1, %v149_v10, %v150_v12  ;;  %v157_v17 = vsel %vm153_vm1, %v151_v11, %v152_v44  ;;  %v1576_v44 = vld [vmem:[#allocation2 + $0x80] sm:$0xf]  ;;  %v1670_v12 = vld [vmem:[#allocation2 + $0x70] sm:$0xf0] }
  0xf0   :  { %v156_v18 = vsel %vm155_vm10, %v2045_v14, %v154_v16  ;;  %v158_v19 = vsel %vm155_vm10, %v146_v6, %v157_v17  ;;  %v1669_v21 = vld [vmem:[#allocation2 + $0x68] sm:$0xf0]  ;;  %v1345_v14 = vld [vmem:[%s2320_s1] sm:$0xf]  ;;  %v1577_v11 = vor.u32 %v1673_v2, %v1576_v44 }
  0xf1   :  { %163 = vst [vmem:[#allocation2 + $0x18] sm:$0xff] %v156_v18  ;;  %v1557_v23 = vor.u32 %v1669_v21, %v1556_v20  ;;  %v1346_v55 = vor.u32 %v1626_v35, %v1345_v14  ;;  %v1668_v21 = vld [vmem:[#allocation2 + $0x64] sm:$0xf] }
  0xf2   :  { %165 = vst [vmem:[#allocation2 + $0x24] sm:$0xff] %v158_v19  ;;  %v1558_v19 = vld [vmem:[#allocation2 + $0x6c] sm:$0xf0] }
  0xf3   :  { %1197 = vmatpush.bf16.msra.mxu3 %v1557_v23  ;;  %v1564_v23 = vld [vmem:[#allocation2 + $0x68] sm:$0xf] }
  0xf4   :  { %v819_v25 = vpop.permute.xlu1 %818  ;;  %v817_v26 = vpop.permute.xlu0 %816  ;;  %v1373_v27 = vld [vmem:[#allocation2 + $0x20] sm:$0xf] }
  0xf5   :  { %v825_v28 = vrot.slane %v819_v25, 4  ;;  %837 = vst.msk [vmem:[#allocation2 + $0x50] sm:$0xf] %vm129_vm0, %v819_v25  ;;  %v824_v29 = vrot.slane %v817_v26, 4  ;;  %v1374_v30 = vor.u32 %v1632_v24, %v1373_v27  ;;  %v1561_v25 = vor.u32 %v1668_v21, %v1558_v19  ;;  %v1654_v19 = vld [vmem:[%s2320_s1 + $0x4] sm:$0xf] }
  0xf7   :  { %v828_v22 = vsel %vm153_vm1, %v824_v29, %v825_v28  ;;  %655 = vmatpush.bf16.msrb.mxu1 %v1374_v30  ;;  %v2120_v36 = vpop.permute.xlu2 %758 }
  0xf8   :  { %v829_v32 = vsel %vm221_vm8, %v817_v26, %v828_v22  ;;  %v1365_v33 = vld [vmem:[#allocation2 + $0x18] sm:$0xf]  ;;  %v1630_v34 = vld [vmem:[#allocation2 + $0x1c] sm:$0xf]  ;;  %775 = vst.msk [vmem:[#allocation2 + $0x2c] sm:$0xf] %vm129_vm0, %v2120_v36  ;;  %v1565_v26 = vor.u32 %v1670_v12, %v1564_v23 }
  0xf9   :  { %836 = vst [vmem:[#allocation2 + $0x48] sm:$0xff] %v829_v32  ;;  %v1631_v37 = vld [vmem:[#allocation2 + $0x20] sm:$0xf0]  ;;  %v1367_v8 = vld [vmem:[#allocation2 + $0x24] sm:$0xf0]  ;;  %v763_v24 = vrot.slane %v2120_v36, 4 }
  0xfa   :  { %v1366_v38 = vor.u32 %v1631_v37, %v1365_v33  ;;  %v1370_v39 = vor.u32 %v1630_v34, %v1367_v8  ;;  %v760_v22 = vrot.slane %v2104_v15, 4 }
  0xfb   :  { %656 = vmatpush.bf16.msrb.mxu1 %v1362_v31 }
  0xfc   :  { %599 = vmatpush.bf16.msra.mxu0 %v1366_v38  ;;  %627 = vmatpush.bf16.msra.mxu2 %v1370_v39  ;;  %v785_v42 = vpop.permute.xlu1 %784  ;;  %v823_v43 = vpop.permute.xlu0 %822  ;;  %v1552_v33 = vld [vmem:[#allocation2 + $0x50] sm:$0xf] }
  0xfd   :  { %v792_v57 = vrot.slane %v785_v42, 4  ;;  %v827_v52 = vrot.slane %v823_v43, 4  ;;  %839 = vst.msk [vmem:[#allocation2 + $0x5c] sm:$0xf] %vm129_vm0, %v823_v43 }
  0xfe   :  { %657 = vmatmul.bf16.vlgmr.msrb.gmra.mxu1 %v1346_v55 }
  0xff   :  { %v830_v59 = vsel %vm153_vm1, %v826_v56, %v827_v52  ;;  %v796_v60 = vsel %vm153_vm1, %v792_v57, %v793_v40 }
 0x100   :  { %v831_v46 = vsel %vm221_vm8, %v2064_v41, %v830_v59  ;;  %v797_v51 = vsel %vm188_vm9, %v785_v42, %v796_v60  ;;  %600 = vmatpush.bf16.msra.mxu0 %v1354_v47  ;;  %628 = vmatpush.bf16.msra.mxu2 %v1358_v48  ;;  %v1671_v41 = vld [vmem:[#allocation2 + $0x7c] sm:$0xf]  ;;  %v1544_v17 = vld [vmem:[#allocation2 + $0x48] sm:$0xf]  ;;  %v1665_v32 = vld [vmem:[#allocation2 + $0x4c] sm:$0xf] }
 0x101   :  { %838 = vst [vmem:[#allocation2 + $0x54] sm:$0xff] %v831_v46  ;;  %v1573_v10 = vor.u32 %v1671_v41, %v1570_v4  ;;  %v1516_v60 = vld [vmem:[#allocation2 + $0x8] sm:$0xf]  ;;  %v1508_v46 = vld [vmem:[#allocation2] sm:$0xf] }
 0x102   :  { %804 = vst [vmem:[#allocation2 + $0x30] sm:$0xff] %v797_v51  ;;  %v1657_v51 = vld [vmem:[#allocation2 + $0x8] sm:$0xf0] }
 0x103   :  { %629 = vmatmul.bf16.vlgmr.msra.gmra.mxu2 %v1346_v55  ;;  %601 = vmatmul.bf16.vlgmr.msra.gmra.mxu0 %v1346_v55  ;;  %v1661_v55 = vld [vmem:[#allocation2 + $0x28] sm:$0xf0] }
 0x104   :  { %1222 = vmatpush.bf16.msrb.mxu2 %v1597_v45  ;;  %1250 = vmatpush.bf16.msrb.mxu0 %v1601_v50  ;;  %v791_v53 = vpop.permute.xlu1 %790  ;;  %v789_v3 = vpop.permute.xlu0 %788  ;;  %v1667_v30 = vld [vmem:[#allocation2 + $0x58] sm:$0xf0]  ;;  %v1658_v45 = vld [vmem:[#allocation2 + $0x10] sm:$0xf0] }
 0x105   :  { %v795_v5 = vrot.slane %v791_v53, 4  ;;  %807 = vst.msk [vmem:[#allocation2 + $0x44] sm:$0xf] %vm129_vm0, %v791_v53  ;;  %v794_v6 = vrot.slane %v789_v3, 4  ;;  %v1553_v37 = vor.u32 %v1667_v30, %v1552_v33 }
 0x107   :  { %v798_v7 = vsel %vm153_vm1, %v794_v6, %v795_v5  ;;  %v1509_v6 = vor.u32 %v1657_v51, %v1508_v46 }
 0x108   :  { %1223 = vmatpush.bf16.msrb.mxu2 %v1585_v0  ;;  %1251 = vmatpush.bf16.msrb.mxu0 %v1589_v1  ;;  %v799_v16 = vsel %vm188_vm9, %v789_v3, %v798_v7  ;;  %v1666_v18 = vld [vmem:[#allocation2 + $0x50] sm:$0xf0]  ;;  %v1546_v29 = vld [vmem:[#allocation2 + $0x54] sm:$0xf0]  ;;  %v981_v0 = vpop.permute.xlu2 %980  ;;  %v1510_v1 = vld [vmem:[#allocation2 + $0xc] sm:$0xf0]  ;;  %v1517_v3 = vor.u32 %v1658_v45, %v1516_v60 }
 0x109   :  { %806 = vst [vmem:[#allocation2 + $0x3c] sm:$0xff] %v799_v16  ;;  %v1545_v20 = vor.u32 %v1666_v18, %v1544_v17  ;;  %v1549_v36 = vor.u32 %v1665_v32, %v1546_v29  ;;  %v1532_v8 = vld [vmem:[#allocation2 + $0x30] sm:$0xf]  ;;  %v1662_v38 = vld [vmem:[#allocation2 + $0x34] sm:$0xf]  ;;  %v986_v44 = vrot.slane %v981_v0, 4 }
 0x10a   :  { %v1500_v7 = vld [vmem:[%s2320_s1] sm:$0xf] }
 0x10b   :  { %1198 = vmatpush.bf16.msra.mxu3 %v1545_v20  ;;  %v1502_v20 = vld [vmem:[%s2320_s1 + $0x8] sm:$0xf0] }
 0x10c   :  { %1224 = vmatpush.bf16.msrb.mxu2 %v1573_v10  ;;  %1252 = vmatpush.bf16.msrb.mxu0 %v1577_v11  ;;  %v757_v27 = vpop.permute.xlu1 %756  ;;  %v755_v28 = vpop.permute.xlu0 %754  ;;  %v1664_v47 = vld [vmem:[#allocation2 + $0x40] sm:$0xf0]  ;;  %v1655_v10 = vld [vmem:[%s2320_s1 + $0x4] sm:$0xf0]  ;;  %v1513_v11 = vor.u32 %v1656_v13, %v1510_v1 }
 0x10d   :  { %v762_v14 = vrot.slane %v757_v27, 4  ;;  %v761_v31 = vrot.slane %v755_v28, 4  ;;  %773 = vst.msk [vmem:[#allocation2 + $0x20] sm:$0xf] %vm129_vm0, %v755_v28  ;;  %v1541_v56 = vor.u32 %v1664_v47, %v1540_v54  ;;  %v1501_v17 = vor.u32 %v1655_v10, %v1500_v7 }
 0x10f   :  { %v764_v34 = vsel %vm153_vm1, %v760_v22, %v761_v31  ;;  %v766_v35 = vsel %vm153_vm1, %v762_v14, %v763_v24  ;;  %v1505_v22 = vor.u32 %v1654_v19, %v1502_v20  ;;  %v15_v14 = vlaneseq }
 0x110   :  { %1225 = vmatpush.bf16.msrb.mxu2 %v1561_v25  ;;  %1253 = vmatpush.bf16.msrb.mxu0 %v1565_v26  ;;  %v765_v39 = vsel %vm155_vm10, %v2104_v15, %v764_v34  ;;  %v767_v40 = vsel %vm155_vm10, %v757_v27, %v766_v35  ;;  %v1663_v42 = vld [vmem:[#allocation2 + $0x38] sm:$0xf0]  ;;  %v1534_v43 = vld [vmem:[#allocation2 + $0x3c] sm:$0xf0] }
 0x111   :  { %772 = vst [vmem:[#allocation2 + $0x18] sm:$0xff] %v765_v39  ;;  %v1533_v48 = vor.u32 %v1663_v42, %v1532_v8  ;;  %v1537_v49 = vor.u32 %v1662_v38, %v1534_v43  ;;  %v2168_v31 = vand.u32 127, %v15_v14 }
 0x112   :  { %774 = vst [vmem:[#allocation2 + $0x24] sm:$0xff] %v767_v40 }
 0x113   :  { %1199 = vmatpush.bf16.msra.mxu3 %v1533_v48  ;;  %v2171_v32 = vadd.s32 128, %v2168_v31  ;;  %v2174_v33 = vadd.s32 256, %v2168_v31  ;;  %v22_v34 = vand.u32 65535, %v2168_v31 }
 0x114   :  { %1226 = vmatpush.bf16.msrb.mxu2 %v1549_v36  ;;  %1254 = vmatpush.bf16.msrb.mxu0 %v1553_v37  ;;  %v979_v57 = vpop.permute.xlu1 %978  ;;  %v977_v52 = vpop.permute.xlu0 %976  ;;  %v1528_v9 = vld [vmem:[#allocation2 + $0x20] sm:$0xf]  ;;  %v23_v37 = vshrl.u32 %v2168_v31, 16 }
 0x115   :  { %v985_v58 = vrot.slane %v979_v57, 4  ;;  %997 = vst.msk [vmem:[#allocation2 + $0xc8] sm:$0xf] %vm129_vm0, %v979_v57  ;;  %v984_v15 = vrot.slane %v977_v52, 4  ;;  %v1529_v59 = vor.u32 %v1661_v55, %v1528_v9  ;;  %v51_v35 = vand.u32 65535, %v2171_v32 }
 0x116   :  { %v80_v36 = vand.u32 65535, %v2174_v33  ;;  %v26_v8 = vmul.u32 58254, %v22_v34  ;;  %v52_v38 = vshrl.u32 %v2171_v32, 16  ;;  %v81_v40 = vshrl.u32 %v2174_v33, 16 }
 0x117   :  { %v988_v50 = vsel %vm153_vm1, %v984_v15, %v985_v58  ;;  %v55_v39 = vmul.u32 58254, %v51_v35  ;;  %v25_v42 = vmul.u32 14564, %v22_v34  ;;  %v27_v43 = vmul.u32 14564, %v23_v37 }
 0x118   :  { %1227 = vmatpush.bf16.msrb.mxu2 %v1537_v49  ;;  %1255 = vmatpush.bf16.msrb.mxu0 %v1541_v56  ;;  %v989_v61 = vsel %vm386_vm4, %v977_v52, %v988_v50  ;;  %v1520_v62 = vld [vmem:[#allocation2 + $0x18] sm:$0xf]  ;;  %v1659_v63 = vld [vmem:[#allocation2 + $0x1c] sm:$0xf]  ;;  %v29_v47 = vshll.u32 %v26_v8, 16  ;;  %v54_v48 = vmul.u32 14564, %v51_v35 }
 0x119   :  { %996 = vst [vmem:[#allocation2 + $0xc0] sm:$0xff] %v989_v61  ;;  %v1660_v2 = vld [vmem:[#allocation2 + $0x20] sm:$0xf0]  ;;  %v1522_v53 = vld [vmem:[#allocation2 + $0x24] sm:$0xf0]  ;;  %v56_v49 = vmul.u32 14564, %v52_v38 }
 0x11a   :  { %v1521_v41 = vor.u32 %v1660_v2, %v1520_v62  ;;  %v1525_v4 = vor.u32 %v1659_v63, %v1522_v53  ;;  %v58_v54 = vshll.u32 %v55_v39, 16  ;;  %v84_v55 = vmul.u32 58254, %v80_v36 }
 0x11b   :  { %v31_v56 = vshll.u32 %v27_v43, 16  ;;  %vm33_vm11 = vc.u32 %v25_v42, %v29_v47  ;;  %v83_v57 = vmul.u32 14564, %v80_v36  ;;  %v28_v52 = vmul.u32 58254, %v23_v37 }
 0x11c   :  { %1256 = vmatpush.bf16.msrb.mxu0 %v1529_v59  ;;  %1200 = vmatpush.bf16.msra.mxu3 %v1521_v41  ;;  %v983_v5 = vpop.permute.xlu0 %982  ;;  %v1612_v23 = vld [vmem:[#allocation2 + $0xc8] sm:$0xf]  ;;  %v35_v9 = vadd.s32 %v29_v47, %v25_v42  ;;  %v60_v58 = vshll.u32 %v56_v49, 16  ;;  %v85_v15 = vmul.u32 14564, %v81_v40  ;;  %v1700_v59 = vmov 0  }
 0x11d   :  { %1228 = vmatpush.bf16.msrb.mxu2 %v1525_v4  ;;  %v987_v12 = vrot.slane %v983_v5, 4  ;;  %999 = vst.msk [vmem:[#allocation2 + $0xd4] sm:$0xf] %vm129_vm0, %v983_v5  ;;  %v34_v60 = vsel %vm33_vm11, 1, %v1700_v59  ;;  %vm62_vm12 = vc.u32 %v54_v48, %v58_v54  ;;  %v64_v45 = vadd.s32 %v58_v54, %v54_v48 }
 0x11e   :  { %vm37_vm13 = vc.u32 %v35_v9, %v31_v56  ;;  %v57_v50 = vmul.u32 58254, %v52_v38  ;;  %v87_v46 = vshll.u32 %v84_v55, 16  ;;  %v63_v51 = vsel %vm62_vm12, 1, %v1700_v59 }
 0x11f   :  { %v990_v16 = vsel %vm153_vm1, %v986_v44, %v987_v12  ;;  %v86_v13 = vmul.u32 58254, %v81_v40  ;;  %v36_v61 = vadd.s32 %v34_v60, %v28_v52  ;;  %vm66_vm14 = vc.u32 %v64_v45, %v60_v58 }
 0x120   :  { %1257 = vmatpush.bf16.msrb.mxu0 %v1517_v3  ;;  %v991_v18 = vsel %vm386_vm4, %v981_v0, %v990_v16  ;;  %1201 = vmatpush.bf16.msra.mxu3 %v1509_v6  ;;  %v1604_v21 = vld [vmem:[#allocation2 + $0xc0] sm:$0xf]  ;;  %v1680_v26 = vld [vmem:[#allocation2 + $0xc4] sm:$0xf]  ;;  %v89_v62 = vshll.u32 %v85_v15, 16  ;;  %vm91_vm15 = vc.u32 %v83_v57, %v87_v46  ;;  %v38_v63 = vsel %vm37_vm13, 1, %v1700_v59  ;;  %v616_v16 = vpop.f32.mrf.mxu1 }
 0x121   :  { %1229 = vmatpush.bf16.msrb.mxu2 %v1513_v11  ;;  %998 = vst [vmem:[#allocation2 + $0xcc] sm:$0xff] %v991_v18  ;;  %v92_v0 = vsel %vm91_vm15, 1, %v1700_v59  ;;  %v65_v1 = vadd.s32 %v63_v51, %v57_v50  ;;  %v93_v2 = vadd.s32 %v87_v46, %v83_v57  ;;  %v67_v53 = vsel %vm66_vm14, 1, %v1700_v59 }
 0x122   :  { %v94_v3 = vadd.s32 %v92_v0, %v86_v13  ;;  %v2182_v41 = vpop.f32.mrf.mxu3  ;;  %v30_v4 = vshrl.u32 %v26_v8, 16  ;;  %v40_v44 = vadd.s32 %v38_v63, %v36_v61  ;;  %v88_v5 = vshrl.u32 %v84_v55, 16 }
 0x123   :  { %1258 = vmatmul.bf16.vlgmr.msrb.gmra.mxu0 %v1501_v17  ;;  %1202 = vmatmul.bf16.vlgmr.msra.gmra.mxu3 %v1501_v17  ;;  %vm95_vm1 = vc.u32 %v93_v2, %v89_v62  ;;  %v59_v7 = vshrl.u32 %v55_v39, 16  ;;  %v69_v10 = vadd.s32 %v67_v53, %v65_v1  ;;  %v90_v11 = vshrl.u32 %v85_v15, 16 }
 0x124   :  { %1230 = vmatmul.bf16.vlgmr.msrb.gmra.mxu2 %v1501_v17  ;;  %v1682_v24 = vld [vmem:[#allocation2 + $0xd0] sm:$0xf0]  ;;  %v96_v6 = vsel %vm95_vm1, 1, %v1700_v59  ;;  %v32_v17 = vshrl.u32 %v27_v43, 16  ;;  %v41_v18 = vadd.s32 %v40_v44, %v30_v4  ;;  %v61_v20 = vshrl.u32 %v56_v49, 16 }
 0x125   :  { %v1613_v30 = vor.u32 %v1682_v24, %v1612_v23  ;;  %v98_v12 = vadd.s32 %v96_v6, %v94_v3  ;;  %vm698_vm13 = vcmask 261120   ;;  %vm708_vm15 = vcmask 7168  }
 0x126   :  { %v42_v24 = vadd.s32 %v41_v18, %v32_v17 }
 0x127   :  { %v99_v19 = vadd.s32 %v98_v12, %v88_v5 }
 0x128   :  { %v1681_v25 = vld [vmem:[#allocation2 + $0xc8] sm:$0xf0]  ;;  %v1606_v27 = vld [vmem:[#allocation2 + $0xcc] sm:$0xf0] }
 0x129   :  { %v1605_v28 = vor.u32 %v1681_v25, %v1604_v21  ;;  %v1609_v29 = vor.u32 %v1680_v26, %v1606_v27  ;;  %v70_v21 = vadd.s32 %v69_v10, %v59_v7  ;;  %v100_v23 = vadd.s32 %v99_v19, %v90_v11 }
 0x12a   :  { %v2184_v25 = vpop.f32.mrf.mxu3 }
 0x12b   :  { %1215 = vmatpush.bf16.msrb.mxu3 %v1605_v28  ;;  %1243 = vmatpush.bf16.msra.mxu1 %v1609_v29  ;;  %v71_v26 = vadd.s32 %v70_v21, %v61_v20  ;;  %v101_v27 = vshrl.u32 %v100_v23, 4  ;;  %v43_v28 = vshrl.u32 %v42_v24, 4  ;;  %v618_v29 = vpop.f32.mrf.mxu1 }
 0x12d   :  { %v44_v14 = vmul.u32 18, %v43_v28 }
 0x12e   :  { %1615 = vmatmul.msk.bf16.vlgmr.msra.gmra.mxu1 %vm589_vm6, %v1505_v22 }
 0x12f   :  { %1271 = vmatpush.bf16.msrb.mxu1 %v1613_v30  ;;  %v72_v30 = vshrl.u32 %v71_v26, 4  ;;  %v45_v37 = vsub.s32 %v2168_v31, %v44_v14 }
 0x131   :  { %v73_v34 = vmul.u32 18, %v72_v30  ;;  %vm106_vm4 = vcmp.ne.s32.totalorder %v45_v37, 0  ;;  %vm109_vm5 = vcmp.lt.s32.totalorder %v45_v37, 0  ;;  %v115_v42 = vadd.s32 18, %v45_v37 }
 0x132   :  { %v672_v36 = vpop.f32.mrf.mxu3  ;;  %vm112_vm9 = vmand %vm109_vm5, %vm106_vm4 }
 0x133   :  { %1614 = vmatmul.msk.bf16.vlgmr.msrb.gmra.mxu3 %vm589_vm6, %v1505_v22  ;;  %v74_v8 = vsub.s32 %v2171_v32, %v73_v34  ;;  %v118_v49 = vsel %vm112_vm9, %v115_v42, %v45_v37 }
 0x134   :  { %vm2197_vm12 = vcmp.lt.s32.totalorder %v118_v49, 16 }
 0x135   :  { %vm107_vm7 = vcmp.ne.s32.totalorder %v74_v8, 0  ;;  %vm110_vm8 = vcmp.lt.s32.totalorder %v74_v8, 0  ;;  %v116_v47 = vadd.s32 18, %v74_v8 }
 0x136   :  { %vm113_vm10 = vmand %vm110_vm8, %vm107_vm7 }
 0x137   :  { %v119_v56 = vsel %vm113_vm10, %v116_v47, %v74_v8 }
 0x138   :  { %vm2203_vm14 = vcmp.lt.s32.totalorder %v119_v56, 16 }
 0x13a   :  { %v674_v32 = vpop.f32.mrf.mxu3 }
 0x13e   :  { %1616 = vmatmul.msk.bf16.vlgmr.msrb.gmra.mxu1 %vm589_vm6, %v1505_v22  ;;  %v102_v22 = vmul.u32 18, %v101_v27 }
 0x140   :  { %v103_v35 = vsub.s32 %v2174_v33, %v102_v22 }
 0x142   :  { %vm108_vm2 = vcmp.ne.s32.totalorder %v103_v35, 0  ;;  %vm111_vm3 = vcmp.lt.s32.totalorder %v103_v35, 0  ;;  %v117_v39 = vadd.s32 18, %v103_v35 }
 0x143   :  { %vm114_vm6 = vmand %vm111_vm3, %vm108_vm2 }
 0x144   :  { %v120_v33 = vsel %vm114_vm6, %v117_v39, %v103_v35 }
 0x145   :  { %vm2193_vm11 = vcmp.lt.s32.totalorder %v120_v33, 16 }
 0x17b   :  { %v658_v38 = vpop.f32.mrf.mxu1 }
 0x17c   :  { %v673_v40 = vadd.f32 %v672_v36, %v658_v38 }
 0x17e   :  { %v678_v43 = vpack.c.bf16 %v673_v40, %v673_v40  ;;  %v713_v57 = vmul.f32 %v673_v40, %v673_v40  ;;  %v693_v15 = vsel %vm2193_vm11, %v673_v40, 0.0 }
 0x17f   :  { %v699_v51 = vsel %vm698_vm13, %v693_v15, 0.0 }
 0x180   :  { %v602_v48 = vpop.f32.mrf.mxu0  ;;  %682 = vst.msk [vmem:[%s2321_s2 + $0x8] sm:$0xf] %vm129_vm0, %v678_v43  ;;  %v719_v13 = vsel %vm2193_vm11, %v713_v57, 0.0 }
 0x181   :  { %v617_v31 = vadd.f32 %v616_v16, %v602_v48  ;;  %v724_v3 = vsel %vm698_vm13, %v719_v13, 0.0 }
 0x183   :  { %v660_v55 = vpop.f32.mrf.mxu1  ;;  %v711_v58 = vmul.f32 %v617_v31, %v617_v31  ;;  %v691_v46 = vsel %vm2197_vm12, %v617_v31, 0.0 }
 0x184   :  { %v675_v52 = vadd.f32 %v674_v32, %v660_v55 }
 0x185   :  { %v717_v0 = vsel %vm2197_vm12, %v711_v58, 0.0 }
 0x186   :  { %v630_v59 = vpop.f32.mrf.mxu2  ;;  %v680_v60 = vpack.c.bf16 %v675_v52, %v675_v52  ;;  %v696_v5 = vsel %vm2193_vm11, %v675_v52, 0.0  ;;  %v716_v19 = vmul.f32 %v675_v52, %v675_v52 }
 0x187   :  { %v645_v50 = vadd.f32 %v2182_v41, %v630_v59  ;;  %v704_v11 = vsel %vm698_vm13, %v696_v5, 0.0 }
 0x188   :  { %684 = vst.msk [vmem:[%s2321_s2 + $0x14] sm:$0xf] %vm129_vm0, %v680_v60  ;;  %v604_v1 = vpop.f32.mrf.mxu0 }
 0x189   :  { %v677_v61 = vpack.c.bf16 %v645_v50, %v617_v31  ;;  %v712_v62 = vmul.f32 %v645_v50, %v645_v50  ;;  %v692_v63 = vsel %vm2203_vm14, %v645_v50, 0.0  ;;  %v619_v44 = vadd.f32 %v618_v29, %v604_v1 }
 0x18a   :  { %v697_v2 = vadd.f32 %v692_v63, %v691_v46 }
 0x18b   :  { %681 = vst [vmem:[%s2321_s2] sm:$0xff] %v677_v61  ;;  %v718_v53 = vsel %vm2203_vm14, %v712_v62, 0.0  ;;  %v694_v17 = vsel %vm2197_vm12, %v619_v44, 0.0  ;;  %v714_v21 = vmul.f32 %v619_v44, %v619_v44 }
 0x18c   :  { %v700_v41 = vadd.f32 %v699_v51, %v697_v2  ;;  %v723_v4 = vadd.f32 %v718_v53, %v717_v0 }
 0x18d   :  { %v720_v26 = vsel %vm2197_vm12, %v714_v21, 0.0 }
 0x18e   :  { %v632_v6 = vpop.f32.mrf.mxu2  ;;  %701 = vadd.xlane.f32.xlu1 %v700_v41  ;;  %v725_v7 = vadd.f32 %v724_v3, %v723_v4 }
 0x18f   :  { %v647_v10 = vadd.f32 %v2184_v25, %v632_v6  ;;  %v722_v25 = vsel %vm2193_vm11, %v716_v19, 0.0 }
 0x190   :  { %726 = vadd.xlane.f32.xlu0 %v725_v7  ;;  %v729_v28 = vsel %vm698_vm13, %v722_v25, 0.0 }
 0x191   :  { %v679_v12 = vpack.c.bf16 %v647_v10, %v619_v44  ;;  %v715_v16 = vmul.f32 %v647_v10, %v647_v10  ;;  %v695_v18 = vsel %vm2203_vm14, %v647_v10, 0.0 }
 0x192   :  { %v703_v20 = vadd.f32 %v695_v18, %v694_v17 }
 0x193   :  { %683 = vst [vmem:[%s2321_s2 + $0xc] sm:$0xff] %v679_v12  ;;  %v721_v24 = vsel %vm2203_vm14, %v715_v16, 0.0 }
 0x194   :  { %v705_v23 = vadd.f32 %v704_v11, %v703_v20  ;;  %v728_v27 = vadd.f32 %v721_v24, %v720_v26 }
 0x196   :  { %706 = vadd.xlane.f32.xlu2 %v705_v23  ;;  %v730_v29 = vadd.f32 %v729_v28, %v728_v27 }
 0x19e   :  { %731 = vadd.xlane.f32.xlu2 %v730_v29 }
 0x1a0   :  { %v1259_v40 = vpop.f32.mrf.mxu0 }
 0x1a6   :  { %v1203_v30 = vpop.f32.mrf.mxu3 }
 0x1a7   :  { %v1231_v34 = vpop.f32.mrf.mxu2 }
 0x1a8   :  { %v1261_v1 = vpop.f32.mrf.mxu0 }
 0x1ab   :  { %v1245_v22 = vpop.f32.mrf.mxu1 }
 0x1ac   :  { %v1246_v37 = vadd.f32 %v1245_v22, %v1231_v34 }
 0x1ae   :  { %v1205_v14 = vpop.f32.mrf.mxu3  ;;  %v1307_v42 = vmul.f32 %v1246_v37, %v1246_v37  ;;  %v1288_v31 = vsel %vm2203_vm14, %v1246_v37, 0.0 }
 0x1af   :  { %v1233_v33 = vpop.f32.mrf.mxu2 }
 0x1b0   :  { %v1313_v60 = vsel %vm2203_vm14, %v1307_v42, 0.0 }
 0x1b3   :  { %v1247_v35 = vpop.f32.mrf.mxu1 }
 0x1b4   :  { %v1248_v58 = vadd.f32 %v1247_v35, %v1233_v33 }
 0x1b6   :  { %v1217_v36 = vpop.f32.mrf.mxu3  ;;  %v1310_v0 = vmul.f32 %v1248_v58, %v1248_v58  ;;  %v1291_v41 = vsel %vm2203_vm14, %v1248_v58, 0.0 }
 0x1b7   :  { %v1218_v8 = vadd.f32 %v1217_v36, %v1203_v30 }
 0x1b8   :  { %v1316_v11 = vsel %vm2203_vm14, %v1310_v0, 0.0 }
 0x1b9   :  { %v1278_v38 = vpack.c.bf16 %v1246_v37, %v1218_v8  ;;  %v1306_v39 = vmul.f32 %v1218_v8, %v1218_v8  ;;  %v1287_v47 = vsel %vm2197_vm12, %v1218_v8, 0.0 }
 0x1ba   :  { %v1293_v52 = vadd.f32 %v1288_v31, %v1287_v47 }
 0x1bb   :  { %1617 = vst [vmem:[%s2321_s2 + $0x18] sm:$0xff] %v1278_v38  ;;  %v1273_v43 = vpop.f32.mrf.mxu1  ;;  %v1312_v32 = vsel %vm2197_vm12, %v1306_v39, 0.0 }
 0x1bc   :  { %v1274_v48 = vadd.f32 %v1273_v43, %v1259_v40  ;;  %v1318_v51 = vadd.f32 %v1313_v60, %v1312_v32 }
 0x1be   :  { %v1279_v49 = vpack.c.bf16 %v1274_v48, %v1274_v48  ;;  %v1308_v55 = vmul.f32 %v1274_v48, %v1274_v48  ;;  %v1219_v56 = vpop.f32.mrf.mxu3  ;;  %v1289_v57 = vsel %vm2193_vm11, %v1274_v48, 0.0 }
 0x1bf   :  { %v1220_v15 = vadd.f32 %v1219_v56, %v1205_v14  ;;  %v1294_v59 = vsel %vm698_vm13, %v1289_v57, 0.0 }
 0x1c0   :  { %1618 = vst.msk [vmem:[%s2321_s2 + $0x20] sm:$0xf] %vm129_vm0, %v1279_v49  ;;  %v1295_v50 = vadd.f32 %v1294_v59, %v1293_v52  ;;  %v1314_v46 = vsel %vm2193_vm11, %v1308_v55, 0.0 }
 0x1c1   :  { %v1280_v13 = vpack.c.bf16 %v1248_v58, %v1220_v15  ;;  %v1309_v61 = vmul.f32 %v1220_v15, %v1220_v15  ;;  %v1319_v62 = vsel %vm698_vm13, %v1314_v46, 0.0  ;;  %v1290_v53 = vsel %vm2197_vm12, %v1220_v15, 0.0 }
 0x1c2   :  { %1296 = vadd.xlane.f32.xlu1 %v1295_v50  ;;  %v1320_v63 = vadd.f32 %v1319_v62, %v1318_v51  ;;  %v1298_v7 = vadd.f32 %v1291_v41, %v1290_v53 }
 0x1c3   :  { %1619 = vst [vmem:[%s2321_s2 + $0x24] sm:$0xff] %v1280_v13  ;;  %v1275_v2 = vpop.f32.mrf.mxu1  ;;  %v1315_v4 = vsel %vm2197_vm12, %v1309_v61, 0.0 }
 0x1c4   :  { %v1276_v3 = vadd.f32 %v1275_v2, %v1261_v1  ;;  %1321 = vadd.xlane.f32.xlu0 %v1320_v63  ;;  %v1323_v16 = vadd.f32 %v1316_v11, %v1315_v4 }
 0x1c6   :  { %v1281_v44 = vpack.c.bf16 %v1276_v3, %v1276_v3  ;;  %v1311_v5 = vmul.f32 %v1276_v3, %v1276_v3  ;;  %v1292_v6 = vsel %vm2193_vm11, %v1276_v3, 0.0 }
 0x1c7   :  { %v1299_v10 = vsel %vm698_vm13, %v1292_v6, 0.0 }
 0x1c8   :  { %1620 = vst.msk [vmem:[%s2321_s2 + $0x2c] sm:$0xf] %vm129_vm0, %v1281_v44  ;;  %v1300_v12 = vadd.f32 %v1299_v10, %v1298_v7  ;;  %v1317_v9 = vsel %vm2193_vm11, %v1311_v5, 0.0 }
 0x1c9   :  { %v1324_v17 = vsel %vm698_vm13, %v1317_v9, 0.0 }
 0x1ca   :  { %1301 = vadd.xlane.f32.xlu2 %v1300_v12  ;;  %v1325_v18 = vadd.f32 %v1324_v17, %v1323_v16 }
 0x1cc   :  { %1326 = vadd.xlane.f32.xlu1 %v1325_v18 }
 0x201   :  { %v702_v19 = vpop.xlane.xlu1 %701 }
 0x202   :  { %709 = vst.msk [vmem:[%s2322_s3] sm:$0xff] %vm708_vm15, %v702_v19 }
 0x203   :  { %v727_v45 = vpop.xlane.xlu0 %726 }
 0x204   :  { %733 = vst.msk [vmem:[%s2323_s4] sm:$0xff] %vm708_vm15, %v727_v45 }
 0x209   :  { %v707_v54 = vpop.xlane.xlu2 %706 }
 0x20a   :  { %710 = vst.msk [vmem:[%s2322_s3 + $0x8] sm:$0xff] %vm708_vm15, %v707_v54 }
 0x211   :  { %v732_v20 = vpop.xlane.xlu2 %731 }
 0x212   :  { %734 = vst.msk [vmem:[%s2323_s4 + $0x8] sm:$0xff] %vm708_vm15, %v732_v20 }
 0x235   :  { %v1297_v21 = vpop.xlane.xlu1 %1296 }
 0x236   :  { %1621 = vst.msk [vmem:[%s2322_s3 + $0x10] sm:$0xff] %vm708_vm15, %v1297_v21 }
 0x237   :  { %v1322_v23 = vpop.xlane.xlu0 %1321 }
 0x238   :  { %1623 = vst.msk [vmem:[%s2323_s4 + $0x10] sm:$0xff] %vm708_vm15, %v1322_v23 }
 0x23d   :  { %v1302_v24 = vpop.xlane.xlu2 %1301 }
 0x23e   :  { %1622 = vst.msk [vmem:[%s2322_s3 + $0x18] sm:$0xff] %vm708_vm15, %v1302_v24 }
 0x23f   :  { %v1327_v25 = vpop.xlane.xlu1 %1326 }
 0x240   :  { %1624 = vst.msk [vmem:[%s2323_s4 + $0x18] sm:$0xff] %vm708_vm15, %v1327_v25 }

// kernel: conv_block_forward.3
= control target key start
LH: loop header
LB: loop body
LE: loop exit
PB: predicated region body
PF: predicated region fallthrough
CT: control target
= control target key end

     0   :  { %s1923_s19 = smov 90   ;;  %s1924_s20 = smov 91   ;;  %vm129_vm0 = vcmask 257024   ;;  %vm153_vm1 = vcmask 1043456   ;;  %vm353_vm2 = vcmask 744448   ;;  %vm386_vm3 = vcmask 736256   ;;  %s2767_s0 = inlined_call_operand.vmem [shape: bf16[2,16,326], index: 0, kind: input, shape index: {}]   ;;  %s2768_s1 = inlined_call_operand.vmem [shape: bf16[32,144], index: 1, kind: input, shape index: {}]   ;;  %s2769_s2 = inlined_call_operand.vmem [shape: bf16[2,32,288], index: 2, kind: output, shape index: {0}]   ;;  %s2770_s3 = inlined_call_operand.vmem [shape: f32[2,32,1], index: 3, kind: output, shape index: {1}]   ;;  %s2771_s4 = inlined_call_operand.vmem [shape: f32[2,32,1], index: 4, kind: output, shape index: {2}]  }
   0x1   :  { %v367_v0 = vld [vmem:[%s2767_s0 + $0xc] sm:$0xff]  ;;  %v365_v1 = vld [vmem:[%s2767_s0] sm:$0xff]  ;;  %v368_v2 = vld [vmem:[%s2767_s0 + $0x14] sm:$0xf]  ;;  %s1925_s29 = smov 92   ;;  %s1926_s10 = smov 108  }
   0x2   :  { %377 = vrot.lane.b32.xlu1 %v367_v0, %s1923_s19  ;;  %373 = vrot.lane.b32.xlu0 %v365_v1, %s1923_s19  ;;  %128 = vst [vmem:[#allocation2] sm:$0xff] %v365_v1  ;;  %v366_v3 = vld [vmem:[%s2767_s0 + $0x8] sm:$0xf]  ;;  %v335_v5 = vld [vmem:[%s2767_s0 + $0x14] sm:$0xf]  ;;  %s1927_s15 = smov 109  }
   0x3   :  { %340 = vrot.lane.b32.xlu2 %v365_v1, %s1924_s20  ;;  %131 = vst [vmem:[#allocation2 + $0xc] sm:$0xff] %v367_v0  ;;  %v333_v4 = vld [vmem:[%s2767_s0 + $0x8] sm:$0xf]  ;;  %v302_v7 = vld [vmem:[%s2767_s0 + $0x14] sm:$0xf]  ;;  %s1928_s18 = smov 110  }
   0x4   :  { %v300_v6 = vld [vmem:[%s2767_s0 + $0x8] sm:$0xf]  ;;  %v269_v9 = vld [vmem:[%s2767_s0 + $0x14] sm:$0xf]  ;;  %s1929_s27 = smov 126   ;;  %s1930_s7 = smov 127  }
   0x5   :  { %v267_v8 = vld [vmem:[%s2767_s0 + $0x8] sm:$0xf]  ;;  %v236_v11 = vld [vmem:[%s2767_s0 + $0x14] sm:$0xf]  ;;  %v2046_v18 = vld [vmem:[%s2767_s0 + $0x18] sm:$0xff]  ;;  %vm320_vm4 = vcmask 752640  }
   0x6   :  { %v234_v10 = vld [vmem:[%s2767_s0 + $0x8] sm:$0xf]  ;;  %v203_v13 = vld [vmem:[%s2767_s0 + $0x14] sm:$0xf]  ;;  %v1690_v19 = vld [vmem:[%s2767_s0 + $0x20] sm:$0xf] }
   0x7   :  { %v201_v12 = vld [vmem:[%s2767_s0 + $0x8] sm:$0xf]  ;;  %v170_v15 = vld [vmem:[%s2767_s0 + $0x14] sm:$0xf]  ;;  %v1692_v21 = vld [vmem:[%s2767_s0 + $0x2c] sm:$0xf] }
   0x8   :  { %v168_v14 = vld [vmem:[%s2767_s0 + $0x8] sm:$0xf]  ;;  %v136_v17 = vld [vmem:[%s2767_s0 + $0x14] sm:$0xf]  ;;  %v1686_v23 = vld [vmem:[%s2767_s0 + $0x20] sm:$0xf] }
   0x9   :  { %v134_v16 = vld [vmem:[%s2767_s0 + $0x8] sm:$0xf]  ;;  %v1688_v27 = vld [vmem:[%s2767_s0 + $0x2c] sm:$0xf]  ;;  %v1682_v29 = vld [vmem:[%s2767_s0 + $0x20] sm:$0xf] }
   0xa   :  { %379 = vrot.lane.b32.xlu1 %v368_v2, %s1923_s19  ;;  %375 = vrot.lane.b32.xlu0 %v366_v3, %s1923_s19  ;;  %v2056_v20 = vld [vmem:[%s2767_s0 + $0x24] sm:$0xff]  ;;  %v1684_v32 = vld [vmem:[%s2767_s0 + $0x2c] sm:$0xf]  ;;  %vm287_vm5 = vcmask 883712   ;;  %vm254_vm6 = vcmask 891904   ;;  %vm600_vm7 = vcmask 130048  }
   0xb   :  { %342 = vrot.lane.b32.xlu2 %v333_v4, %s1924_s20  ;;  %v1678_v36 = vld [vmem:[%s2767_s0 + $0x20] sm:$0xf]  ;;  %v1680_v37 = vld [vmem:[%s2767_s0 + $0x2c] sm:$0xf]  ;;  %vm221_vm8 = vcmask 900096   ;;  %vm188_vm9 = vcmask 1031168  }
   0xc   :  { %v1674_v47 = vld [vmem:[%s2767_s0 + $0x20] sm:$0xf]  ;;  %v1676_v56 = vld [vmem:[%s2767_s0 + $0x2c] sm:$0xf]  ;;  %vm155_vm10 = vcmask 1039360  }
   0xd   :  { %v1670_v58 = vld [vmem:[%s2767_s0 + $0x20] sm:$0xf] }
  0x12   :  { %346 = vrot.lane.b32.xlu1 %v335_v5, %s1924_s20  ;;  %344 = vrot.lane.b32.xlu0 %v367_v0, %s1924_s20 }
  0x13   :  { %307 = vrot.lane.b32.xlu2 %v365_v1, %s1925_s29 }
  0x1a   :  { %311 = vrot.lane.b32.xlu1 %v367_v0, %s1925_s29  ;;  %309 = vrot.lane.b32.xlu0 %v300_v6, %s1925_s29 }
  0x1b   :  { %313 = vrot.lane.b32.xlu2 %v302_v7, %s1925_s29 }
  0x22   :  { %276 = vrot.lane.b32.xlu1 %v267_v8, %s1926_s10  ;;  %274 = vrot.lane.b32.xlu0 %v365_v1, %s1926_s10 }
  0x23   :  { %278 = vrot.lane.b32.xlu2 %v367_v0, %s1926_s10 }
  0x2a   :  { %280 = vrot.lane.b32.xlu0 %v269_v9, %s1926_s10  ;;  %241 = vrot.lane.b32.xlu1 %v365_v1, %s1927_s15 }
  0x2b   :  { %243 = vrot.lane.b32.xlu2 %v234_v10, %s1927_s15 }
  0x32   :  { %245 = vrot.lane.b32.xlu0 %v367_v0, %s1927_s15  ;;  %247 = vrot.lane.b32.xlu1 %v236_v11, %s1927_s15 }
  0x33   :  { %208 = vrot.lane.b32.xlu2 %v365_v1, %s1928_s18 }
  0x3a   :  { %212 = vrot.lane.b32.xlu1 %v367_v0, %s1928_s18  ;;  %210 = vrot.lane.b32.xlu0 %v201_v12, %s1928_s18 }
  0x3b   :  { %214 = vrot.lane.b32.xlu2 %v203_v13, %s1928_s18 }
  0x42   :  { %177 = vrot.lane.b32.xlu1 %v168_v14, %s1929_s27  ;;  %175 = vrot.lane.b32.xlu0 %v365_v1, %s1929_s27 }
  0x43   :  { %179 = vrot.lane.b32.xlu2 %v367_v0, %s1929_s27 }
  0x4a   :  { %181 = vrot.lane.b32.xlu0 %v170_v15, %s1929_s27  ;;  %141 = vrot.lane.b32.xlu1 %v365_v1, %s1930_s7 }
  0x4b   :  { %143 = vrot.lane.b32.xlu2 %v134_v16, %s1930_s7  ;;  %v1672_v16 = vld [vmem:[%s2767_s0 + $0x2c] sm:$0xf] }
  0x52   :  { %145 = vrot.lane.b32.xlu0 %v367_v0, %s1930_s7  ;;  %147 = vrot.lane.b32.xlu1 %v136_v17, %s1930_s7 }
  0x53   :  { %1038 = vrot.lane.b32.xlu2 %v2046_v18, %s1924_s20 }
  0x5a   :  { %1040 = vrot.lane.b32.xlu0 %v1690_v19, %s1924_s20  ;;  %1042 = vrot.lane.b32.xlu1 %v2056_v20, %s1924_s20 }
  0x5b   :  { %1044 = vrot.lane.b32.xlu2 %v1692_v21, %s1924_s20 }
  0x5d   :  { %v341_v22 = vpop.permute.xlu2 %340 }
  0x5e   :  { %v348_v24 = vrot.slane %v341_v22, 4 }
  0x62   :  { %1006 = vrot.lane.b32.xlu0 %v2046_v18, %s1925_s29  ;;  %1008 = vrot.lane.b32.xlu1 %v1686_v23, %s1925_s29 }
  0x63   :  { %1010 = vrot.lane.b32.xlu2 %v2056_v20, %s1925_s29 }
  0x65   :  { %v343_v25 = vpop.permute.xlu2 %342 }
  0x66   :  { %v349_v26 = vrot.slane %v343_v25, 4  ;;  %362 = vst.msk [vmem:[#allocation2 + $0xb0] sm:$0xf] %vm129_vm0, %v343_v25 }
  0x68   :  { %v352_v28 = vsel %vm153_vm1, %v348_v24, %v349_v26 }
  0x69   :  { %v354_v30 = vsel %vm353_vm2, %v341_v22, %v352_v28 }
  0x6a   :  { %1012 = vrot.lane.b32.xlu0 %v1688_v27, %s1925_s29  ;;  %974 = vrot.lane.b32.xlu1 %v2046_v18, %s1926_s10  ;;  %361 = vst [vmem:[#allocation2 + $0xa8] sm:$0xff] %v354_v30 }
  0x6b   :  { %976 = vrot.lane.b32.xlu2 %v1682_v29, %s1926_s10 }
  0x6d   :  { %v2086_v31 = vpop.permute.xlu2 %307  ;;  %v1641_v3 = vld [vmem:[#allocation2 + $0xb0] sm:$0xf] }
  0x6e   :  { %v315_v4 = vrot.slane %v2086_v31, 4 }
  0x71   :  { %v1633_v17 = vld [vmem:[#allocation2 + $0xa8] sm:$0xf]  ;;  %v1868_v23 = vld [vmem:[#allocation2 + $0xac] sm:$0xf] }
  0x72   :  { %978 = vrot.lane.b32.xlu0 %v2056_v20, %s1926_s10  ;;  %980 = vrot.lane.b32.xlu1 %v1684_v32, %s1926_s10 }
  0x73   :  { %942 = vrot.lane.b32.xlu2 %v2046_v18, %s1927_s15 }
  0x74   :  { %v378_v33 = vpop.permute.xlu1 %377  ;;  %v374_v34 = vpop.permute.xlu0 %373 }
  0x75   :  { %v2096_v35 = vpop.permute.xlu2 %313  ;;  %v383_v38 = vrot.slane %v378_v33, 4  ;;  %v381_v41 = vrot.slane %v374_v34, 4 }
  0x76   :  { %331 = vst.msk [vmem:[#allocation2 + $0xa4] sm:$0xf] %vm129_vm0, %v2096_v35  ;;  %v318_v6 = vrot.slane %v2096_v35, 4 }
  0x7a   :  { %944 = vrot.lane.b32.xlu0 %v1678_v36, %s1927_s15  ;;  %946 = vrot.lane.b32.xlu1 %v2056_v20, %s1927_s15  ;;  %v1694_v36 = vld [vmem:[%s2767_s0 + $0x20] sm:$0xf] }
  0x7b   :  { %948 = vrot.lane.b32.xlu2 %v1680_v37, %s1927_s15 }
  0x7c   :  { %v380_v39 = vpop.permute.xlu1 %379  ;;  %v376_v40 = vpop.permute.xlu0 %375 }
  0x7d   :  { %v384_v42 = vrot.slane %v380_v39, 4  ;;  %397 = vst.msk [vmem:[#allocation2 + $0xd4] sm:$0xf] %vm129_vm0, %v380_v39  ;;  %v382_v43 = vrot.slane %v376_v40, 4  ;;  %v2111_v44 = vpop.permute.xlu2 %278  ;;  %v1867_v27 = vld [vmem:[#allocation2 + $0xa0] sm:$0xf0] }
  0x7e   :  { %395 = vst.msk [vmem:[#allocation2 + $0xc8] sm:$0xf] %vm129_vm0, %v376_v40 }
  0x7f   :  { %v388_v45 = vsel %vm153_vm1, %v383_v38, %v384_v42  ;;  %v385_v46 = vsel %vm153_vm1, %v381_v41, %v382_v43 }
  0x80   :  { %v389_v48 = vsel %vm386_vm3, %v378_v33, %v388_v45  ;;  %v387_v49 = vsel %vm386_vm3, %v374_v34, %v385_v46  ;;  %v1696_v45 = vld [vmem:[%s2767_s0 + $0x2c] sm:$0xf]  ;;  %v284_v46 = vrot.slane %v2111_v44, 4 }
  0x81   :  { %396 = vst [vmem:[#allocation2 + $0xcc] sm:$0xff] %v389_v48 }
  0x82   :  { %394 = vst [vmem:[#allocation2 + $0xc0] sm:$0xff] %v387_v49  ;;  %910 = vrot.lane.b32.xlu0 %v2046_v18, %s1928_s18  ;;  %912 = vrot.lane.b32.xlu1 %v1674_v47, %s1928_s18 }
  0x83   :  { %914 = vrot.lane.b32.xlu2 %v2056_v20, %s1928_s18 }
  0x84   :  { %v347_v50 = vpop.permute.xlu1 %346  ;;  %v345_v51 = vpop.permute.xlu0 %344  ;;  %v1873_v57 = vld [vmem:[#allocation2 + $0xd0] sm:$0xf0] }
  0x85   :  { %v351_v52 = vrot.slane %v347_v50, 4  ;;  %364 = vst.msk [vmem:[#allocation2 + $0xbc] sm:$0xf] %vm129_vm0, %v347_v50  ;;  %v350_v53 = vrot.slane %v345_v51, 4  ;;  %v2127_v54 = vpop.permute.xlu2 %243  ;;  %v1653_v62 = vld [vmem:[#allocation2 + $0xc8] sm:$0xf] }
  0x86   :  { %263 = vst.msk [vmem:[#allocation2 + $0x68] sm:$0xf] %vm129_vm0, %v2127_v54  ;;  %v1654_v5 = vor.u32 %v1873_v57, %v1653_v62  ;;  %v250_v47 = vrot.slane %v2127_v54, 4  ;;  %v1535_v54 = vld [vmem:[%s2768_s1 + $0x8] sm:$0xf0] }
  0x87   :  { %v355_v55 = vsel %vm153_vm1, %v350_v53, %v351_v52  ;;  %v1843_v53 = vld [vmem:[%s2768_s1 + $0x4] sm:$0xf]  ;;  %v1666_v57 = vld [vmem:[%s2767_s0 + $0x20] sm:$0xf] }
  0x88   :  { %v356_v59 = vsel %vm353_vm2, %v345_v51, %v355_v55  ;;  %v1872_v60 = vld [vmem:[#allocation2 + $0xc8] sm:$0xf0]  ;;  %v1647_v61 = vld [vmem:[#allocation2 + $0xcc] sm:$0xf0] }
  0x89   :  { %363 = vst [vmem:[#allocation2 + $0xb4] sm:$0xff] %v356_v59  ;;  %v1645_v63 = vld [vmem:[#allocation2 + $0xc0] sm:$0xf]  ;;  %v1871_v0 = vld [vmem:[#allocation2 + $0xc4] sm:$0xf] }
  0x8a   :  { %916 = vrot.lane.b32.xlu0 %v1676_v56, %s1928_s18  ;;  %878 = vrot.lane.b32.xlu1 %v2046_v18, %s1929_s27  ;;  %v1646_v1 = vor.u32 %v1872_v60, %v1645_v63  ;;  %v1650_v2 = vor.u32 %v1871_v0, %v1647_v61 }
  0x8b   :  { %880 = vrot.lane.b32.xlu2 %v1670_v58, %s1929_s27  ;;  %v2194_v58 = vor.u32 %v1843_v53, %v1535_v54 }
  0x8c   :  { %633 = vmatpush.bf16.msra.mxu1 %v1646_v1  ;;  %671 = vmatpush.bf16.msra.mxu3 %v1650_v2  ;;  %v312_v7 = vpop.permute.xlu1 %311  ;;  %v310_v8 = vpop.permute.xlu0 %309  ;;  %v1870_v9 = vld [vmem:[#allocation2 + $0xb8] sm:$0xf0] }
  0x8d   :  { %v317_v10 = vrot.slane %v312_v7, 4  ;;  %v316_v11 = vrot.slane %v310_v8, 4  ;;  %329 = vst.msk [vmem:[#allocation2 + $0x98] sm:$0xf] %vm129_vm0, %v310_v8  ;;  %v1642_v12 = vor.u32 %v1870_v9, %v1641_v3  ;;  %v2146_v13 = vpop.permute.xlu2 %208 }
  0x8f   :  { %v319_v14 = vsel %vm153_vm1, %v315_v4, %v316_v11  ;;  %v322_v15 = vsel %vm153_vm1, %v317_v10, %v318_v6  ;;  %1657 = vmatmul.msk.bf16.vlgmr.msra.gmra.mxu3 %vm600_vm7, %v2194_v58  ;;  %1655 = vmatmul.msk.bf16.vlgmr.msra.gmra.mxu1 %vm600_vm7, %v2194_v58 }
  0x90   :  { %709 = vmatpush.bf16.msrb.mxu3 %v1654_v5  ;;  %683 = vmatpush.bf16.msrb.mxu1 %v1642_v12  ;;  %v321_v19 = vsel %vm320_vm4, %v2086_v31, %v319_v14  ;;  %v323_v21 = vsel %vm320_vm4, %v312_v7, %v322_v15  ;;  %v1869_v22 = vld [vmem:[#allocation2 + $0xb0] sm:$0xf0]  ;;  %v1635_v24 = vld [vmem:[#allocation2 + $0xb4] sm:$0xf0]  ;;  %v1668_v5 = vld [vmem:[%s2767_s0 + $0x2c] sm:$0xf] }
  0x91   :  { %328 = vst [vmem:[#allocation2 + $0x90] sm:$0xff] %v321_v19  ;;  %v1634_v25 = vor.u32 %v1869_v22, %v1633_v17  ;;  %v1638_v26 = vor.u32 %v1868_v23, %v1635_v24  ;;  %v1605_v14 = vld [vmem:[#allocation2 + $0x68] sm:$0xf]  ;;  %v216_v15 = vrot.slane %v2146_v13, 4 }
  0x92   :  { %330 = vst [vmem:[#allocation2 + $0x9c] sm:$0xff] %v323_v21  ;;  %882 = vrot.lane.b32.xlu0 %v2056_v20, %s1929_s27  ;;  %884 = vrot.lane.b32.xlu1 %v1672_v16, %s1929_s27 }
  0x93   :  { %607 = vmatpush.bf16.msra.mxu0 %v1634_v25  ;;  %645 = vmatpush.bf16.msra.mxu2 %v1638_v26  ;;  %v1845_v26 = vld [vmem:[%s2768_s1 + $0x14] sm:$0xf] }
  0x94   :  { %v277_v28 = vpop.permute.xlu1 %276  ;;  %v275_v29 = vpop.permute.xlu0 %274  ;;  %v1629_v30 = vld [vmem:[#allocation2 + $0x98] sm:$0xf]  ;;  %1070 = vrot.lane.b32.xlu2 %v2046_v18, %s1923_s19 }
  0x95   :  { %v283_v31 = vrot.slane %v277_v28, 4  ;;  %296 = vst.msk [vmem:[#allocation2 + $0x80] sm:$0xf] %vm129_vm0, %v277_v28  ;;  %v282_v32 = vrot.slane %v275_v29, 4  ;;  %v1630_v33 = vor.u32 %v1867_v27, %v1629_v30  ;;  %v2162_v34 = vpop.permute.xlu2 %214  ;;  %v1543_v27 = vld [vmem:[%s2768_s1 + $0x18] sm:$0xf0] }
  0x96   :  { %232 = vst.msk [vmem:[#allocation2 + $0x5c] sm:$0xf] %vm129_vm0, %v2162_v34  ;;  %v219_v16 = vrot.slane %v2162_v34, 4 }
  0x97   :  { %v286_v35 = vsel %vm153_vm1, %v282_v32, %v283_v31  ;;  %684 = vmatpush.bf16.msrb.mxu1 %v1630_v33  ;;  %v2232_v32 = vor.u32 %v1845_v26, %v1543_v27 }
  0x98   :  { %v288_v37 = vsel %vm287_vm5, %v275_v29, %v286_v35  ;;  %v1621_v38 = vld [vmem:[#allocation2 + $0x90] sm:$0xf]  ;;  %v1865_v39 = vld [vmem:[#allocation2 + $0x94] sm:$0xf] }
  0x99   :  { %295 = vst [vmem:[#allocation2 + $0x78] sm:$0xff] %v288_v37  ;;  %v1866_v40 = vld [vmem:[#allocation2 + $0x98] sm:$0xf0]  ;;  %v1623_v41 = vld [vmem:[#allocation2 + $0x9c] sm:$0xf0] }
  0x9a   :  { %1072 = vrot.lane.b32.xlu0 %v1694_v36, %s1923_s19  ;;  %1074 = vrot.lane.b32.xlu1 %v2056_v20, %s1923_s19  ;;  %v1622_v42 = vor.u32 %v1866_v40, %v1621_v38  ;;  %v1626_v43 = vor.u32 %v1865_v39, %v1623_v41  ;;  %v125_v37 = vld [vmem:[%s2767_s0 + $0x8] sm:$0xf]  ;;  %v127_v40 = vld [vmem:[%s2767_s0 + $0x14] sm:$0xf] }
  0x9b   :  { %130 = vst.msk [vmem:[#allocation2 + $0x8] sm:$0xf] %vm129_vm0, %v125_v37 }
  0x9c   :  { %608 = vmatpush.bf16.msra.mxu0 %v1622_v42  ;;  %646 = vmatpush.bf16.msra.mxu2 %v1626_v43  ;;  %v281_v48 = vpop.permute.xlu0 %280  ;;  %v242_v49 = vpop.permute.xlu1 %241  ;;  %v1617_v61 = vld [vmem:[#allocation2 + $0x80] sm:$0xf]  ;;  %132 = vst.msk [vmem:[#allocation2 + $0x14] sm:$0xf] %vm129_vm0, %v127_v40 }
  0x9d   :  { %v285_v50 = vrot.slane %v281_v48, 4  ;;  %298 = vst.msk [vmem:[#allocation2 + $0x8c] sm:$0xf] %vm129_vm0, %v281_v48  ;;  %v249_v51 = vrot.slane %v242_v49, 4  ;;  %1076 = vrot.lane.b32.xlu2 %v1696_v45, %s1923_s19  ;;  %v2181_v52 = vpop.permute.xlu2 %179 }
  0x9f   :  { %v289_v55 = vsel %vm153_vm1, %v284_v46, %v285_v50  ;;  %v253_v56 = vsel %vm153_vm1, %v249_v51, %v250_v47  ;;  %1658 = vmatmul.msk.bf16.gmra.mxu3 %vm600_vm7, %v2232_v32  ;;  %1656 = vmatmul.msk.bf16.gmra.mxu1 %vm600_vm7, %v2232_v32 }
  0xa0   :  { %v290_v59 = vsel %vm287_vm5, %v2111_v44, %v289_v55  ;;  %v255_v60 = vsel %vm254_vm6, %v242_v49, %v253_v56  ;;  %v1609_v6 = vld [vmem:[#allocation2 + $0x78] sm:$0xf]  ;;  %v1862_v9 = vld [vmem:[#allocation2 + $0x7c] sm:$0xf]  ;;  %v185_v56 = vrot.slane %v2181_v52, 4 }
  0xa1   :  { %297 = vst [vmem:[#allocation2 + $0x84] sm:$0xff] %v290_v59 }
  0xa2   :  { %262 = vst [vmem:[#allocation2 + $0x60] sm:$0xff] %v255_v60  ;;  %846 = vrot.lane.b32.xlu0 %v2046_v18, %s1930_s7  ;;  %848 = vrot.lane.b32.xlu1 %v1666_v57, %s1930_s7 }
  0xa4   :  { %v246_v62 = vpop.permute.xlu0 %245  ;;  %v248_v63 = vpop.permute.xlu1 %247  ;;  %v1864_v44 = vld [vmem:[#allocation2 + $0x88] sm:$0xf0] }
  0xa5   :  { %v251_v0 = vrot.slane %v246_v62, 4  ;;  %v252_v1 = vrot.slane %v248_v63, 4  ;;  %265 = vst.msk [vmem:[#allocation2 + $0x74] sm:$0xf] %vm129_vm0, %v248_v63  ;;  %v1618_v2 = vor.u32 %v1864_v44, %v1617_v61  ;;  %v2207_v3 = vpop.permute.xlu2 %143  ;;  %850 = vrot.lane.b32.xlu2 %v2056_v20, %s1930_s7  ;;  %v2258_v61 = vld [vmem:[#allocation2 + $0x8] sm:$0xf] }
  0xa6   :  { %164 = vst.msk [vmem:[#allocation2 + $0x20] sm:$0xf] %vm129_vm0, %v2207_v3  ;;  %v150_v60 = vrot.slane %v2207_v3, 4  ;;  %v2263_v63 = vld [vmem:[#allocation2 + $0x10] sm:$0xf0] }
  0xa7   :  { %v256_v4 = vsel %vm153_vm1, %v251_v0, %v252_v1  ;;  %685 = vmatpush.bf16.msrb.mxu1 %v1618_v2  ;;  %v1664_v44 = vld [vmem:[%s2767_s0 + $0x2c] sm:$0xf]  ;;  %v2269_v2 = vld [vmem:[#allocation2] sm:$0xf] }
  0xa8   :  { %v257_v7 = vsel %vm254_vm6, %v246_v62, %v256_v4  ;;  %v1863_v8 = vld [vmem:[#allocation2 + $0x80] sm:$0xf0]  ;;  %v1611_v10 = vld [vmem:[#allocation2 + $0x84] sm:$0xf0]  ;;  %v1662_v62 = vld [vmem:[%s2767_s0 + $0x20] sm:$0xf] }
  0xa9   :  { %264 = vst [vmem:[#allocation2 + $0x6c] sm:$0xff] %v257_v7  ;;  %v1610_v11 = vor.u32 %v1863_v8, %v1609_v6  ;;  %v1614_v12 = vor.u32 %v1862_v9, %v1611_v10  ;;  %v1597_v30 = vld [vmem:[#allocation2 + $0x60] sm:$0xf]  ;;  %v1859_v31 = vld [vmem:[#allocation2 + $0x64] sm:$0xf] }
  0xaa   :  { %852 = vrot.lane.b32.xlu0 %v1668_v5, %s1930_s7  ;;  %835 = vst.msk [vmem:[#allocation2 + $0x8] sm:$0xf] %vm129_vm0, %v1662_v62  ;;  %v2275_v6 = vld [vmem:[#allocation2 + $0x4] sm:$0xf]  ;;  %v2277_v7 = vld [vmem:[#allocation2 + $0x8] sm:$0xf0] }
  0xab   :  { %609 = vmatpush.bf16.msra.mxu0 %v1610_v11  ;;  %647 = vmatpush.bf16.msra.mxu2 %v1614_v12  ;;  %837 = vst.msk [vmem:[#allocation2 + $0x14] sm:$0xf] %vm129_vm0, %v1664_v44  ;;  %v2279_v8 = vld [vmem:[#allocation2 + $0xc] sm:$0xf0] }
  0xac   :  { %v213_v17 = vpop.permute.xlu1 %212  ;;  %v211_v19 = vpop.permute.xlu0 %210  ;;  %v1861_v21 = vld [vmem:[#allocation2 + $0x70] sm:$0xf0]  ;;  %834 = vst [vmem:[#allocation2] sm:$0xff] %v2046_v18 }
  0xad   :  { %v218_v22 = vrot.slane %v213_v17, 4  ;;  %v217_v23 = vrot.slane %v211_v19, 4  ;;  %230 = vst.msk [vmem:[#allocation2 + $0x50] sm:$0xf] %vm129_vm0, %v211_v19  ;;  %v1606_v24 = vor.u32 %v1861_v21, %v1605_v14  ;;  %v2222_v25 = vpop.permute.xlu2 %1038 }
  0xae   :  { %836 = vst [vmem:[#allocation2 + $0xc] sm:$0xff] %v2056_v20 }
  0xaf   :  { %v220_v28 = vsel %vm153_vm1, %v216_v15, %v217_v23  ;;  %v223_v29 = vsel %vm153_vm1, %v218_v22, %v219_v16  ;;  %686 = vmatpush.bf16.msrb.mxu1 %v1606_v24  ;;  %1659 = vmatmul.msk.bf16.vlgmr.msrb.gmra.mxu3 %vm600_vm7, %v2194_v58 }
  0xb0   :  { %v222_v33 = vsel %vm221_vm8, %v2146_v13, %v220_v28  ;;  %v224_v34 = vsel %vm221_vm8, %v213_v17, %v223_v29  ;;  %v1860_v35 = vld [vmem:[#allocation2 + $0x68] sm:$0xf0]  ;;  %v1599_v36 = vld [vmem:[#allocation2 + $0x6c] sm:$0xf0]  ;;  %v1858_v13 = vld [vmem:[#allocation2 + $0x58] sm:$0xf0] }
  0xb1   :  { %229 = vst [vmem:[#allocation2 + $0x48] sm:$0xff] %v222_v33  ;;  %v1598_v38 = vor.u32 %v1860_v35, %v1597_v30  ;;  %v1602_v39 = vor.u32 %v1859_v31, %v1599_v36  ;;  %v1569_v29 = vld [vmem:[#allocation2 + $0x20] sm:$0xf]  ;;  %v1046_v30 = vrot.slane %v2222_v25, 4 }
  0xb2   :  { %231 = vst [vmem:[#allocation2 + $0x54] sm:$0xff] %v224_v34 }
  0xb3   :  { %610 = vmatpush.bf16.msra.mxu0 %v1598_v38  ;;  %648 = vmatpush.bf16.msra.mxu2 %v1602_v39 }
  0xb4   :  { %v178_v41 = vpop.permute.xlu1 %177  ;;  %v176_v42 = vpop.permute.xlu0 %175  ;;  %v1593_v43 = vld [vmem:[#allocation2 + $0x50] sm:$0xf] }
  0xb5   :  { %v184_v45 = vrot.slane %v178_v41, 4  ;;  %197 = vst.msk [vmem:[#allocation2 + $0x38] sm:$0xf] %vm129_vm0, %v178_v41  ;;  %v183_v46 = vrot.slane %v176_v42, 4  ;;  %v1594_v47 = vor.u32 %v1858_v13, %v1593_v43  ;;  %v2250_v48 = vpop.permute.xlu2 %1044 }
  0xb6   :  { %1061 = vst.msk [vmem:[#allocation2 + $0xbc] sm:$0xf] %vm129_vm0, %v2250_v48  ;;  %v1049_v31 = vrot.slane %v2250_v48, 4  ;;  %v1558_v48 = vor.u32 %v2263_v63, %v2258_v61 }
  0xb7   :  { %v187_v49 = vsel %vm153_vm1, %v183_v46, %v184_v45  ;;  %687 = vmatpush.bf16.msrb.mxu1 %v1594_v47 }
  0xb8   :  { %v189_v50 = vsel %vm188_vm9, %v176_v42, %v187_v49  ;;  %v1585_v51 = vld [vmem:[#allocation2 + $0x48] sm:$0xf]  ;;  %v1856_v53 = vld [vmem:[#allocation2 + $0x4c] sm:$0xf] }
  0xb9   :  { %196 = vst [vmem:[#allocation2 + $0x30] sm:$0xff] %v189_v50  ;;  %v1857_v54 = vld [vmem:[#allocation2 + $0x50] sm:$0xf0]  ;;  %v1587_v55 = vld [vmem:[#allocation2 + $0x54] sm:$0xf0] }
  0xba   :  { %v1586_v57 = vor.u32 %v1857_v54, %v1585_v51  ;;  %v1590_v59 = vor.u32 %v1856_v53, %v1587_v55  ;;  %v1554_v51 = vor.u32 %v2275_v6, %v2279_v8  ;;  %v1533_v53 = vld [vmem:[%s2768_s1] sm:$0xf]  ;;  %v1844_v54 = vld [vmem:[%s2768_s1 + $0x4] sm:$0xf0] }
  0xbc   :  { %611 = vmatpush.bf16.msra.mxu0 %v1586_v57  ;;  %649 = vmatpush.bf16.msra.mxu2 %v1590_v59  ;;  %v182_v0 = vpop.permute.xlu0 %181  ;;  %v142_v1 = vpop.permute.xlu1 %141  ;;  %v1581_v14 = vld [vmem:[#allocation2 + $0x38] sm:$0xf] }
  0xbd   :  { %v186_v3 = vrot.slane %v182_v0, 4  ;;  %199 = vst.msk [vmem:[#allocation2 + $0x44] sm:$0xf] %vm129_vm0, %v182_v0  ;;  %v149_v4 = vrot.slane %v142_v1, 4  ;;  %v2273_v5 = vpop.permute.xlu2 %1010 }
  0xbf   :  { %v190_v9 = vsel %vm153_vm1, %v185_v56, %v186_v3  ;;  %v154_v10 = vsel %vm153_vm1, %v149_v4, %v150_v60  ;;  %1660 = vmatmul.msk.bf16.gmra.mxu3 %vm600_vm7, %v2232_v32  ;;  %v1534_v60 = vor.u32 %v1844_v54, %v1533_v53  ;;  %v1016_v4 = vrot.slane %v2273_v5, 4 }
  0xc0   :  { %v191_v11 = vsel %vm188_vm9, %v2181_v52, %v190_v9  ;;  %v156_v12 = vsel %vm155_vm10, %v142_v1, %v154_v10  ;;  %v1573_v22 = vld [vmem:[#allocation2 + $0x30] sm:$0xf]  ;;  %v1853_v24 = vld [vmem:[#allocation2 + $0x34] sm:$0xf] }
  0xc1   :  { %198 = vst [vmem:[#allocation2 + $0x3c] sm:$0xff] %v191_v11 }
  0xc2   :  { %163 = vst [vmem:[#allocation2 + $0x18] sm:$0xff] %v156_v12 }
  0xc4   :  { %v146_v15 = vpop.permute.xlu0 %145  ;;  %v148_v16 = vpop.permute.xlu1 %147  ;;  %v1855_v18 = vld [vmem:[#allocation2 + $0x40] sm:$0xf0] }
  0xc5   :  { %v151_v17 = vrot.slane %v146_v15, 4  ;;  %v152_v19 = vrot.slane %v148_v16, 4  ;;  %166 = vst.msk [vmem:[#allocation2 + $0x2c] sm:$0xf] %vm129_vm0, %v148_v16  ;;  %v1582_v21 = vor.u32 %v1855_v18, %v1581_v14  ;;  %v2291_v20 = vpop.permute.xlu2 %976  ;;  %v1541_v18 = vld [vmem:[%s2768_s1 + $0x10] sm:$0xf] }
  0xc6   :  { %995 = vst.msk [vmem:[#allocation2 + $0x80] sm:$0xf] %vm129_vm0, %v2291_v20  ;;  %v983_v6 = vrot.slane %v2291_v20, 4 }
  0xc7   :  { %v157_v52 = vsel %vm153_vm1, %v151_v17, %v152_v19  ;;  %688 = vmatpush.bf16.msrb.mxu1 %v1582_v21  ;;  %v1846_v17 = vld [vmem:[%s2768_s1 + $0x14] sm:$0xf0] }
  0xc8   :  { %v158_v58 = vsel %vm155_vm10, %v146_v15, %v157_v52  ;;  %v1854_v23 = vld [vmem:[#allocation2 + $0x38] sm:$0xf0]  ;;  %v1575_v26 = vld [vmem:[#allocation2 + $0x3c] sm:$0xf0] }
  0xc9   :  { %165 = vst [vmem:[#allocation2 + $0x24] sm:$0xff] %v158_v58  ;;  %v1574_v27 = vor.u32 %v1854_v23, %v1573_v22  ;;  %v1578_v28 = vor.u32 %v1853_v24, %v1575_v26  ;;  %v1561_v41 = vld [vmem:[#allocation2 + $0x18] sm:$0xf]  ;;  %v1850_v46 = vld [vmem:[#allocation2 + $0x1c] sm:$0xf] }
  0xcb   :  { %612 = vmatpush.bf16.msra.mxu0 %v1574_v27  ;;  %650 = vmatpush.bf16.msra.mxu2 %v1578_v28 }
  0xcc   :  { %v1041_v33 = vpop.permute.xlu0 %1040  ;;  %v1043_v34 = vpop.permute.xlu1 %1042  ;;  %v1852_v35 = vld [vmem:[#allocation2 + $0x28] sm:$0xf0] }
  0xcd   :  { %v1047_v36 = vrot.slane %v1041_v33, 4  ;;  %1059 = vst.msk [vmem:[#allocation2 + $0xb0] sm:$0xf] %vm129_vm0, %v1041_v33  ;;  %v1048_v37 = vrot.slane %v1043_v34, 4  ;;  %v1570_v38 = vor.u32 %v1852_v35, %v1569_v29  ;;  %v2300_v39 = vpop.permute.xlu2 %942 }
  0xcf   :  { %v1050_v40 = vsel %vm153_vm1, %v1046_v30, %v1047_v36  ;;  %v1052_v13 = vsel %vm153_vm1, %v1048_v37, %v1049_v31  ;;  %689 = vmatpush.bf16.msrb.mxu1 %v1570_v38  ;;  %v950_v31 = vrot.slane %v2300_v39, 4 }
  0xd0   :  { %v1051_v42 = vsel %vm353_vm2, %v2222_v25, %v1050_v40  ;;  %v1053_v43 = vsel %vm353_vm2, %v1043_v34, %v1052_v13  ;;  %v1851_v45 = vld [vmem:[#allocation2 + $0x20] sm:$0xf0]  ;;  %v1563_v47 = vld [vmem:[#allocation2 + $0x24] sm:$0xf0]  ;;  %v1550_v25 = vor.u32 %v2277_v7, %v2269_v2 }
  0xd1   :  { %1058 = vst [vmem:[#allocation2 + $0xa8] sm:$0xff] %v1051_v42  ;;  %v1562_v49 = vor.u32 %v1851_v45, %v1561_v41  ;;  %v1566_v50 = vor.u32 %v1850_v46, %v1563_v47 }
  0xd2   :  { %1060 = vst [vmem:[#allocation2 + $0xb4] sm:$0xff] %v1053_v43 }
  0xd3   :  { %613 = vmatpush.bf16.msra.mxu0 %v1562_v49  ;;  %651 = vmatpush.bf16.msra.mxu2 %v1566_v50 }
  0xd4   :  { %v1007_v55 = vpop.permute.xlu0 %1006  ;;  %v1009_v56 = vpop.permute.xlu1 %1008  ;;  %690 = vmatpush.bf16.msrb.mxu1 %v1558_v48 }
  0xd5   :  { %v1014_v32 = vrot.slane %v1007_v55, 4  ;;  %v1015_v57 = vrot.slane %v1009_v56, 4  ;;  %1027 = vst.msk [vmem:[#allocation2 + $0x98] sm:$0xf] %vm129_vm0, %v1009_v56  ;;  %v2322_v59 = vpop.permute.xlu2 %948 }
  0xd6   :  { %965 = vst.msk [vmem:[#allocation2 + $0x74] sm:$0xf] %vm129_vm0, %v2322_v59  ;;  %v953_v33 = vrot.slane %v2322_v59, 4 }
  0xd7   :  { %v1018_v61 = vsel %vm153_vm1, %v1014_v32, %v1015_v57  ;;  %614 = vmatpush.bf16.msra.mxu0 %v1550_v25  ;;  %652 = vmatpush.bf16.msra.mxu2 %v1554_v51 }
  0xd8   :  { %v1019_v62 = vsel %vm320_vm4, %v1007_v55, %v1018_v61  ;;  %v1799_v63 = vld [vmem:[#allocation2 + $0xa8] sm:$0xf]  ;;  %v1899_v44 = vld [vmem:[#allocation2 + $0xac] sm:$0xf]  ;;  %691 = vmatmul.bf16.vlgmr.msrb.gmra.mxu1 %v1534_v60 }
  0xd9   :  { %1026 = vst [vmem:[#allocation2 + $0x90] sm:$0xff] %v1019_v62  ;;  %v1900_v0 = vld [vmem:[#allocation2 + $0xb0] sm:$0xf0]  ;;  %v1801_v1 = vld [vmem:[#allocation2 + $0xb4] sm:$0xf0] }
  0xda   :  { %v1800_v2 = vor.u32 %v1900_v0, %v1799_v63  ;;  %v1804_v3 = vor.u32 %v1899_v44, %v1801_v1  ;;  %653 = vmatmul.bf16.vlgmr.msra.gmra.mxu2 %v1534_v60  ;;  %615 = vmatmul.bf16.vlgmr.msra.gmra.mxu0 %v1534_v60 }
  0xdc   :  { %1302 = vmatpush.bf16.msrb.mxu0 %v1800_v2  ;;  %1340 = vmatpush.bf16.msra.mxu1 %v1804_v3  ;;  %v1013_v7 = vpop.permute.xlu0 %1012  ;;  %v975_v8 = vpop.permute.xlu1 %974 }
  0xdd   :  { %v1017_v9 = vrot.slane %v1013_v7, 4  ;;  %1029 = vst.msk [vmem:[#allocation2 + $0xa4] sm:$0xf] %vm129_vm0, %v1013_v7  ;;  %v982_v10 = vrot.slane %v975_v8, 4  ;;  %v2331_v11 = vpop.permute.xlu2 %914 }
  0xde   :  { %v920_v62 = vrot.slane %v2331_v11, 4 }
  0xdf   :  { %v1020_v12 = vsel %vm153_vm1, %v1016_v4, %v1017_v9  ;;  %v986_v14 = vsel %vm153_vm1, %v982_v10, %v983_v6 }
  0xe0   :  { %v1021_v15 = vsel %vm320_vm4, %v2273_v5, %v1020_v12  ;;  %v987_v16 = vsel %vm287_vm5, %v975_v8, %v986_v14  ;;  %v1542_v5 = vor.u32 %v1846_v17, %v1541_v18  ;;  %v1787_v23 = vld [vmem:[#allocation2 + $0x90] sm:$0xf]  ;;  %v1896_v27 = vld [vmem:[#allocation2 + $0x94] sm:$0xf] }
  0xe1   :  { %1028 = vst [vmem:[#allocation2 + $0x9c] sm:$0xff] %v1021_v15 }
  0xe2   :  { %994 = vst [vmem:[#allocation2 + $0x78] sm:$0xff] %v987_v16 }
  0xe4   :  { %v979_v19 = vpop.permute.xlu0 %978  ;;  %v981_v21 = vpop.permute.xlu1 %980 }
  0xe5   :  { %v984_v20 = vrot.slane %v979_v19, 4  ;;  %v985_v52 = vrot.slane %v981_v21, 4  ;;  %997 = vst.msk [vmem:[#allocation2 + $0x8c] sm:$0xf] %vm129_vm0, %v981_v21  ;;  %v2345_v22 = vpop.permute.xlu2 %880 }
  0xe6   :  { %899 = vst.msk [vmem:[#allocation2 + $0x38] sm:$0xf] %vm129_vm0, %v2345_v22  ;;  %v887_v63 = vrot.slane %v2345_v22, 4 }
  0xe7   :  { %v988_v58 = vsel %vm153_vm1, %v984_v20, %v985_v52 }
  0xe8   :  { %v989_v24 = vsel %vm287_vm5, %v979_v19, %v988_v58  ;;  %v1897_v26 = vld [vmem:[#allocation2 + $0x98] sm:$0xf0]  ;;  %v1789_v28 = vld [vmem:[#allocation2 + $0x9c] sm:$0xf0]  ;;  %696 = vmatmul.bf16.gmra.mxu1 %v1542_v5 }
  0xe9   :  { %996 = vst [vmem:[#allocation2 + $0x84] sm:$0xff] %v989_v24  ;;  %v1788_v29 = vor.u32 %v1897_v26, %v1787_v23  ;;  %v1792_v30 = vor.u32 %v1896_v27, %v1789_v28  ;;  %v1775_v41 = vld [vmem:[#allocation2 + $0x78] sm:$0xf]  ;;  %v1893_v46 = vld [vmem:[#allocation2 + $0x7c] sm:$0xf] }
  0xea   :  { %658 = vmatmul.bf16.gmra.mxu2 %v1542_v5  ;;  %620 = vmatmul.bf16.gmra.mxu0 %v1542_v5 }
  0xeb   :  { %1303 = vmatpush.bf16.msrb.mxu0 %v1788_v29  ;;  %1341 = vmatpush.bf16.msra.mxu1 %v1792_v30 }
  0xec   :  { %v945_v34 = vpop.permute.xlu0 %944  ;;  %v947_v35 = vpop.permute.xlu1 %946 }
  0xed   :  { %v951_v36 = vrot.slane %v945_v34, 4  ;;  %963 = vst.msk [vmem:[#allocation2 + $0x68] sm:$0xf] %vm129_vm0, %v945_v34  ;;  %v952_v37 = vrot.slane %v947_v35, 4 }
  0xee   :  { %v2354_v38 = vpop.permute.xlu2 %1070 }
  0xef   :  { %v954_v40 = vsel %vm153_vm1, %v950_v31, %v951_v36  ;;  %v956_v13 = vsel %vm153_vm1, %v952_v37, %v953_v33  ;;  %v1078_v20 = vrot.slane %v2354_v38, 4 }
  0xf0   :  { %v955_v42 = vsel %vm254_vm6, %v2300_v39, %v954_v40  ;;  %v957_v43 = vsel %vm254_vm6, %v947_v35, %v956_v13  ;;  %v1894_v45 = vld [vmem:[#allocation2 + $0x80] sm:$0xf0]  ;;  %v1777_v47 = vld [vmem:[#allocation2 + $0x84] sm:$0xf0] }
  0xf1   :  { %962 = vst [vmem:[#allocation2 + $0x60] sm:$0xff] %v955_v42  ;;  %v1776_v48 = vor.u32 %v1894_v45, %v1775_v41  ;;  %v1780_v49 = vor.u32 %v1893_v46, %v1777_v47  ;;  %v1709_v41 = vld [vmem:[%s2768_s1 + $0x18] sm:$0xf0]  ;;  %v1874_v45 = vld [vmem:[%s2768_s1 + $0x4] sm:$0xf] }
  0xf2   :  { %964 = vst [vmem:[#allocation2 + $0x6c] sm:$0xff] %v957_v43  ;;  %v1701_v46 = vld [vmem:[%s2768_s1 + $0x8] sm:$0xf0] }
  0xf3   :  { %1304 = vmatpush.bf16.msrb.mxu0 %v1776_v48  ;;  %1342 = vmatpush.bf16.msra.mxu1 %v1780_v49 }
  0xf4   :  { %v911_v50 = vpop.permute.xlu0 %910  ;;  %v913_v25 = vpop.permute.xlu1 %912 }
  0xf5   :  { %v918_v51 = vrot.slane %v911_v50, 4  ;;  %v919_v53 = vrot.slane %v913_v25, 4  ;;  %931 = vst.msk [vmem:[#allocation2 + $0x50] sm:$0xf] %vm129_vm0, %v913_v25 }
  0xf7   :  { %v922_v54 = vsel %vm153_vm1, %v918_v51, %v919_v53  ;;  %v1077_v39 = vpop.permute.xlu2 %1076 }
  0xf8   :  { %v923_v55 = vsel %vm221_vm8, %v911_v50, %v922_v54  ;;  %v1763_v56 = vld [vmem:[#allocation2 + $0x60] sm:$0xf]  ;;  %v1890_v32 = vld [vmem:[#allocation2 + $0x64] sm:$0xf]  ;;  %1093 = vst.msk [vmem:[#allocation2 + $0xd4] sm:$0xf] %vm129_vm0, %v1077_v39 }
  0xf9   :  { %930 = vst [vmem:[#allocation2 + $0x48] sm:$0xff] %v923_v55  ;;  %v1891_v57 = vld [vmem:[#allocation2 + $0x68] sm:$0xf0]  ;;  %v1765_v59 = vld [vmem:[#allocation2 + $0x6c] sm:$0xf0]  ;;  %v1081_v52 = vrot.slane %v1077_v39, 4 }
  0xfa   :  { %v1764_v60 = vor.u32 %v1891_v57, %v1763_v56  ;;  %v1768_v61 = vor.u32 %v1890_v32, %v1765_v59  ;;  %v1704_v57 = vor.u32 %v1874_v45, %v1701_v46 }
  0xfc   :  { %1305 = vmatpush.bf16.msrb.mxu0 %v1764_v60  ;;  %1343 = vmatpush.bf16.msra.mxu1 %v1768_v61  ;;  %v917_v44 = vpop.permute.xlu0 %916  ;;  %v879_v0 = vpop.permute.xlu1 %878 }
  0xfd   :  { %v921_v1 = vrot.slane %v917_v44, 4  ;;  %933 = vst.msk [vmem:[#allocation2 + $0x5c] sm:$0xf] %vm129_vm0, %v917_v44  ;;  %v886_v2 = vrot.slane %v879_v0, 4  ;;  %v1715_v44 = vld [vmem:[#allocation2] sm:$0xf] }
  0xff   :  { %v924_v3 = vsel %vm153_vm1, %v920_v62, %v921_v1  ;;  %v890_v4 = vsel %vm153_vm1, %v886_v2, %v887_v63  ;;  %v1904_v43 = vld [vmem:[#allocation2 + $0xd0] sm:$0xf0]  ;;  %v851_v48 = vpop.permute.xlu2 %850 }
 0x100   :  { %v925_v6 = vsel %vm221_vm8, %v2331_v11, %v924_v3  ;;  %v891_v7 = vsel %vm188_vm9, %v879_v0, %v890_v4  ;;  %v1751_v15 = vld [vmem:[#allocation2 + $0x48] sm:$0xf]  ;;  %v1887_v17 = vld [vmem:[#allocation2 + $0x4c] sm:$0xf]  ;;  %v856_v55 = vrot.slane %v851_v48, 4 }
 0x101   :  { %932 = vst [vmem:[#allocation2 + $0x54] sm:$0xff] %v925_v6  ;;  %v1879_v0 = vld [vmem:[#allocation2 + $0x8] sm:$0xf0] }
 0x102   :  { %898 = vst [vmem:[#allocation2 + $0x30] sm:$0xff] %v891_v7 }
 0x104   :  { %v883_v8 = vpop.permute.xlu0 %882  ;;  %v885_v9 = vpop.permute.xlu1 %884 }
 0x105   :  { %v888_v10 = vrot.slane %v883_v8, 4  ;;  %v889_v12 = vrot.slane %v885_v9, 4  ;;  %901 = vst.msk [vmem:[#allocation2 + $0x44] sm:$0xf] %vm129_vm0, %v885_v9  ;;  %v1717_v9 = vld [vmem:[#allocation2 + $0xc] sm:$0xf0] }
 0x107   :  { %v892_v14 = vsel %vm153_vm1, %v888_v10, %v889_v12  ;;  %v1901_v10 = vld [vmem:[#allocation2 + $0xb8] sm:$0xf0]  ;;  %v1716_v12 = vor.u32 %v1879_v0, %v1715_v44 }
 0x108   :  { %v893_v16 = vsel %vm188_vm9, %v883_v8, %v892_v14  ;;  %v1888_v18 = vld [vmem:[#allocation2 + $0x50] sm:$0xf0]  ;;  %v1753_v19 = vld [vmem:[#allocation2 + $0x54] sm:$0xf0]  ;;  %v1878_v8 = vld [vmem:[#allocation2 + $0x4] sm:$0xf] }
 0x109   :  { %900 = vst [vmem:[#allocation2 + $0x3c] sm:$0xff] %v893_v16  ;;  %v1752_v11 = vor.u32 %v1888_v18, %v1751_v15  ;;  %v1756_v21 = vor.u32 %v1887_v17, %v1753_v19  ;;  %v1739_v27 = vld [vmem:[#allocation2 + $0x30] sm:$0xf]  ;;  %v1884_v31 = vld [vmem:[#allocation2 + $0x34] sm:$0xf]  ;;  %v1720_v18 = vor.u32 %v1878_v8, %v1717_v9 }
 0x10a   :  { %v1807_v14 = vld [vmem:[#allocation2 + $0xb0] sm:$0xf]  ;;  %v1699_v15 = vld [vmem:[%s2768_s1] sm:$0xf]  ;;  %v1875_v16 = vld [vmem:[%s2768_s1 + $0x4] sm:$0xf0] }
 0x10b   :  { %1306 = vmatpush.bf16.msrb.mxu0 %v1752_v11  ;;  %1344 = vmatpush.bf16.msra.mxu1 %v1756_v21  ;;  %v1808_v19 = vor.u32 %v1901_v10, %v1807_v14  ;;  %v2416_v11 = vor.u32 %v1875_v16, %v1699_v15  ;;  %v15_v21 = vlaneseq  ;;  %v1747_v14 = vld [vmem:[#allocation2 + $0x38] sm:$0xf] }
 0x10c   :  { %v1073_v22 = vpop.permute.xlu0 %1072  ;;  %v1075_v5 = vpop.permute.xlu1 %1074  ;;  %v1886_v15 = vld [vmem:[#allocation2 + $0x40] sm:$0xf0] }
 0x10d   :  { %v1079_v58 = vrot.slane %v1073_v22, 4  ;;  %1091 = vst.msk [vmem:[#allocation2 + $0xc8] sm:$0xf] %vm129_vm0, %v1073_v22  ;;  %v1080_v23 = vrot.slane %v1075_v5, 4  ;;  %v2414_v17 = vpop.f32.mrf.mxu1  ;;  %v2419_v22 = vand.u32 127, %v15_v21 }
 0x10f   :  { %v1082_v24 = vsel %vm153_vm1, %v1078_v20, %v1079_v58  ;;  %v1084_v26 = vsel %vm153_vm1, %v1080_v23, %v1081_v52  ;;  %v1795_v20 = vld [vmem:[#allocation2 + $0x98] sm:$0xf]  ;;  %v1898_v52 = vld [vmem:[#allocation2 + $0xa0] sm:$0xf0]  ;;  %v1783_v23 = vld [vmem:[#allocation2 + $0x80] sm:$0xf] }
 0x110   :  { %v1083_v28 = vsel %vm386_vm3, %v2354_v38, %v1082_v24  ;;  %v1085_v29 = vsel %vm386_vm3, %v1075_v5, %v1084_v26  ;;  %v1885_v30 = vld [vmem:[#allocation2 + $0x38] sm:$0xf0]  ;;  %v1741_v33 = vld [vmem:[#allocation2 + $0x3c] sm:$0xf0]  ;;  %v1876_v38 = vld [vmem:[%s2768_s1 + $0x14] sm:$0xf]  ;;  %v1796_v58 = vor.u32 %v1898_v52, %v1795_v20 }
 0x111   :  { %1090 = vst [vmem:[#allocation2 + $0xc0] sm:$0xff] %v1083_v28  ;;  %v1740_v34 = vor.u32 %v1885_v30, %v1739_v27  ;;  %v1744_v35 = vor.u32 %v1884_v31, %v1741_v33  ;;  %v2398_v32 = vor.u32 %v1876_v38, %v1709_v41  ;;  %v1895_v24 = vld [vmem:[#allocation2 + $0x88] sm:$0xf0]  ;;  %v2426_v26 = vadd.s32 128, %v2419_v22  ;;  %v1771_v27 = vld [vmem:[#allocation2 + $0x68] sm:$0xf] }
 0x112   :  { %1092 = vst [vmem:[#allocation2 + $0xcc] sm:$0xff] %v1085_v29  ;;  %v2406_v1 = vpop.f32.mrf.mxu3  ;;  %v1892_v28 = vld [vmem:[#allocation2 + $0x70] sm:$0xf0]  ;;  %v2430_v29 = vadd.s32 256, %v2419_v22  ;;  %v1759_v30 = vld [vmem:[#allocation2 + $0x50] sm:$0xf] }
 0x113   :  { %1307 = vmatpush.bf16.msrb.mxu0 %v1740_v34  ;;  %1345 = vmatpush.bf16.msra.mxu1 %v1744_v35  ;;  %v1889_v31 = vld [vmem:[#allocation2 + $0x58] sm:$0xf0]  ;;  %v22_v33 = vand.u32 65535, %v2419_v22  ;;  %v51_v34 = vand.u32 65535, %v2426_v26  ;;  %v1784_v35 = vor.u32 %v1895_v24, %v1783_v23  ;;  %v1772_v41 = vor.u32 %v1892_v28, %v1771_v27 }
 0x114   :  { %v847_v36 = vpop.permute.xlu0 %846  ;;  %v849_v37 = vpop.permute.xlu1 %848  ;;  %v1819_v25 = vld [vmem:[#allocation2 + $0xc8] sm:$0xf]  ;;  %v81_v45 = vshrl.u32 %v2430_v29, 16  ;;  %v1748_v28 = vor.u32 %v1886_v15, %v1747_v14 }
 0x115   :  { %v854_v40 = vrot.slane %v847_v36, 4  ;;  %v855_v13 = vrot.slane %v849_v37, 4  ;;  %867 = vst.msk [vmem:[#allocation2 + $0x20] sm:$0xf] %vm129_vm0, %v849_v37  ;;  %v1820_v56 = vor.u32 %v1904_v43, %v1819_v25  ;;  %v23_v37 = vshrl.u32 %v2419_v22, 16  ;;  %v2439_v43 = vpop.f32.mrf.mxu1 }
 0x116   :  { %v2437_v38 = vmul.u32 58254, %v51_v34  ;;  %v54_v25 = vmul.u32 14564, %v51_v34 }
 0x117   :  { %v858_v42 = vsel %vm153_vm1, %v854_v40, %v855_v13  ;;  %v26_v40 = vmul.u32 58254, %v22_v33  ;;  %v52_v13 = vshrl.u32 %v2426_v26, 16 }
 0x118   :  { %v1811_v47 = vld [vmem:[#allocation2 + $0xc0] sm:$0xf]  ;;  %v1902_v49 = vld [vmem:[#allocation2 + $0xc4] sm:$0xf]  ;;  %v859_v50 = vsel %vm155_vm10, %v847_v36, %v858_v42  ;;  %v80_v36 = vand.u32 65535, %v2430_v29  ;;  %v1760_v42 = vor.u32 %v1889_v31, %v1759_v30 }
 0x119   :  { %v1903_v51 = vld [vmem:[#allocation2 + $0xc8] sm:$0xf0]  ;;  %v1813_v53 = vld [vmem:[#allocation2 + $0xcc] sm:$0xf0]  ;;  %866 = vst [vmem:[#allocation2 + $0x18] sm:$0xff] %v859_v50  ;;  %v29_v50 = vshll.u32 %v26_v40, 16 }
 0x11a   :  { %v1812_v54 = vor.u32 %v1903_v51, %v1811_v47  ;;  %v1816_v39 = vor.u32 %v1902_v49, %v1813_v53  ;;  %v2422_v5 = vpop.f32.mrf.mxu3  ;;  %v2442_v46 = vmul.u32 58254, %v80_v36  ;;  %v1707_v47 = vld [vmem:[%s2768_s1 + $0x10] sm:$0xf]  ;;  %v27_v49 = vmul.u32 14564, %v23_v37  ;;  %v1877_v51 = vld [vmem:[%s2768_s1 + $0x14] sm:$0xf0] }
 0x11b   :  { %v56_v53 = vmul.u32 14564, %v52_v13  ;;  %v2455_v0 = vor.u32 %v1877_v51, %v1707_v47  ;;  %v30_v8 = vshrl.u32 %v26_v40, 16  ;;  %v1880_v40 = vld [vmem:[#allocation2 + $0x10] sm:$0xf0] }
 0x11c   :  { %1328 = vmatpush.bf16.msrb.mxu2 %v1812_v54  ;;  %1905 = vmatpush.bf16.msra.mxu3 %v1812_v54  ;;  %v853_v59 = vpop.permute.xlu0 %852  ;;  %v58_v54 = vshll.u32 %v2437_v38, 16  ;;  %v1735_v31 = vld [vmem:[#allocation2 + $0x20] sm:$0xf] }
 0x11d   :  { %v857_v60 = vrot.slane %v853_v59, 4  ;;  %869 = vst.msk [vmem:[#allocation2 + $0x2c] sm:$0xf] %vm129_vm0, %v853_v59  ;;  %v60_v44 = vshll.u32 %v56_v53, 16  ;;  %v2464_v52 = vpop.f32.mrf.mxu1  ;;  %v61_v23 = vshrl.u32 %v56_v53, 16 }
 0x11e   :  { %vm62_vm12 = vc.u32 %v54_v25, %v58_v54 }
 0x11f   :  { %v860_v61 = vsel %vm153_vm1, %v856_v55, %v857_v60  ;;  %1822 = vmatmul.msk.bf16.vlgmr.msra.gmra.mxu3 %vm600_vm7, %v2398_v32  ;;  %1821 = vmatmul.msk.bf16.vlgmr.msrb.gmra.mxu2 %vm600_vm7, %v1704_v57  ;;  %v2451_v55 = vmul.u32 14564, %v81_v45  ;;  %v1931_v60 = vmov 0  }
 0x120   :  { %1366 = vmatpush.bf16.msrb.mxu3 %v1816_v39  ;;  %1404 = vmatpush.bf16.msra.mxu2 %v1820_v56  ;;  %v861_v62 = vsel %vm155_vm10, %v851_v48, %v860_v61  ;;  %v1727_v63 = vld [vmem:[#allocation2 + $0x18] sm:$0xf]  ;;  %v1881_v3 = vld [vmem:[#allocation2 + $0x1c] sm:$0xf]  ;;  %v25_v48 = vmul.u32 14564, %v22_v33  ;;  %v83_v39 = vmul.u32 14564, %v80_v36 }
 0x121   :  { %868 = vst [vmem:[#allocation2 + $0x24] sm:$0xff] %v861_v62  ;;  %v28_v56 = vmul.u32 58254, %v23_v37  ;;  %v88_v36 = vshrl.u32 %v2442_v46, 16  ;;  %v1723_v37 = vld [vmem:[#allocation2 + $0x8] sm:$0xf] }
 0x122   :  { %vm33_vm11 = vc.u32 %v25_v48, %v29_v50  ;;  %v2453_v59 = vpop.f32.mrf.mxu3  ;;  %v35_v62 = vadd.s32 %v29_v50, %v25_v48 }
 0x123   :  { %v34_v61 = vsel %vm33_vm11, 1, %v1931_v60 }
 0x124   :  { %v1883_v33 = vld [vmem:[#allocation2 + $0x28] sm:$0xf0] }
 0x128   :  { %v1882_v2 = vld [vmem:[#allocation2 + $0x20] sm:$0xf0]  ;;  %v1729_v4 = vld [vmem:[#allocation2 + $0x24] sm:$0xf0] }
 0x129   :  { %v1728_v6 = vor.u32 %v1882_v2, %v1727_v63  ;;  %v1732_v7 = vor.u32 %v1881_v3, %v1729_v4  ;;  %v57_v63 = vmul.u32 58254, %v52_v13  ;;  %v36_v2 = vadd.s32 %v34_v61, %v28_v56 }
 0x12a   :  { %v64_v3 = vadd.s32 %v58_v54, %v54_v25  ;;  %v63_v4 = vsel %vm62_vm12, 1, %v1931_v60  ;;  %v2469_v13 = vpop.f32.mrf.mxu3  ;;  %v2472_v25 = vpop.f32.mrf.mxu1 }
 0x12b   :  { %1308 = vmatpush.bf16.msrb.mxu0 %v1728_v6  ;;  %1346 = vmatpush.bf16.msra.mxu1 %v1732_v7  ;;  %v86_v6 = vmul.u32 58254, %v81_v45  ;;  %v87_v7 = vshll.u32 %v2442_v46, 16  ;;  %v65_v10 = vadd.s32 %v63_v4, %v57_v63  ;;  %v1736_v45 = vor.u32 %v1883_v33, %v1735_v31 }
 0x12c   :  { %vm66_vm14 = vc.u32 %v64_v3, %v60_v44 }
 0x12d   :  { %vm91_vm15 = vc.u32 %v83_v39, %v87_v7  ;;  %v67_v21 = vsel %vm66_vm14, 1, %v1931_v60  ;;  %v93_v27 = vadd.s32 %v87_v7, %v83_v39 }
 0x12e   :  { %v92_v20 = vsel %vm91_vm15, 1, %v1931_v60  ;;  %v69_v24 = vadd.s32 %v67_v21, %v65_v10  ;;  %vm776_vm15 = vcmask 7168  }
 0x12f   :  { %1823 = vmatmul.msk.bf16.vlgmr.msrb.gmra.mxu3 %vm600_vm7, %v1704_v57  ;;  %1309 = vmatpush.bf16.msrb.mxu0 %v1716_v12  ;;  %v89_v12 = vshll.u32 %v2451_v55, 16  ;;  %v94_v30 = vadd.s32 %v92_v20, %v86_v6 }
 0x130   :  { %1347 = vmatpush.bf16.msra.mxu1 %v1720_v18  ;;  %1825 = vmatmul.msk.bf16.vlgmr.msra.gmra.mxu2 %vm600_vm7, %v1704_v57  ;;  %v31_v57 = vshll.u32 %v27_v49, 16  ;;  %v59_v18 = vshrl.u32 %v2437_v38, 16 }
 0x131   :  { %vm95_vm1 = vc.u32 %v93_v27, %v89_v12 }
 0x132   :  { %1310 = vmatmul.bf16.vlgmr.msrb.gmra.mxu0 %v2416_v11  ;;  %vm37_vm13 = vc.u32 %v35_v62, %v31_v57  ;;  %v711_v56 = vpop.f32.mrf.mxu3 }
 0x133   :  { %1378 = vmatpush.bf16.msra.mxu0 %v1808_v19  ;;  %1348 = vmatmul.bf16.vlgmr.msra.gmra.mxu1 %v2416_v11  ;;  %v38_v9 = vsel %vm37_vm13, 1, %v1931_v60  ;;  %vm756_vm13 = vcmask 261120  }
 0x134   :  { %1906 = vmatpush.bf16.msrb.mxu1 %v1808_v19  ;;  %v40_v16 = vadd.s32 %v38_v9, %v36_v2  ;;  %v32_v19 = vshrl.u32 %v27_v49, 16  ;;  %v1724_v49 = vor.u32 %v1880_v40, %v1723_v37 }
 0x137   :  { %1379 = vmatpush.bf16.msra.mxu0 %v1796_v58 }
 0x138   :  { %1907 = vmatpush.bf16.msrb.mxu1 %v1796_v58  ;;  %v41_v58 = vadd.s32 %v40_v16, %v30_v8 }
 0x13a   :  { %v42_v34 = vadd.s32 %v41_v58, %v32_v19 }
 0x13b   :  { %1380 = vmatpush.bf16.msra.mxu0 %v1784_v35 }
 0x13c   :  { %1908 = vmatpush.bf16.msrb.mxu1 %v1784_v35  ;;  %v70_v35 = vadd.s32 %v69_v24, %v59_v18  ;;  %v43_v47 = vshrl.u32 %v42_v34, 4 }
 0x13e   :  { %v71_v38 = vadd.s32 %v70_v35, %v61_v23  ;;  %v44_v51 = vmul.u32 18, %v43_v47 }
 0x13f   :  { %1381 = vmatpush.bf16.msra.mxu0 %v1772_v41  ;;  %1824 = vmatmul.msk.bf16.gmra.mxu3 %vm600_vm7, %v2398_v32 }
 0x140   :  { %1909 = vmatpush.bf16.msrb.mxu1 %v1772_v41  ;;  %1826 = vmatmul.msk.bf16.gmra.mxu2 %vm600_vm7, %v2398_v32  ;;  %v96_v32 = vsel %vm95_vm1, 1, %v1931_v60  ;;  %v90_v41 = vshrl.u32 %v2451_v55, 16  ;;  %v72_v50 = vshrl.u32 %v71_v38, 4  ;;  %v45_v55 = vsub.s32 %v2419_v22, %v44_v51 }
 0x142   :  { %1315 = vmatmul.bf16.gmra.mxu0 %v2455_v0  ;;  %v73_v54 = vmul.u32 18, %v72_v50  ;;  %vm106_vm4 = vcmp.ne.s32.totalorder %v45_v55, 0  ;;  %vm109_vm5 = vcmp.lt.s32.totalorder %v45_v55, 0  ;;  %v115_v63 = vadd.s32 18, %v45_v55 }
 0x143   :  { %1382 = vmatpush.bf16.msra.mxu0 %v1760_v42  ;;  %1353 = vmatmul.bf16.gmra.mxu1 %v2455_v0  ;;  %vm112_vm9 = vmand %vm109_vm5, %vm106_vm4 }
 0x144   :  { %1910 = vmatpush.bf16.msrb.mxu1 %v1760_v42  ;;  %v98_v42 = vadd.s32 %v96_v32, %v94_v30  ;;  %v74_v60 = vsub.s32 %v2426_v26, %v73_v54  ;;  %v118_v3 = vsel %vm112_vm9, %v115_v63, %v45_v55 }
 0x145   :  { %vm2488_vm12 = vcmp.lt.s32.totalorder %v118_v3, 16 }
 0x146   :  { %v99_v48 = vadd.s32 %v98_v42, %v88_v36  ;;  %vm107_vm6 = vcmp.ne.s32.totalorder %v74_v60, 0  ;;  %vm110_vm7 = vcmp.lt.s32.totalorder %v74_v60, 0 }
 0x147   :  { %1383 = vmatpush.bf16.msra.mxu0 %v1748_v28  ;;  %vm113_vm10 = vmand %vm110_vm7, %vm107_vm6 }
 0x148   :  { %1911 = vmatpush.bf16.msrb.mxu1 %v1748_v28  ;;  %v100_v46 = vadd.s32 %v99_v48, %v90_v41 }
 0x14a   :  { %v101_v53 = vshrl.u32 %v100_v46, 4 }
 0x14b   :  { %1384 = vmatpush.bf16.msra.mxu0 %v1736_v45 }
 0x14c   :  { %1912 = vmatpush.bf16.msrb.mxu1 %v1736_v45  ;;  %v102_v39 = vmul.u32 18, %v101_v53 }
 0x14e   :  { %v103_v57 = vsub.s32 %v2430_v29, %v102_v39  ;;  %v116_v29 = vadd.s32 18, %v74_v60 }
 0x14f   :  { %1385 = vmatpush.bf16.msra.mxu0 %v1724_v49 }
 0x150   :  { %1913 = vmatpush.bf16.msrb.mxu1 %v1724_v49  ;;  %vm108_vm2 = vcmp.ne.s32.totalorder %v103_v57, 0  ;;  %vm111_vm3 = vcmp.lt.s32.totalorder %v103_v57, 0  ;;  %v117_v61 = vadd.s32 18, %v103_v57  ;;  %v119_v4 = vsel %vm113_vm10, %v116_v29, %v74_v60 }
 0x151   :  { %vm114_vm8 = vmand %vm111_vm3, %vm108_vm2  ;;  %vm2493_vm14 = vcmp.lt.s32.totalorder %v119_v4, 16 }
 0x152   :  { %1386 = vmatmul.bf16.vlgmr.msra.gmra.mxu0 %v2416_v11  ;;  %v120_v26 = vsel %vm114_vm8, %v117_v61, %v103_v57  ;;  %v713_v11 = vpop.f32.mrf.mxu3 }
 0x153   :  { %1391 = vmatmul.bf16.vlgmr.msrb.gmra.mxu1 %v2455_v0  ;;  %vm2484_vm11 = vcmp.lt.s32.totalorder %v120_v26, 16 }
 0x155   :  { %v692_v62 = vpop.f32.mrf.mxu1 }
 0x156   :  { %v712_v44 = vadd.f32 %v711_v56, %v692_v62 }
 0x157   :  { %v616_v22 = vpop.f32.mrf.mxu0 }
 0x158   :  { %v722_v2 = vpack.c.bf16 %v712_v44, %v712_v44  ;;  %v636_v0 = vadd.f32 %v2414_v17, %v616_v22  ;;  %v745_v17 = vsel %vm2484_vm11, %v712_v44, 0.0  ;;  %v783_v20 = vmul.f32 %v712_v44, %v712_v44 }
 0x159   :  { %v757_v23 = vsel %vm756_vm13, %v745_v17, 0.0 }
 0x15a   :  { %730 = vst.msk [vmem:[%s2769_s2 + $0x8] sm:$0xf] %vm129_vm0, %v722_v2  ;;  %v781_v15 = vmul.f32 %v636_v0, %v636_v0  ;;  %v743_v18 = vsel %vm2488_vm12, %v636_v0, 0.0  ;;  %v716_v24 = vpop.f32.mrf.mxu3  ;;  %v795_v34 = vsel %vm2484_vm11, %v783_v20, 0.0 }
 0x15b   :  { %v806_v47 = vsel %vm756_vm13, %v795_v34, 0.0 }
 0x15c   :  { %v793_v30 = vsel %vm2488_vm12, %v781_v15, 0.0 }
 0x15d   :  { %v654_v8 = vpop.f32.mrf.mxu2  ;;  %v694_v9 = vpop.f32.mrf.mxu1 }
 0x15e   :  { %v674_v10 = vadd.f32 %v2406_v1, %v654_v8  ;;  %v714_v12 = vadd.f32 %v713_v11, %v694_v9 }
 0x15f   :  { %v618_v16 = vpop.f32.mrf.mxu0 }
 0x160   :  { %v721_v19 = vpack.c.bf16 %v674_v10, %v636_v0  ;;  %v782_v21 = vmul.f32 %v674_v10, %v674_v10  ;;  %v724_v58 = vpack.c.bf16 %v714_v12, %v714_v12  ;;  %v744_v1 = vsel %vm2493_vm14, %v674_v10, 0.0 }
 0x161   :  { %v638_v27 = vadd.f32 %v2439_v43, %v618_v16  ;;  %v755_v28 = vadd.f32 %v744_v1, %v743_v18  ;;  %v748_v43 = vsel %vm2484_vm11, %v714_v12, 0.0  ;;  %v786_v41 = vmul.f32 %v714_v12, %v714_v12 }
 0x162   :  { %729 = vst [vmem:[%s2769_s2] sm:$0xff] %v721_v19  ;;  %v794_v31 = vsel %vm2493_vm14, %v782_v21, 0.0  ;;  %v762_v46 = vsel %vm756_vm13, %v748_v43, 0.0  ;;  %v718_v60 = vpop.f32.mrf.mxu3 }
 0x163   :  { %732 = vst.msk [vmem:[%s2769_s2 + $0x14] sm:$0xf] %vm129_vm0, %v724_v58  ;;  %v758_v33 = vadd.f32 %v757_v23, %v755_v28  ;;  %v784_v32 = vmul.f32 %v638_v27, %v638_v27  ;;  %v746_v40 = vsel %vm2488_vm12, %v638_v27, 0.0  ;;  %v805_v38 = vadd.f32 %v794_v31, %v793_v30 }
 0x164   :  { %v798_v57 = vsel %vm2484_vm11, %v786_v41, 0.0 }
 0x165   :  { %v656_v35 = vpop.f32.mrf.mxu2  ;;  %v697_v36 = vpop.f32.mrf.mxu1  ;;  %759 = vadd.xlane.f32.xlu1 %v758_v33  ;;  %v796_v54 = vsel %vm2488_vm12, %v784_v32, 0.0  ;;  %v811_v22 = vsel %vm756_vm13, %v798_v57, 0.0 }
 0x166   :  { %v676_v37 = vadd.f32 %v2422_v5, %v656_v35  ;;  %v717_v45 = vadd.f32 %v716_v24, %v697_v36  ;;  %v807_v5 = vadd.f32 %v806_v47, %v805_v38 }
 0x167   :  { %v621_v42 = vpop.f32.mrf.mxu0 }
 0x168   :  { %v723_v48 = vpack.c.bf16 %v676_v37, %v638_v27  ;;  %v785_v49 = vmul.f32 %v676_v37, %v676_v37  ;;  %v747_v50 = vsel %vm2493_vm14, %v676_v37, 0.0  ;;  %v726_v53 = vpack.c.bf16 %v717_v45, %v717_v45 }
 0x169   :  { %v761_v51 = vadd.f32 %v747_v50, %v746_v40  ;;  %v641_v55 = vadd.f32 %v2464_v52, %v621_v42  ;;  %v751_v52 = vsel %vm2484_vm11, %v717_v45, 0.0  ;;  %v789_v26 = vmul.f32 %v717_v45, %v717_v45 }
 0x16a   :  { %731 = vst [vmem:[%s2769_s2 + $0xc] sm:$0xff] %v723_v48  ;;  %v797_v39 = vsel %vm2493_vm14, %v785_v49, 0.0  ;;  %v767_v12 = vsel %vm756_vm13, %v751_v52, 0.0 }
 0x16b   :  { %v763_v56 = vadd.f32 %v762_v46, %v761_v51  ;;  %734 = vst.msk [vmem:[%s2769_s2 + $0x20] sm:$0xf] %vm129_vm0, %v726_v53  ;;  %v810_v62 = vadd.f32 %v797_v39, %v796_v54  ;;  %v787_v2 = vmul.f32 %v641_v55, %v641_v55  ;;  %v749_v3 = vsel %vm2488_vm12, %v641_v55, 0.0 }
 0x16c   :  { %v801_v20 = vsel %vm2484_vm11, %v789_v26, 0.0 }
 0x16d   :  { %764 = vadd.xlane.f32.xlu2 %v763_v56  ;;  %v659_v61 = vpop.f32.mrf.mxu2  ;;  %v699_v63 = vpop.f32.mrf.mxu1  ;;  %808 = vadd.xlane.f32.xlu1 %v807_v5  ;;  %v812_v10 = vadd.f32 %v811_v22, %v810_v62  ;;  %v816_v28 = vsel %vm756_vm13, %v801_v20, 0.0 }
 0x16e   :  { %v679_v44 = vadd.f32 %v2453_v59, %v659_v61  ;;  %v719_v29 = vadd.f32 %v718_v60, %v699_v63 }
 0x16f   :  { %v623_v11 = vpop.f32.mrf.mxu0 }
 0x170   :  { %v725_v0 = vpack.c.bf16 %v679_v44, %v641_v55  ;;  %v788_v4 = vmul.f32 %v679_v44, %v679_v44  ;;  %v643_v8 = vadd.f32 %v2472_v25, %v623_v11  ;;  %v728_v9 = vpack.c.bf16 %v719_v29, %v719_v29 }
 0x171   :  { %v750_v59 = vsel %vm2493_vm14, %v679_v44, 0.0  ;;  %v792_v15 = vmul.f32 %v719_v29, %v719_v29  ;;  %v799_v25 = vsel %vm2488_vm12, %v787_v2, 0.0  ;;  %v754_v21 = vsel %vm2484_vm11, %v719_v29, 0.0 }
 0x172   :  { %733 = vst [vmem:[%s2769_s2 + $0x18] sm:$0xff] %v725_v0  ;;  %v766_v17 = vadd.f32 %v750_v59, %v749_v3  ;;  %v800_v16 = vsel %vm2493_vm14, %v788_v4, 0.0  ;;  %v790_v18 = vmul.f32 %v643_v8, %v643_v8  ;;  %v752_v23 = vsel %vm2488_vm12, %v643_v8, 0.0 }
 0x173   :  { %736 = vst.msk [vmem:[%s2769_s2 + $0x2c] sm:$0xf] %vm129_vm0, %v728_v9  ;;  %v815_v24 = vadd.f32 %v800_v16, %v799_v25  ;;  %v772_v27 = vsel %vm756_vm13, %v754_v21, 0.0  ;;  %v804_v30 = vsel %vm2484_vm11, %v792_v15, 0.0 }
 0x174   :  { %v768_v19 = vadd.f32 %v767_v12, %v766_v17  ;;  %v821_v32 = vsel %vm756_vm13, %v804_v30, 0.0 }
 0x175   :  { %813 = vadd.xlane.f32.xlu2 %v812_v10  ;;  %v661_v58 = vpop.f32.mrf.mxu2  ;;  %v817_v43 = vadd.f32 %v816_v28, %v815_v24 }
 0x176   :  { %v681_v1 = vadd.f32 %v2469_v13, %v661_v58  ;;  %769 = vadd.xlane.f32.xlu0 %v768_v19  ;;  %v802_v13 = vsel %vm2488_vm12, %v790_v18, 0.0 }
 0x178   :  { %v727_v31 = vpack.c.bf16 %v681_v1, %v643_v8  ;;  %v791_v33 = vmul.f32 %v681_v1, %v681_v1  ;;  %v753_v34 = vsel %vm2493_vm14, %v681_v1, 0.0 }
 0x179   :  { %v771_v35 = vadd.f32 %v753_v34, %v752_v23 }
 0x17a   :  { %735 = vst [vmem:[%s2769_s2 + $0x24] sm:$0xff] %v727_v31  ;;  %v803_v36 = vsel %vm2493_vm14, %v791_v33, 0.0 }
 0x17b   :  { %v773_v37 = vadd.f32 %v772_v27, %v771_v35  ;;  %v820_v40 = vadd.f32 %v803_v36, %v802_v13 }
 0x17d   :  { %774 = vadd.xlane.f32.xlu2 %v773_v37  ;;  %v822_v38 = vadd.f32 %v821_v32, %v820_v40 }
 0x17e   :  { %818 = vadd.xlane.f32.xlu0 %v817_v43 }
 0x17f   :  { %823 = vadd.xlane.f32.xlu1 %v822_v38 }
 0x1a2   :  { %v1335_v41 = vpop.f32.mrf.mxu3  ;;  %v1330_v42 = vpop.f32.mrf.mxu2 }
 0x1aa   :  { %v1337_v45 = vpop.f32.mrf.mxu3  ;;  %v1332_v49 = vpop.f32.mrf.mxu2 }
 0x1af   :  { %v1311_v47 = vpop.f32.mrf.mxu0 }
 0x1b0   :  { %v1349_v48 = vpop.f32.mrf.mxu1  ;;  %v1331_v46 = vadd.f32 %v1330_v42, %v1311_v47 }
 0x1b2   :  { %v1368_v50 = vpop.f32.mrf.mxu3  ;;  %v1470_v8 = vmul.f32 %v1331_v46, %v1331_v46  ;;  %v1433_v18 = vsel %vm2488_vm12, %v1331_v46, 0.0 }
 0x1b3   :  { %v1369_v51 = vadd.f32 %v1368_v50, %v1349_v48  ;;  %v1406_v56 = vpop.f32.mrf.mxu2 }
 0x1b4   :  { %v1482_v19 = vsel %vm2488_vm12, %v1470_v8, 0.0 }
 0x1b5   :  { %v1416_v53 = vpack.c.bf16 %v1369_v51, %v1331_v46  ;;  %v1471_v11 = vmul.f32 %v1369_v51, %v1369_v51  ;;  %v1434_v59 = vsel %vm2493_vm14, %v1369_v51, 0.0 }
 0x1b6   :  { %v1445_v58 = vadd.f32 %v1434_v59, %v1433_v18 }
 0x1b7   :  { %1827 = vst [vmem:[%s2769_s2 + $0x30] sm:$0xff] %v1416_v53  ;;  %v1313_v5 = vpop.f32.mrf.mxu0  ;;  %v1483_v12 = vsel %vm2493_vm14, %v1471_v11, 0.0 }
 0x1b8   :  { %v1351_v54 = vpop.f32.mrf.mxu1  ;;  %v2586_v55 = vadd.f32 %v1332_v49, %v1313_v5  ;;  %v1494_v1 = vadd.f32 %v1483_v12, %v1482_v19 }
 0x1ba   :  { %v1370_v39 = vpop.f32.mrf.mxu3  ;;  %v1473_v13 = vmul.f32 %v2586_v55, %v2586_v55  ;;  %v1436_v50 = vsel %vm2488_vm12, %v2586_v55, 0.0 }
 0x1bb   :  { %v2588_v57 = vadd.f32 %v1370_v39, %v1351_v54  ;;  %v1408_v29 = vpop.f32.mrf.mxu2 }
 0x1bc   :  { %v1485_v46 = vsel %vm2488_vm12, %v1473_v13, 0.0 }
 0x1bd   :  { %v1418_v60 = vpack.c.bf16 %v2588_v57, %v2586_v55  ;;  %v1474_v21 = vmul.f32 %v2588_v57, %v2588_v57  ;;  %v1437_v38 = vsel %vm2493_vm14, %v2588_v57, 0.0 }
 0x1be   :  { %v1450_v5 = vadd.f32 %v1437_v38, %v1436_v50 }
 0x1bf   :  { %1829 = vst [vmem:[%s2769_s2 + $0x3c] sm:$0xff] %v1418_v60  ;;  %v1316_v61 = vpop.f32.mrf.mxu0 }
 0x1c0   :  { %v1354_v62 = vpop.f32.mrf.mxu1  ;;  %v2595_v44 = vadd.f32 %v1335_v41, %v1316_v61  ;;  %v1486_v41 = vsel %vm2493_vm14, %v1474_v21, 0.0 }
 0x1c1   :  { %v1499_v54 = vadd.f32 %v1486_v41, %v1485_v46 }
 0x1c2   :  { %v1373_v63 = vpop.f32.mrf.mxu3  ;;  %v1439_v27 = vsel %vm2488_vm12, %v2595_v44, 0.0 }
 0x1c3   :  { %v2597_v22 = vadd.f32 %v1373_v63, %v1354_v62  ;;  %v1411_v10 = vpop.f32.mrf.mxu2 }
 0x1c5   :  { %v1420_v52 = vpack.c.bf16 %v2597_v22, %v2595_v44  ;;  %v1440_v16 = vsel %vm2493_vm14, %v2597_v22, 0.0 }
 0x1c6   :  { %v1455_v33 = vadd.f32 %v1440_v16, %v1439_v27 }
 0x1c7   :  { %1831 = vst [vmem:[%s2769_s2 + $0x48] sm:$0xff] %v1420_v52  ;;  %v1318_v2 = vpop.f32.mrf.mxu0  ;;  %v1477_v52 = vmul.f32 %v2597_v22, %v2597_v22 }
 0x1c8   :  { %v1356_v26 = vpop.f32.mrf.mxu1  ;;  %v2604_v0 = vadd.f32 %v1337_v45, %v1318_v2 }
 0x1ca   :  { %v1375_v3 = vpop.f32.mrf.mxu3  ;;  %v1442_v53 = vsel %vm2488_vm12, %v2604_v0, 0.0  ;;  %v1479_v12 = vmul.f32 %v2604_v0, %v2604_v0 }
 0x1cb   :  { %v2606_v4 = vadd.f32 %v1375_v3, %v1356_v26  ;;  %v1413_v49 = vpop.f32.mrf.mxu2 }
 0x1cc   :  { %v1491_v14 = vsel %vm2488_vm12, %v1479_v12, 0.0 }
 0x1cd   :  { %v1422_v9 = vpack.c.bf16 %v2606_v4, %v2604_v0  ;;  %v1443_v45 = vsel %vm2493_vm14, %v2606_v4, 0.0  ;;  %v1480_v3 = vmul.f32 %v2606_v4, %v2606_v4 }
 0x1ce   :  { %v1460_v60 = vadd.f32 %v1443_v45, %v1442_v53 }
 0x1cf   :  { %1833 = vst [vmem:[%s2769_s2 + $0x54] sm:$0xff] %v1422_v9  ;;  %v1387_v17 = vpop.f32.mrf.mxu0  ;;  %v1476_v9 = vmul.f32 %v2595_v44, %v2595_v44  ;;  %v1492_v44 = vsel %vm2493_vm14, %v1480_v3, 0.0 }
 0x1d0   :  { %v1407_v15 = vadd.f32 %v1406_v56, %v1387_v17  ;;  %v1392_v25 = vpop.f32.mrf.mxu1  ;;  %v1489_v17 = vsel %vm2493_vm14, %v1477_v52, 0.0  ;;  %v1509_v21 = vadd.f32 %v1492_v44, %v1491_v14 }
 0x1d1   :  { %v1412_v20 = vadd.f32 %v1411_v10, %v1392_v25  ;;  %v1488_v16 = vsel %vm2488_vm12, %v1476_v9, 0.0 }
 0x1d2   :  { %v1417_v23 = vpack.c.bf16 %v1407_v15, %v1407_v15  ;;  %v1472_v24 = vmul.f32 %v1407_v15, %v1407_v15  ;;  %v1435_v28 = vsel %vm2484_vm11, %v1407_v15, 0.0  ;;  %v1504_v6 = vadd.f32 %v1489_v17, %v1488_v16 }
 0x1d3   :  { %v1421_v30 = vpack.c.bf16 %v1412_v20, %v1412_v20  ;;  %v1441_v31 = vsel %vm2484_vm11, %v1412_v20, 0.0  ;;  %v1446_v34 = vsel %vm756_vm13, %v1435_v28, 0.0  ;;  %v1478_v55 = vmul.f32 %v1412_v20, %v1412_v20 }
 0x1d4   :  { %1828 = vst.msk [vmem:[%s2769_s2 + $0x38] sm:$0xf] %vm129_vm0, %v1417_v23  ;;  %v1456_v35 = vsel %vm756_vm13, %v1441_v31, 0.0  ;;  %v1447_v43 = vadd.f32 %v1446_v34, %v1445_v58  ;;  %v1484_v36 = vsel %vm2484_vm11, %v1472_v24, 0.0 }
 0x1d5   :  { %1832 = vst.msk [vmem:[%s2769_s2 + $0x50] sm:$0xf] %vm129_vm0, %v1421_v30  ;;  %v1457_v32 = vadd.f32 %v1456_v35, %v1455_v33  ;;  %v1495_v37 = vsel %vm756_vm13, %v1484_v36, 0.0  ;;  %v1490_v4 = vsel %vm2484_vm11, %v1478_v55, 0.0 }
 0x1d6   :  { %1448 = vadd.xlane.f32.xlu2 %v1447_v43  ;;  %v1496_v40 = vadd.f32 %v1495_v37, %v1494_v1  ;;  %v1505_v18 = vsel %vm756_vm13, %v1490_v4, 0.0 }
 0x1d7   :  { %1458 = vadd.xlane.f32.xlu1 %v1457_v32  ;;  %v1389_v42 = vpop.f32.mrf.mxu0  ;;  %v1506_v20 = vadd.f32 %v1505_v18, %v1504_v6 }
 0x1d8   :  { %v1409_v47 = vadd.f32 %v1408_v29, %v1389_v42  ;;  %v1394_v48 = vpop.f32.mrf.mxu1  ;;  %1497 = vadd.xlane.f32.xlu0 %v1496_v40  ;;  %v760_v39 = vpop.xlane.xlu1 %759 }
 0x1d9   :  { %v1414_v51 = vadd.f32 %v1413_v49, %v1394_v48  ;;  %777 = vst.msk [vmem:[%s2770_s3] sm:$0xff] %vm776_vm15, %v760_v39 }
 0x1da   :  { %v1419_v56 = vpack.c.bf16 %v1409_v47, %v1409_v47  ;;  %v1475_v57 = vmul.f32 %v1409_v47, %v1409_v47  ;;  %v1438_v61 = vsel %vm2484_vm11, %v1409_v47, 0.0 }
 0x1db   :  { %v1423_v62 = vpack.c.bf16 %v1414_v51, %v1414_v51  ;;  %v1444_v63 = vsel %vm2484_vm11, %v1414_v51, 0.0  ;;  %v1451_v29 = vsel %vm756_vm13, %v1438_v61, 0.0  ;;  %v1481_v2 = vmul.f32 %v1414_v51, %v1414_v51 }
 0x1dc   :  { %1830 = vst.msk [vmem:[%s2769_s2 + $0x44] sm:$0xf] %vm129_vm0, %v1419_v56  ;;  %v1461_v26 = vsel %vm756_vm13, %v1444_v63, 0.0  ;;  %v1487_v11 = vsel %vm2484_vm11, %v1475_v57, 0.0  ;;  %v1452_v10 = vadd.f32 %v1451_v29, %v1450_v5 }
 0x1dd   :  { %1834 = vst.msk [vmem:[%s2769_s2 + $0x5c] sm:$0xf] %vm129_vm0, %v1423_v62  ;;  %v1462_v22 = vadd.f32 %v1461_v26, %v1460_v60  ;;  %v1500_v8 = vsel %vm756_vm13, %v1487_v11, 0.0  ;;  %v1493_v15 = vsel %vm2484_vm11, %v1481_v2, 0.0 }
 0x1de   :  { %v1501_v59 = vadd.f32 %v1500_v8, %v1499_v54  ;;  %v1510_v19 = vsel %vm756_vm13, %v1493_v15, 0.0 }
 0x1df   :  { %1463 = vadd.xlane.f32.xlu2 %v1462_v22  ;;  %v1511_v58 = vadd.f32 %v1510_v19, %v1509_v21 }
 0x1e0   :  { %1453 = vadd.xlane.f32.xlu0 %v1452_v10  ;;  %1502 = vadd.xlane.f32.xlu1 %v1501_v59  ;;  %v765_v25 = vpop.xlane.xlu2 %764  ;;  %v809_v0 = vpop.xlane.xlu1 %808 }
 0x1e1   :  { %778 = vst.msk [vmem:[%s2770_s3 + $0x8] sm:$0xff] %vm776_vm15, %v765_v25 }
 0x1e2   :  { %825 = vst.msk [vmem:[%s2771_s4] sm:$0xff] %vm776_vm15, %v809_v0 }
 0x1e7   :  { %1507 = vadd.xlane.f32.xlu2 %v1506_v20 }
 0x1e8   :  { %1512 = vadd.xlane.f32.xlu0 %v1511_v58  ;;  %v814_v1 = vpop.xlane.xlu2 %813 }
 0x1e9   :  { %826 = vst.msk [vmem:[%s2771_s4 + $0x8] sm:$0xff] %vm776_vm15, %v814_v1  ;;  %v770_v23 = vpop.xlane.xlu0 %769 }
 0x1ea   :  { %779 = vst.msk [vmem:[%s2770_s3 + $0x10] sm:$0xff] %vm776_vm15, %v770_v23 }
 0x1f0   :  { %v775_v7 = vpop.xlane.xlu2 %774 }
 0x1f1   :  { %780 = vst.msk [vmem:[%s2770_s3 + $0x18] sm:$0xff] %vm776_vm15, %v775_v7  ;;  %v819_v24 = vpop.xlane.xlu0 %818 }
 0x1f2   :  { %827 = vst.msk [vmem:[%s2771_s4 + $0x10] sm:$0xff] %vm776_vm15, %v819_v24  ;;  %v824_v27 = vpop.xlane.xlu1 %823 }
 0x1f3   :  { %828 = vst.msk [vmem:[%s2771_s4 + $0x18] sm:$0xff] %vm776_vm15, %v824_v27 }
 0x249   :  { %v1449_v28 = vpop.xlane.xlu2 %1448 }
 0x24a   :  { %v1459_v30 = vpop.xlane.xlu1 %1458  ;;  %1835 = vst.msk [vmem:[%s2770_s3 + $0x20] sm:$0xff] %vm776_vm15, %v1449_v28 }
 0x24b   :  { %1837 = vst.msk [vmem:[%s2770_s3 + $0x30] sm:$0xff] %vm776_vm15, %v1459_v30  ;;  %v1498_v31 = vpop.xlane.xlu0 %1497 }
 0x24c   :  { %1839 = vst.msk [vmem:[%s2771_s4 + $0x20] sm:$0xff] %vm776_vm15, %v1498_v31 }
 0x252   :  { %v1464_v33 = vpop.xlane.xlu2 %1463 }
 0x253   :  { %1838 = vst.msk [vmem:[%s2770_s3 + $0x38] sm:$0xff] %vm776_vm15, %v1464_v33  ;;  %v1454_v34 = vpop.xlane.xlu0 %1453  ;;  %v1503_v13 = vpop.xlane.xlu1 %1502 }
 0x254   :  { %1836 = vst.msk [vmem:[%s2770_s3 + $0x28] sm:$0xff] %vm776_vm15, %v1454_v34 }
 0x255   :  { %1840 = vst.msk [vmem:[%s2771_s4 + $0x28] sm:$0xff] %vm776_vm15, %v1503_v13 }
 0x25a   :  { %v1508_v35 = vpop.xlane.xlu2 %1507 }
 0x25b   :  { %1841 = vst.msk [vmem:[%s2771_s4 + $0x30] sm:$0xff] %vm776_vm15, %v1508_v35  ;;  %v1513_v43 = vpop.xlane.xlu0 %1512 }
 0x25c   :  { %1842 = vst.msk [vmem:[%s2771_s4 + $0x38] sm:$0xff] %vm776_vm15, %v1513_v43 }

</bundles_post_ra>
